<compile_context>
chip_gen: v7x
topology: tpu7x:2x2x1
jax: 0.10.0
libtpu: 0.0.40
codegen_flags: <defaults>
</compile_context>

<pallas_src>
import functools

import jax
import jax.numpy as jnp
from jax.experimental import pallas as pl
from jax.experimental.pallas import tpu as pltpu


def _round_up(x, m):
    return (x + m - 1) // m * m


def _vmem_bytes_2d(shape, itemsize=4):
    r, c = shape
    return _round_up(r, 8) * _round_up(c, 128) * itemsize


# -----------------------------------------------------------------------------
# Fused kernel: num_layers GRU layers + final Linear, one batch chunk per grid
# step.
# -----------------------------------------------------------------------------
def _make_gru_fc_kernel(num_layers, T, BB, H):
    # Partial unroll keeps the loop body visible to the LLO scheduler for long
    # T without blowing vreg pressure; fully unroll short sequences.
    unroll = True if T <= 32 else 8

    def kernel(*args):
        # args: x2d_ref, (wi, wh, bc, bhn) * num_layers, fc_w, fc_b, out_ref,
        #       gi_scratch, seq_scratch
        x_ref = args[0]  # (T*BB, Din), time-major rows (row t*BB + b)
        layer_refs = [args[1 + 4 * l: 1 + 4 * l + 4] for l in range(num_layers)]
        off = 1 + 4 * num_layers
        fcw_ref = args[off]          # (H, O)   (padded)
        fcb_ref = args[off + 1]      # (1, O)
        out_ref = args[off + 2]      # (BB, O)
        gi_s = args[off + 3]         # VMEM (T*BB, 3H) f32 : hoisted gate inputs
        seq_s = args[off + 4]        # VMEM (T*BB, H)  f32 : layer output sequence

        h_last = jnp.zeros((BB, H), jnp.float32)
        for l in range(num_layers):
            wi_ref, wh_ref, bc_ref, bhn_ref = layer_refs[l]

            # ---- hoisted input projection: ONE (T*BB, Din) @ (Din, 3H) matmul
            # TODO(synk): for very long T, chunk this projection over T-slices
            # so the (T*BB, 3H) scratch stays within v7x's 64 MiB VMEM.
            inp = x_ref[...] if l == 0 else seq_s[...]
            gi_s[...] = (
                jnp.dot(inp, wi_ref[...], preferred_element_type=jnp.float32)
                + bc_ref[...]
            )

            wh = wh_ref[...]                                  # (H, 3H), held across the loop
            bhn_b = jnp.broadcast_to(bhn_ref[...], (BB, H))   # hoisted broadcast
            write_seq = l < num_layers - 1                    # last layer only needs final h

            def step(t, h, wh=wh, bhn_b=bhn_b, write_seq=write_seq):
                row = pl.multiple_of(t * BB, BB)              # BB % 8 == 0 -> sublane aligned
                gi_t = gi_s[pl.ds(row, BB), :]                # (BB, 3H)
                gh = jnp.dot(h, wh, preferred_element_type=jnp.float32)  # (BB, 3H)
                r = jax.nn.sigmoid(gi_t[:, 0:H] + gh[:, 0:H])
                z = jax.nn.sigmoid(gi_t[:, H:2 * H] + gh[:, H:2 * H])
                n = jnp.tanh(gi_t[:, 2 * H:3 * H] + r * (gh[:, 2 * H:3 * H] + bhn_b))
                h_new = n + z * (h - n)                       # == (1-z)*n + z*h
                if write_seq:
                    seq_s[pl.ds(row, BB), :] = h_new
                return h_new

            h_last = jax.lax.fori_loop(
                0, T, step, jnp.zeros((BB, H), jnp.float32), unroll=unroll
            )
            # TODO(synk): inter-layer dropout (p=0.2) is train-mode only;
            # eval-mode semantics implemented (no dropout).

        # ---- fused final Linear on the last hidden state ----
        out_ref[...] = (
            jnp.dot(h_last, fcw_ref[...], preferred_element_type=jnp.float32)
            + fcb_ref[...]
        ).astype(out_ref.dtype)

    return kernel


# -----------------------------------------------------------------------------
# Parameter packing (with lane padding) for the fused kernel
# -----------------------------------------------------------------------------
def _pack_layer_params(params, num_layers, H, H_pad):
    """Per layer: Wi (Din,3Hp), Wh (Hp,3Hp), bc (1,3Hp)=[bir+bhr, biz+bhz, bin], bhn (1,Hp).

    Each gate block is zero-padded from H to H_pad columns; padded hidden lanes
    stay exactly 0 through the recurrence (sigmoid(0)=0.5, tanh(0)=0, 0+0.5*0=0).
    """
    flat = []
    for l in range(num_layers):
        wi = params["wi"][l]  # (3, Din, H), gate order r, z, n
        wh = params["wh"][l]  # (3, H, H)
        bi = params["bi"][l]  # (3, 1, H)
        bh = params["bh"][l]  # (3, 1, H)
        d_in = wi.shape[1]
        d_in_pad = H_pad if l > 0 else d_in  # layer>0 consumes the padded hidden

        def padw(w, rows_to):
            return jnp.pad(w, ((0, rows_to - w.shape[0]), (0, H_pad - H)))

        wi_g = [padw(wi[g], d_in_pad) for g in range(3)]
        wh_g = [padw(wh[g], H_pad) for g in range(3)]
        bi_g = [jnp.pad(bi[g], ((0, 0), (0, H_pad - H))) for g in range(3)]
        bh_g = [jnp.pad(bh[g], ((0, 0), (0, H_pad - H))) for g in range(3)]

        wi_c = jnp.concatenate(wi_g, axis=-1)                                  # (Din, 3Hp)
        wh_c = jnp.concatenate(wh_g, axis=-1)                                  # (Hp, 3Hp)
        bc = jnp.concatenate([bi_g[0] + bh_g[0], bi_g[1] + bh_g[1], bi_g[2]],
                             axis=-1)                                          # (1, 3Hp)
        bhn = bh_g[2]                                                          # (1, Hp)
        flat.extend([wi_c, wh_c, bc, bhn])
    return flat


# -----------------------------------------------------------------------------
# Forward wrapper (equivalent of GRUModel.forward)
# -----------------------------------------------------------------------------
@functools.partial(jax.jit, static_argnames=("num_layers",))
def gru_model_forward(x, params, num_layers):
    """x: (B, T, input_size) -> (B, output_size)."""
    B, T, D = x.shape
    H = params["wh"][0].shape[-1]
    O = params["fc_w"].shape[-1]

    # Lane/sublane padding: H, O -> multiple of 128 (lane-dense gate slices and
    # stores); batch chunk -> multiple of 8 (sublane-aligned per-step slices).
    H_pad = _round_up(H, 128)
    O_pad = _round_up(O, 128)
    B8 = _round_up(B, 8)
    BB = min(B8, 128)                       # batch chunk per grid step
    num_chunks = (B8 + BB - 1) // BB
    B_pad = num_chunks * BB

    # Layout plumbing in XLA (fused with the jit): pad batch, then build one
    # time-major 2-D slab per batch chunk -> (num_chunks, T*BB, D).
    xp = jnp.pad(x.astype(jnp.float32), ((0, B_pad - B), (0, 0), (0, 0)))
    x3 = xp.reshape(num_chunks, BB, T, D).transpose(0, 2, 1, 3).reshape(
        num_chunks, T * BB, D)

    flat = _pack_layer_params(params, num_layers, H, H_pad)
    fc_w = jnp.pad(params["fc_w"], ((0, H_pad - H), (0, O_pad - O)))
    fc_b = jnp.pad(params["fc_b"], ((0, 0), (0, O_pad - O)))

    # TODO(synk): at production sizes cast MXU operands (x3, seq scratch, Wi,
    # Wh, fc_w) to bf16 with f32 accumulation (halves VMEM/HBM, ~4x MXU rate on
    # v6e/v7x); kept f32 here to match the f32 reference at 1e-5.

    # Scoped-VMEM budget derived from the actual resident footprint
    # (pipeline double-buffers every input/output block) + headroom.
    est = 2 * _vmem_bytes_2d((T * BB, D))
    for w in flat:
        est += 2 * _vmem_bytes_2d(w.shape)
    est += 2 * _vmem_bytes_2d(fc_w.shape) + 2 * _vmem_bytes_2d(fc_b.shape)
    est += 2 * _vmem_bytes_2d((BB, O_pad))
    est += _vmem_bytes_2d((T * BB, 3 * H_pad)) + _vmem_bytes_2d((T * BB, H_pad))
    vmem_limit = int(min(max(est + (8 << 20), 16 << 20), 96 << 20))

    kernel = _make_gru_fc_kernel(num_layers, T, BB, H_pad)
    grid_spec = pltpu.PrefetchScalarGridSpec(
        num_scalar_prefetch=0,
        grid=(num_chunks,),  # independent sequences across batch chunks
        in_specs=(
            [pl.BlockSpec((None, T * BB, D), lambda b: (b, 0, 0))]
            + [pl.BlockSpec(w.shape, lambda b: (0, 0)) for w in flat]
            + [pl.BlockSpec(fc_w.shape, lambda b: (0, 0)),
               pl.BlockSpec(fc_b.shape, lambda b: (0, 0))]
        ),
        out_specs=pl.BlockSpec((BB, O_pad), lambda b: (b, 0)),
        scratch_shapes=[
            pltpu.VMEM((T * BB, 3 * H_pad), jnp.float32),  # hoisted gate inputs
            pltpu.VMEM((T * BB, H_pad), jnp.float32),      # inter-layer sequence
        ],
    )
    out = pl.pallas_call(
        kernel,
        out_shape=jax.ShapeDtypeStruct((B_pad, O_pad), jnp.float32),
        grid_spec=grid_spec,
        compiler_params=pltpu.CompilerParams(
            dimension_semantics=("parallel",),   # megacore-shardable on v7x
            vmem_limit_bytes=vmem_limit,
        ),
    )(x3, *flat, fc_w, fc_b)
    return out[:B, :O].astype(x.dtype)


# -----------------------------------------------------------------------------
# Deterministic parameter init (matches nn.GRU / nn.Linear shapes & init scale)
# -----------------------------------------------------------------------------
def init_params(key, input_size, hidden_size, num_layers, output_size):
    H = hidden_size
    bound = 1.0 / jnp.sqrt(jnp.float32(H))
    wi_list, wh_list, bi_list, bh_list = [], [], [], []
    for layer in range(num_layers):
        d_in = input_size if layer == 0 else hidden_size
        key, k1, k2, k3, k4 = jax.random.split(key, 5)
        # PyTorch weight_ih_l{k}: (3H, d_in); stored transposed per gate: (3, d_in, H)
        wi = jax.random.uniform(k1, (3, d_in, H), jnp.float32, -bound, bound)
        wh = jax.random.uniform(k2, (3, H, H), jnp.float32, -bound, bound)
        bi = jax.random.uniform(k3, (3, 1, H), jnp.float32, -bound, bound)
        bh = jax.random.uniform(k4, (3, 1, H), jnp.float32, -bound, bound)
        wi_list.append(wi)
        wh_list.append(wh)
        bi_list.append(bi)
        bh_list.append(bh)
    key, k5, k6 = jax.random.split(key, 3)
    fc_bound = 1.0 / jnp.sqrt(jnp.float32(H))
    fc_w = jax.random.uniform(k5, (H, output_size), jnp.float32, -fc_bound, fc_bound)
    fc_b = jax.random.uniform(k6, (1, output_size), jnp.float32, -fc_bound, fc_bound)
    return {
        "wi": wi_list,
        "wh": wh_list,
        "bi": bi_list,
        "bh": bh_list,
        "fc_w": fc_w,
        "fc_b": fc_b,
    }


# -----------------------------------------------------------------------------
# Pure-JAX reference (for correctness check)
# -----------------------------------------------------------------------------
def reference_forward(x, params, num_layers):
    B, T, _ = x.shape
    seq = x
    for layer in range(num_layers):
        wi, wh, bi, bh = (
            params["wi"][layer],
            params["wh"][layer],
            params["bi"][layer],
            params["bh"][layer],
        )
        H = wh.shape[-1]
        h = jnp.zeros((B, H), jnp.float32)
        outs = []
        for t in range(T):
            x_t = seq[:, t, :]
            gi = [x_t @ wi[g] + bi[g] for g in range(3)]
            gh = [h @ wh[g] + bh[g] for g in range(3)]
            r = jax.nn.sigmoid(gi[0] + gh[0])
            z = jax.nn.sigmoid(gi[1] + gh[1])
            n = jnp.tanh(gi[2] + r * gh[2])
            h = (1.0 - z) * n + z * h
            outs.append(h)
        seq = jnp.stack(outs, axis=1)
    return seq[:, -1, :] @ params["fc_w"] + params["fc_b"]


# -----------------------------------------------------------------------------
if __name__ == "__main__":
    input_size = 16
    hidden_size = 32
    num_layers = 2
    output_size = 8
    batch = 2
    seq_len = 8

    key = jax.random.PRNGKey(0)
    key, pkey, xkey = jax.random.split(key, 3)
    params = init_params(pkey, input_size, hidden_size, num_layers, output_size)
    x = jax.random.normal(xkey, (batch, seq_len, input_size), jnp.float32)

    out = gru_model_forward(x, params, num_layers=num_layers)
    out = jax.block_until_ready(out)

    ref = reference_forward(x, params, num_layers)
    assert out.shape == (batch, output_size)
    assert jnp.allclose(out, ref, atol=1e-5, rtol=1e-5), (
        f"mismatch: max abs diff {jnp.max(jnp.abs(out - ref))}"
    )

    print("KERNEL_OK")
</pallas_src>

<mosaic_0001>
module attributes {stable_mosaic.version = 11 : i64} {
  func.func @kernel(%arg0: i32, %arg1: memref<1x64x16xf32, #tpu.memory_space<vmem>>, %arg2: memref<16x384xf32, #tpu.memory_space<vmem>>, %arg3: memref<128x384xf32, #tpu.memory_space<vmem>>, %arg4: memref<1x384xf32, #tpu.memory_space<vmem>>, %arg5: memref<1x128xf32, #tpu.memory_space<vmem>>, %arg6: memref<128x384xf32, #tpu.memory_space<vmem>>, %arg7: memref<128x384xf32, #tpu.memory_space<vmem>>, %arg8: memref<1x384xf32, #tpu.memory_space<vmem>>, %arg9: memref<1x128xf32, #tpu.memory_space<vmem>>, %arg10: memref<128x128xf32, #tpu.memory_space<vmem>>, %arg11: memref<1x128xf32, #tpu.memory_space<vmem>>, %arg12: memref<8x128xf32, #tpu.memory_space<vmem>>, %arg13: memref<64x384xf32, #tpu.memory_space<vmem>>, %arg14: memref<64x128xf32, #tpu.memory_space<vmem>>) attributes {dimension_semantics = [#tpu.dimension_semantics<parallel>], iteration_bounds = array<i64: 1>, scalar_prefetch = 0 : i64, scratch_operands = 2 : i64, tpu.core_type = #tpu.core_type<tc>, window_params = [{transform_indices = @transform_0, window_bounds = array<i64: 1, 64, 16>}, {pipeline_mode = #tpu.pipeline_mode<synchronous>, transform_indices = @transform_1, window_bounds = array<i64: 16, 384>}, {pipeline_mode = #tpu.pipeline_mode<synchronous>, transform_indices = @transform_2, window_bounds = array<i64: 128, 384>}, {pipeline_mode = #tpu.pipeline_mode<synchronous>, transform_indices = @transform_3, window_bounds = array<i64: 1, 384>}, {pipeline_mode = #tpu.pipeline_mode<synchronous>, transform_indices = @transform_4, window_bounds = array<i64: 1, 128>}, {pipeline_mode = #tpu.pipeline_mode<synchronous>, transform_indices = @transform_5, window_bounds = array<i64: 128, 384>}, {pipeline_mode = #tpu.pipeline_mode<synchronous>, transform_indices = @transform_6, window_bounds = array<i64: 128, 384>}, {pipeline_mode = #tpu.pipeline_mode<synchronous>, transform_indices = @transform_7, window_bounds = array<i64: 1, 384>}, {pipeline_mode = #tpu.pipeline_mode<synchronous>, transform_indices = @transform_8, window_bounds = array<i64: 1, 128>}, {pipeline_mode = #tpu.pipeline_mode<synchronous>, transform_indices = @transform_9, window_bounds = array<i64: 128, 128>}, {pipeline_mode = #tpu.pipeline_mode<synchronous>, transform_indices = @transform_10, window_bounds = array<i64: 1, 128>}, {transform_indices = @transform_11, window_bounds = array<i64: 8, 128>}]} {
    %c0 = arith.constant 0 : index
    %c0_0 = arith.constant 0 : index
    %c0_1 = arith.constant 0 : index
    %0 = vector.load %arg1[%c0, %c0_0, %c0_1] : memref<1x64x16xf32, #tpu.memory_space<vmem>>, vector<1x64x16xf32>
    %1 = vector.shape_cast %0 : vector<1x64x16xf32> to vector<64x16xf32>
    %c0_2 = arith.constant 0 : index
    %c0_3 = arith.constant 0 : index
    %2 = vector.load %arg2[%c0_2, %c0_3] : memref<16x384xf32, #tpu.memory_space<vmem>>, vector<16x384xf32>
    %cst = arith.constant dense<0.000000e+00> : vector<64x384xf32>
    %3 = tpu.matmul %1, %2, %cst {dimension_numbers = #tpu.dot_dimension_numbers<[1], [0], [0], [1], [0, 0, 1, 1], [], []>} : vector<64x16xf32>, vector<16x384xf32>, vector<64x384xf32> -> vector<64x384xf32>
    %c0_4 = arith.constant 0 : index
    %c0_5 = arith.constant 0 : index
    %4 = vector.load %arg4[%c0_4, %c0_5] : memref<1x384xf32, #tpu.memory_space<vmem>>, vector<1x384xf32>
    %5 = vector.broadcast %4 : vector<1x384xf32> to vector<64x384xf32>
    %6 = arith.addf %3, %5 : vector<64x384xf32>
    %c0_6 = arith.constant 0 : index
    %c0_7 = arith.constant 0 : index
    %7 = vector.load %arg13[%c0_6, %c0_7] : memref<64x384xf32, #tpu.memory_space<vmem>>, vector<64x384xf32>
    tpu.vector_store %arg13[%c0_6, %c0_7], %6 {strides = array<i32>} : memref<64x384xf32, #tpu.memory_space<vmem>>, vector<64x384xf32>,
    %c0_8 = arith.constant 0 : index
    %c0_9 = arith.constant 0 : index
    %8 = vector.load %arg3[%c0_8, %c0_9] : memref<128x384xf32, #tpu.memory_space<vmem>>, vector<128x384xf32>
    %c0_10 = arith.constant 0 : index
    %c0_11 = arith.constant 0 : index
    %9 = vector.load %arg5[%c0_10, %c0_11] : memref<1x128xf32, #tpu.memory_space<vmem>>, vector<1x128xf32>
    %10 = vector.shape_cast %9 : vector<1x128xf32> to vector<1x128xf32>
    %11 = vector.broadcast %10 : vector<1x128xf32> to vector<8x128xf32>
    %cst_12 = arith.constant 0.000000e+00 : f32
    %12 = vector.broadcast %cst_12 : f32 to vector<8x128xf32>
    %c0_i32 = arith.constant 0 : i32
    %c8_i32 = arith.constant 8 : i32
    %13 = arith.muli %c0_i32, %c8_i32 : i32
    %14 = tpu.assume_multiple %13, 8 : i32
    %15 = arith.index_cast %14 : i32 to index
    %c0_13 = arith.constant 0 : index
    %16 = vector.load %arg13[%15, %c0_13] : memref<64x384xf32, #tpu.memory_space<vmem>>, vector<8x384xf32>
    %cst_14 = arith.constant dense<0.000000e+00> : vector<8x384xf32>
    %17 = tpu.matmul %12, %8, %cst_14 {dimension_numbers = #tpu.dot_dimension_numbers<[1], [0], [0], [1], [0, 0, 1, 1], [], []>} : vector<8x128xf32>, vector<128x384xf32>, vector<8x384xf32> -> vector<8x384xf32>
    %18 = vector.extract_strided_slice %16 {offsets = [0, 0], sizes = [8, 128], strides = [1, 1]} : vector<8x384xf32> to vector<8x128xf32>
    %19 = vector.extract_strided_slice %17 {offsets = [0, 0], sizes = [8, 128], strides = [1, 1]} : vector<8x384xf32> to vector<8x128xf32>
    %20 = arith.addf %18, %19 : vector<8x128xf32>
    %21 = arith.negf %20 : vector<8x128xf32>
    %22 = math.exp %21 : vector<8x128xf32>
    %cst_15 = arith.constant 1.000000e+00 : f32
    %23 = vector.broadcast %cst_15 : f32 to vector<8x128xf32>
    %24 = arith.addf %23, %22 : vector<8x128xf32>
    %25 = arith.divf %23, %24 : vector<8x128xf32>
    %26 = vector.extract_strided_slice %16 {offsets = [0, 128], sizes = [8, 128], strides = [1, 1]} : vector<8x384xf32> to vector<8x128xf32>
    %27 = vector.extract_strided_slice %17 {offsets = [0, 128], sizes = [8, 128], strides = [1, 1]} : vector<8x384xf32> to vector<8x128xf32>
    %28 = arith.addf %26, %27 : vector<8x128xf32>
    %29 = arith.negf %28 : vector<8x128xf32>
    %30 = math.exp %29 : vector<8x128xf32>
    %cst_16 = arith.constant 1.000000e+00 : f32
    %31 = vector.broadcast %cst_16 : f32 to vector<8x128xf32>
    %32 = arith.addf %31, %30 : vector<8x128xf32>
    %33 = arith.divf %31, %32 : vector<8x128xf32>
    %34 = vector.extract_strided_slice %16 {offsets = [0, 256], sizes = [8, 128], strides = [1, 1]} : vector<8x384xf32> to vector<8x128xf32>
    %35 = vector.extract_strided_slice %17 {offsets = [0, 256], sizes = [8, 128], strides = [1, 1]} : vector<8x384xf32> to vector<8x128xf32>
    %36 = arith.addf %35, %11 : vector<8x128xf32>
    %37 = arith.mulf %25, %36 : vector<8x128xf32>
    %38 = arith.addf %34, %37 : vector<8x128xf32>
    %39 = math.tanh %38 : vector<8x128xf32>
    %40 = arith.subf %12, %39 : vector<8x128xf32>
    %41 = arith.mulf %33, %40 : vector<8x128xf32>
    %42 = arith.addf %39, %41 : vector<8x128xf32>
    %43 = arith.index_cast %14 : i32 to index
    %c0_17 = arith.constant 0 : index
    %44 = vector.load %arg14[%43, %c0_17] : memref<64x128xf32, #tpu.memory_space<vmem>>, vector<8x128xf32>
    tpu.vector_store %arg14[%43, %c0_17], %42 {strides = array<i32>} : memref<64x128xf32, #tpu.memory_space<vmem>>, vector<8x128xf32>,
    %c1_i32 = arith.constant 1 : i32
    %c8_i32_18 = arith.constant 8 : i32
    %45 = arith.muli %c1_i32, %c8_i32_18 : i32
    %46 = tpu.assume_multiple %45, 8 : i32
    %47 = arith.index_cast %46 : i32 to index
    %c0_19 = arith.constant 0 : index
    %48 = vector.load %arg13[%47, %c0_19] : memref<64x384xf32, #tpu.memory_space<vmem>>, vector<8x384xf32>
    %cst_20 = arith.constant dense<0.000000e+00> : vector<8x384xf32>
    %49 = tpu.matmul %42, %8, %cst_20 {dimension_numbers = #tpu.dot_dimension_numbers<[1], [0], [0], [1], [0, 0, 1, 1], [], []>} : vector<8x128xf32>, vector<128x384xf32>, vector<8x384xf32> -> vector<8x384xf32>
    %50 = vector.extract_strided_slice %48 {offsets = [0, 0], sizes = [8, 128], strides = [1, 1]} : vector<8x384xf32> to vector<8x128xf32>
    %51 = vector.extract_strided_slice %49 {offsets = [0, 0], sizes = [8, 128], strides = [1, 1]} : vector<8x384xf32> to vector<8x128xf32>
    %52 = arith.addf %50, %51 : vector<8x128xf32>
    %53 = arith.negf %52 : vector<8x128xf32>
    %54 = math.exp %53 : vector<8x128xf32>
    %cst_21 = arith.constant 1.000000e+00 : f32
    %55 = vector.broadcast %cst_21 : f32 to vector<8x128xf32>
    %56 = arith.addf %55, %54 : vector<8x128xf32>
    %57 = arith.divf %55, %56 : vector<8x128xf32>
    %58 = vector.extract_strided_slice %48 {offsets = [0, 128], sizes = [8, 128], strides = [1, 1]} : vector<8x384xf32> to vector<8x128xf32>
    %59 = vector.extract_strided_slice %49 {offsets = [0, 128], sizes = [8, 128], strides = [1, 1]} : vector<8x384xf32> to vector<8x128xf32>
    %60 = arith.addf %58, %59 : vector<8x128xf32>
    %61 = arith.negf %60 : vector<8x128xf32>
    %62 = math.exp %61 : vector<8x128xf32>
    %cst_22 = arith.constant 1.000000e+00 : f32
    %63 = vector.broadcast %cst_22 : f32 to vector<8x128xf32>
    %64 = arith.addf %63, %62 : vector<8x128xf32>
    %65 = arith.divf %63, %64 : vector<8x128xf32>
    %66 = vector.extract_strided_slice %48 {offsets = [0, 256], sizes = [8, 128], strides = [1, 1]} : vector<8x384xf32> to vector<8x128xf32>
    %67 = vector.extract_strided_slice %49 {offsets = [0, 256], sizes = [8, 128], strides = [1, 1]} : vector<8x384xf32> to vector<8x128xf32>
    %68 = arith.addf %67, %11 : vector<8x128xf32>
    %69 = arith.mulf %57, %68 : vector<8x128xf32>
    %70 = arith.addf %66, %69 : vector<8x128xf32>
    %71 = math.tanh %70 : vector<8x128xf32>
    %72 = arith.subf %42, %71 : vector<8x128xf32>
    %73 = arith.mulf %65, %72 : vector<8x128xf32>
    %74 = arith.addf %71, %73 : vector<8x128xf32>
    %75 = arith.index_cast %46 : i32 to index
    %c0_23 = arith.constant 0 : index
    %76 = vector.load %arg14[%75, %c0_23] : memref<64x128xf32, #tpu.memory_space<vmem>>, vector<8x128xf32>
    tpu.vector_store %arg14[%75, %c0_23], %74 {strides = array<i32>} : memref<64x128xf32, #tpu.memory_space<vmem>>, vector<8x128xf32>,
    %c2_i32 = arith.constant 2 : i32
    %c8_i32_24 = arith.constant 8 : i32
    %77 = arith.muli %c2_i32, %c8_i32_24 : i32
    %78 = tpu.assume_multiple %77, 8 : i32
    %79 = arith.index_cast %78 : i32 to index
    %c0_25 = arith.constant 0 : index
    %80 = vector.load %arg13[%79, %c0_25] : memref<64x384xf32, #tpu.memory_space<vmem>>, vector<8x384xf32>
    %cst_26 = arith.constant dense<0.000000e+00> : vector<8x384xf32>
    %81 = tpu.matmul %74, %8, %cst_26 {dimension_numbers = #tpu.dot_dimension_numbers<[1], [0], [0], [1], [0, 0, 1, 1], [], []>} : vector<8x128xf32>, vector<128x384xf32>, vector<8x384xf32> -> vector<8x384xf32>
    %82 = vector.extract_strided_slice %80 {offsets = [0, 0], sizes = [8, 128], strides = [1, 1]} : vector<8x384xf32> to vector<8x128xf32>
    %83 = vector.extract_strided_slice %81 {offsets = [0, 0], sizes = [8, 128], strides = [1, 1]} : vector<8x384xf32> to vector<8x128xf32>
    %84 = arith.addf %82, %83 : vector<8x128xf32>
    %85 = arith.negf %84 : vector<8x128xf32>
    %86 = math.exp %85 : vector<8x128xf32>
    %cst_27 = arith.constant 1.000000e+00 : f32
    %87 = vector.broadcast %cst_27 : f32 to vector<8x128xf32>
    %88 = arith.addf %87, %86 : vector<8x128xf32>
    %89 = arith.divf %87, %88 : vector<8x128xf32>
    %90 = vector.extract_strided_slice %80 {offsets = [0, 128], sizes = [8, 128], strides = [1, 1]} : vector<8x384xf32> to vector<8x128xf32>
    %91 = vector.extract_strided_slice %81 {offsets = [0, 128], sizes = [8, 128], strides = [1, 1]} : vector<8x384xf32> to vector<8x128xf32>
    %92 = arith.addf %90, %91 : vector<8x128xf32>
    %93 = arith.negf %92 : vector<8x128xf32>
    %94 = math.exp %93 : vector<8x128xf32>
    %cst_28 = arith.constant 1.000000e+00 : f32
    %95 = vector.broadcast %cst_28 : f32 to vector<8x128xf32>
    %96 = arith.addf %95, %94 : vector<8x128xf32>
    %97 = arith.divf %95, %96 : vector<8x128xf32>
    %98 = vector.extract_strided_slice %80 {offsets = [0, 256], sizes = [8, 128], strides = [1, 1]} : vector<8x384xf32> to vector<8x128xf32>
    %99 = vector.extract_strided_slice %81 {offsets = [0, 256], sizes = [8, 128], strides = [1, 1]} : vector<8x384xf32> to vector<8x128xf32>
    %100 = arith.addf %99, %11 : vector<8x128xf32>
    %101 = arith.mulf %89, %100 : vector<8x128xf32>
    %102 = arith.addf %98, %101 : vector<8x128xf32>
    %103 = math.tanh %102 : vector<8x128xf32>
    %104 = arith.subf %74, %103 : vector<8x128xf32>
    %105 = arith.mulf %97, %104 : vector<8x128xf32>
    %106 = arith.addf %103, %105 : vector<8x128xf32>
    %107 = arith.index_cast %78 : i32 to index
    %c0_29 = arith.constant 0 : index
    %108 = vector.load %arg14[%107, %c0_29] : memref<64x128xf32, #tpu.memory_space<vmem>>, vector<8x128xf32>
    tpu.vector_store %arg14[%107, %c0_29], %106 {strides = array<i32>} : memref<64x128xf32, #tpu.memory_space<vmem>>, vector<8x128xf32>,
    %c3_i32 = arith.constant 3 : i32
    %c8_i32_30 = arith.constant 8 : i32
    %109 = arith.muli %c3_i32, %c8_i32_30 : i32
    %110 = tpu.assume_multiple %109, 8 : i32
    %111 = arith.index_cast %110 : i32 to index
    %c0_31 = arith.constant 0 : index
    %112 = vector.load %arg13[%111, %c0_31] : memref<64x384xf32, #tpu.memory_space<vmem>>, vector<8x384xf32>
    %cst_32 = arith.constant dense<0.000000e+00> : vector<8x384xf32>
    %113 = tpu.matmul %106, %8, %cst_32 {dimension_numbers = #tpu.dot_dimension_numbers<[1], [0], [0], [1], [0, 0, 1, 1], [], []>} : vector<8x128xf32>, vector<128x384xf32>, vector<8x384xf32> -> vector<8x384xf32>
    %114 = vector.extract_strided_slice %112 {offsets = [0, 0], sizes = [8, 128], strides = [1, 1]} : vector<8x384xf32> to vector<8x128xf32>
    %115 = vector.extract_strided_slice %113 {offsets = [0, 0], sizes = [8, 128], strides = [1, 1]} : vector<8x384xf32> to vector<8x128xf32>
    %116 = arith.addf %114, %115 : vector<8x128xf32>
    %117 = arith.negf %116 : vector<8x128xf32>
    %118 = math.exp %117 : vector<8x128xf32>
    %cst_33 = arith.constant 1.000000e+00 : f32
    %119 = vector.broadcast %cst_33 : f32 to vector<8x128xf32>
    %120 = arith.addf %119, %118 : vector<8x128xf32>
    %121 = arith.divf %119, %120 : vector<8x128xf32>
    %122 = vector.extract_strided_slice %112 {offsets = [0, 128], sizes = [8, 128], strides = [1, 1]} : vector<8x384xf32> to vector<8x128xf32>
    %123 = vector.extract_strided_slice %113 {offsets = [0, 128], sizes = [8, 128], strides = [1, 1]} : vector<8x384xf32> to vector<8x128xf32>
    %124 = arith.addf %122, %123 : vector<8x128xf32>
    %125 = arith.negf %124 : vector<8x128xf32>
    %126 = math.exp %125 : vector<8x128xf32>
    %cst_34 = arith.constant 1.000000e+00 : f32
    %127 = vector.broadcast %cst_34 : f32 to vector<8x128xf32>
    %128 = arith.addf %127, %126 : vector<8x128xf32>
    %129 = arith.divf %127, %128 : vector<8x128xf32>
    %130 = vector.extract_strided_slice %112 {offsets = [0, 256], sizes = [8, 128], strides = [1, 1]} : vector<8x384xf32> to vector<8x128xf32>
    %131 = vector.extract_strided_slice %113 {offsets = [0, 256], sizes = [8, 128], strides = [1, 1]} : vector<8x384xf32> to vector<8x128xf32>
    %132 = arith.addf %131, %11 : vector<8x128xf32>
    %133 = arith.mulf %121, %132 : vector<8x128xf32>
    %134 = arith.addf %130, %133 : vector<8x128xf32>
    %135 = math.tanh %134 : vector<8x128xf32>
    %136 = arith.subf %106, %135 : vector<8x128xf32>
    %137 = arith.mulf %129, %136 : vector<8x128xf32>
    %138 = arith.addf %135, %137 : vector<8x128xf32>
    %139 = arith.index_cast %110 : i32 to index
    %c0_35 = arith.constant 0 : index
    %140 = vector.load %arg14[%139, %c0_35] : memref<64x128xf32, #tpu.memory_space<vmem>>, vector<8x128xf32>
    tpu.vector_store %arg14[%139, %c0_35], %138 {strides = array<i32>} : memref<64x128xf32, #tpu.memory_space<vmem>>, vector<8x128xf32>,
    %c4_i32 = arith.constant 4 : i32
    %c8_i32_36 = arith.constant 8 : i32
    %141 = arith.muli %c4_i32, %c8_i32_36 : i32
    %142 = tpu.assume_multiple %141, 8 : i32
    %143 = arith.index_cast %142 : i32 to index
    %c0_37 = arith.constant 0 : index
    %144 = vector.load %arg13[%143, %c0_37] : memref<64x384xf32, #tpu.memory_space<vmem>>, vector<8x384xf32>
    %cst_38 = arith.constant dense<0.000000e+00> : vector<8x384xf32>
    %145 = tpu.matmul %138, %8, %cst_38 {dimension_numbers = #tpu.dot_dimension_numbers<[1], [0], [0], [1], [0, 0, 1, 1], [], []>} : vector<8x128xf32>, vector<128x384xf32>, vector<8x384xf32> -> vector<8x384xf32>
    %146 = vector.extract_strided_slice %144 {offsets = [0, 0], sizes = [8, 128], strides = [1, 1]} : vector<8x384xf32> to vector<8x128xf32>
    %147 = vector.extract_strided_slice %145 {offsets = [0, 0], sizes = [8, 128], strides = [1, 1]} : vector<8x384xf32> to vector<8x128xf32>
    %148 = arith.addf %146, %147 : vector<8x128xf32>
    %149 = arith.negf %148 : vector<8x128xf32>
    %150 = math.exp %149 : vector<8x128xf32>
    %cst_39 = arith.constant 1.000000e+00 : f32
    %151 = vector.broadcast %cst_39 : f32 to vector<8x128xf32>
    %152 = arith.addf %151, %150 : vector<8x128xf32>
    %153 = arith.divf %151, %152 : vector<8x128xf32>
    %154 = vector.extract_strided_slice %144 {offsets = [0, 128], sizes = [8, 128], strides = [1, 1]} : vector<8x384xf32> to vector<8x128xf32>
    %155 = vector.extract_strided_slice %145 {offsets = [0, 128], sizes = [8, 128], strides = [1, 1]} : vector<8x384xf32> to vector<8x128xf32>
    %156 = arith.addf %154, %155 : vector<8x128xf32>
    %157 = arith.negf %156 : vector<8x128xf32>
    %158 = math.exp %157 : vector<8x128xf32>
    %cst_40 = arith.constant 1.000000e+00 : f32
    %159 = vector.broadcast %cst_40 : f32 to vector<8x128xf32>
    %160 = arith.addf %159, %158 : vector<8x128xf32>
    %161 = arith.divf %159, %160 : vector<8x128xf32>
    %162 = vector.extract_strided_slice %144 {offsets = [0, 256], sizes = [8, 128], strides = [1, 1]} : vector<8x384xf32> to vector<8x128xf32>
    %163 = vector.extract_strided_slice %145 {offsets = [0, 256], sizes = [8, 128], strides = [1, 1]} : vector<8x384xf32> to vector<8x128xf32>
    %164 = arith.addf %163, %11 : vector<8x128xf32>
    %165 = arith.mulf %153, %164 : vector<8x128xf32>
    %166 = arith.addf %162, %165 : vector<8x128xf32>
    %167 = math.tanh %166 : vector<8x128xf32>
    %168 = arith.subf %138, %167 : vector<8x128xf32>
    %169 = arith.mulf %161, %168 : vector<8x128xf32>
    %170 = arith.addf %167, %169 : vector<8x128xf32>
    %171 = arith.index_cast %142 : i32 to index
    %c0_41 = arith.constant 0 : index
    %172 = vector.load %arg14[%171, %c0_41] : memref<64x128xf32, #tpu.memory_space<vmem>>, vector<8x128xf32>
    tpu.vector_store %arg14[%171, %c0_41], %170 {strides = array<i32>} : memref<64x128xf32, #tpu.memory_space<vmem>>, vector<8x128xf32>,
    %c5_i32 = arith.constant 5 : i32
    %c8_i32_42 = arith.constant 8 : i32
    %173 = arith.muli %c5_i32, %c8_i32_42 : i32
    %174 = tpu.assume_multiple %173, 8 : i32
    %175 = arith.index_cast %174 : i32 to index
    %c0_43 = arith.constant 0 : index
    %176 = vector.load %arg13[%175, %c0_43] : memref<64x384xf32, #tpu.memory_space<vmem>>, vector<8x384xf32>
    %cst_44 = arith.constant dense<0.000000e+00> : vector<8x384xf32>
    %177 = tpu.matmul %170, %8, %cst_44 {dimension_numbers = #tpu.dot_dimension_numbers<[1], [0], [0], [1], [0, 0, 1, 1], [], []>} : vector<8x128xf32>, vector<128x384xf32>, vector<8x384xf32> -> vector<8x384xf32>
    %178 = vector.extract_strided_slice %176 {offsets = [0, 0], sizes = [8, 128], strides = [1, 1]} : vector<8x384xf32> to vector<8x128xf32>
    %179 = vector.extract_strided_slice %177 {offsets = [0, 0], sizes = [8, 128], strides = [1, 1]} : vector<8x384xf32> to vector<8x128xf32>
    %180 = arith.addf %178, %179 : vector<8x128xf32>
    %181 = arith.negf %180 : vector<8x128xf32>
    %182 = math.exp %181 : vector<8x128xf32>
    %cst_45 = arith.constant 1.000000e+00 : f32
    %183 = vector.broadcast %cst_45 : f32 to vector<8x128xf32>
    %184 = arith.addf %183, %182 : vector<8x128xf32>
    %185 = arith.divf %183, %184 : vector<8x128xf32>
    %186 = vector.extract_strided_slice %176 {offsets = [0, 128], sizes = [8, 128], strides = [1, 1]} : vector<8x384xf32> to vector<8x128xf32>
    %187 = vector.extract_strided_slice %177 {offsets = [0, 128], sizes = [8, 128], strides = [1, 1]} : vector<8x384xf32> to vector<8x128xf32>
    %188 = arith.addf %186, %187 : vector<8x128xf32>
    %189 = arith.negf %188 : vector<8x128xf32>
    %190 = math.exp %189 : vector<8x128xf32>
    %cst_46 = arith.constant 1.000000e+00 : f32
    %191 = vector.broadcast %cst_46 : f32 to vector<8x128xf32>
    %192 = arith.addf %191, %190 : vector<8x128xf32>
    %193 = arith.divf %191, %192 : vector<8x128xf32>
    %194 = vector.extract_strided_slice %176 {offsets = [0, 256], sizes = [8, 128], strides = [1, 1]} : vector<8x384xf32> to vector<8x128xf32>
    %195 = vector.extract_strided_slice %177 {offsets = [0, 256], sizes = [8, 128], strides = [1, 1]} : vector<8x384xf32> to vector<8x128xf32>
    %196 = arith.addf %195, %11 : vector<8x128xf32>
    %197 = arith.mulf %185, %196 : vector<8x128xf32>
    %198 = arith.addf %194, %197 : vector<8x128xf32>
    %199 = math.tanh %198 : vector<8x128xf32>
    %200 = arith.subf %170, %199 : vector<8x128xf32>
    %201 = arith.mulf %193, %200 : vector<8x128xf32>
    %202 = arith.addf %199, %201 : vector<8x128xf32>
    %203 = arith.index_cast %174 : i32 to index
    %c0_47 = arith.constant 0 : index
    %204 = vector.load %arg14[%203, %c0_47] : memref<64x128xf32, #tpu.memory_space<vmem>>, vector<8x128xf32>
    tpu.vector_store %arg14[%203, %c0_47], %202 {strides = array<i32>} : memref<64x128xf32, #tpu.memory_space<vmem>>, vector<8x128xf32>,
    %c6_i32 = arith.constant 6 : i32
    %c8_i32_48 = arith.constant 8 : i32
    %205 = arith.muli %c6_i32, %c8_i32_48 : i32
    %206 = tpu.assume_multiple %205, 8 : i32
    %207 = arith.index_cast %206 : i32 to index
    %c0_49 = arith.constant 0 : index
    %208 = vector.load %arg13[%207, %c0_49] : memref<64x384xf32, #tpu.memory_space<vmem>>, vector<8x384xf32>
    %cst_50 = arith.constant dense<0.000000e+00> : vector<8x384xf32>
    %209 = tpu.matmul %202, %8, %cst_50 {dimension_numbers = #tpu.dot_dimension_numbers<[1], [0], [0], [1], [0, 0, 1, 1], [], []>} : vector<8x128xf32>, vector<128x384xf32>, vector<8x384xf32> -> vector<8x384xf32>
    %210 = vector.extract_strided_slice %208 {offsets = [0, 0], sizes = [8, 128], strides = [1, 1]} : vector<8x384xf32> to vector<8x128xf32>
    %211 = vector.extract_strided_slice %209 {offsets = [0, 0], sizes = [8, 128], strides = [1, 1]} : vector<8x384xf32> to vector<8x128xf32>
    %212 = arith.addf %210, %211 : vector<8x128xf32>
    %213 = arith.negf %212 : vector<8x128xf32>
    %214 = math.exp %213 : vector<8x128xf32>
    %cst_51 = arith.constant 1.000000e+00 : f32
    %215 = vector.broadcast %cst_51 : f32 to vector<8x128xf32>
    %216 = arith.addf %215, %214 : vector<8x128xf32>
    %217 = arith.divf %215, %216 : vector<8x128xf32>
    %218 = vector.extract_strided_slice %208 {offsets = [0, 128], sizes = [8, 128], strides = [1, 1]} : vector<8x384xf32> to vector<8x128xf32>
    %219 = vector.extract_strided_slice %209 {offsets = [0, 128], sizes = [8, 128], strides = [1, 1]} : vector<8x384xf32> to vector<8x128xf32>
    %220 = arith.addf %218, %219 : vector<8x128xf32>
    %221 = arith.negf %220 : vector<8x128xf32>
    %222 = math.exp %221 : vector<8x128xf32>
    %cst_52 = arith.constant 1.000000e+00 : f32
    %223 = vector.broadcast %cst_52 : f32 to vector<8x128xf32>
    %224 = arith.addf %223, %222 : vector<8x128xf32>
    %225 = arith.divf %223, %224 : vector<8x128xf32>
    %226 = vector.extract_strided_slice %208 {offsets = [0, 256], sizes = [8, 128], strides = [1, 1]} : vector<8x384xf32> to vector<8x128xf32>
    %227 = vector.extract_strided_slice %209 {offsets = [0, 256], sizes = [8, 128], strides = [1, 1]} : vector<8x384xf32> to vector<8x128xf32>
    %228 = arith.addf %227, %11 : vector<8x128xf32>
    %229 = arith.mulf %217, %228 : vector<8x128xf32>
    %230 = arith.addf %226, %229 : vector<8x128xf32>
    %231 = math.tanh %230 : vector<8x128xf32>
    %232 = arith.subf %202, %231 : vector<8x128xf32>
    %233 = arith.mulf %225, %232 : vector<8x128xf32>
    %234 = arith.addf %231, %233 : vector<8x128xf32>
    %235 = arith.index_cast %206 : i32 to index
    %c0_53 = arith.constant 0 : index
    %236 = vector.load %arg14[%235, %c0_53] : memref<64x128xf32, #tpu.memory_space<vmem>>, vector<8x128xf32>
    tpu.vector_store %arg14[%235, %c0_53], %234 {strides = array<i32>} : memref<64x128xf32, #tpu.memory_space<vmem>>, vector<8x128xf32>,
    %c7_i32 = arith.constant 7 : i32
    %c8_i32_54 = arith.constant 8 : i32
    %237 = arith.muli %c7_i32, %c8_i32_54 : i32
    %238 = tpu.assume_multiple %237, 8 : i32
    %239 = arith.index_cast %238 : i32 to index
    %c0_55 = arith.constant 0 : index
    %240 = vector.load %arg13[%239, %c0_55] : memref<64x384xf32, #tpu.memory_space<vmem>>, vector<8x384xf32>
    %cst_56 = arith.constant dense<0.000000e+00> : vector<8x384xf32>
    %241 = tpu.matmul %234, %8, %cst_56 {dimension_numbers = #tpu.dot_dimension_numbers<[1], [0], [0], [1], [0, 0, 1, 1], [], []>} : vector<8x128xf32>, vector<128x384xf32>, vector<8x384xf32> -> vector<8x384xf32>
    %242 = vector.extract_strided_slice %240 {offsets = [0, 0], sizes = [8, 128], strides = [1, 1]} : vector<8x384xf32> to vector<8x128xf32>
    %243 = vector.extract_strided_slice %241 {offsets = [0, 0], sizes = [8, 128], strides = [1, 1]} : vector<8x384xf32> to vector<8x128xf32>
    %244 = arith.addf %242, %243 : vector<8x128xf32>
    %245 = arith.negf %244 : vector<8x128xf32>
    %246 = math.exp %245 : vector<8x128xf32>
    %cst_57 = arith.constant 1.000000e+00 : f32
    %247 = vector.broadcast %cst_57 : f32 to vector<8x128xf32>
    %248 = arith.addf %247, %246 : vector<8x128xf32>
    %249 = arith.divf %247, %248 : vector<8x128xf32>
    %250 = vector.extract_strided_slice %240 {offsets = [0, 128], sizes = [8, 128], strides = [1, 1]} : vector<8x384xf32> to vector<8x128xf32>
    %251 = vector.extract_strided_slice %241 {offsets = [0, 128], sizes = [8, 128], strides = [1, 1]} : vector<8x384xf32> to vector<8x128xf32>
    %252 = arith.addf %250, %251 : vector<8x128xf32>
    %253 = arith.negf %252 : vector<8x128xf32>
    %254 = math.exp %253 : vector<8x128xf32>
    %cst_58 = arith.constant 1.000000e+00 : f32
    %255 = vector.broadcast %cst_58 : f32 to vector<8x128xf32>
    %256 = arith.addf %255, %254 : vector<8x128xf32>
    %257 = arith.divf %255, %256 : vector<8x128xf32>
    %258 = vector.extract_strided_slice %240 {offsets = [0, 256], sizes = [8, 128], strides = [1, 1]} : vector<8x384xf32> to vector<8x128xf32>
    %259 = vector.extract_strided_slice %241 {offsets = [0, 256], sizes = [8, 128], strides = [1, 1]} : vector<8x384xf32> to vector<8x128xf32>
    %260 = arith.addf %259, %11 : vector<8x128xf32>
    %261 = arith.mulf %249, %260 : vector<8x128xf32>
    %262 = arith.addf %258, %261 : vector<8x128xf32>
    %263 = math.tanh %262 : vector<8x128xf32>
    %264 = arith.subf %234, %263 : vector<8x128xf32>
    %265 = arith.mulf %257, %264 : vector<8x128xf32>
    %266 = arith.addf %263, %265 : vector<8x128xf32>
    %267 = arith.index_cast %238 : i32 to index
    %c0_59 = arith.constant 0 : index
    %268 = vector.load %arg14[%267, %c0_59] : memref<64x128xf32, #tpu.memory_space<vmem>>, vector<8x128xf32>
    tpu.vector_store %arg14[%267, %c0_59], %266 {strides = array<i32>} : memref<64x128xf32, #tpu.memory_space<vmem>>, vector<8x128xf32>,
    %c8_i32_60 = arith.constant 8 : i32
    %c0_61 = arith.constant 0 : index
    %c0_62 = arith.constant 0 : index
    %269 = vector.load %arg14[%c0_61, %c0_62] : memref<64x128xf32, #tpu.memory_space<vmem>>, vector<64x128xf32>
    %c0_63 = arith.constant 0 : index
    %c0_64 = arith.constant 0 : index
    %270 = vector.load %arg6[%c0_63, %c0_64] : memref<128x384xf32, #tpu.memory_space<vmem>>, vector<128x384xf32>
    %cst_65 = arith.constant dense<0.000000e+00> : vector<64x384xf32>
    %271 = tpu.matmul %269, %270, %cst_65 {dimension_numbers = #tpu.dot_dimension_numbers<[1], [0], [0], [1], [0, 0, 1, 1], [], []>} : vector<64x128xf32>, vector<128x384xf32>, vector<64x384xf32> -> vector<64x384xf32>
    %c0_66 = arith.constant 0 : index
    %c0_67 = arith.constant 0 : index
    %272 = vector.load %arg8[%c0_66, %c0_67] : memref<1x384xf32, #tpu.memory_space<vmem>>, vector<1x384xf32>
    %273 = vector.broadcast %272 : vector<1x384xf32> to vector<64x384xf32>
    %274 = arith.addf %271, %273 : vector<64x384xf32>
    %c0_68 = arith.constant 0 : index
    %c0_69 = arith.constant 0 : index
    %275 = vector.load %arg13[%c0_68, %c0_69] : memref<64x384xf32, #tpu.memory_space<vmem>>, vector<64x384xf32>
    tpu.vector_store %arg13[%c0_68, %c0_69], %274 {strides = array<i32>} : memref<64x384xf32, #tpu.memory_space<vmem>>, vector<64x384xf32>,
    %c0_70 = arith.constant 0 : index
    %c0_71 = arith.constant 0 : index
    %276 = vector.load %arg7[%c0_70, %c0_71] : memref<128x384xf32, #tpu.memory_space<vmem>>, vector<128x384xf32>
    %c0_72 = arith.constant 0 : index
    %c0_73 = arith.constant 0 : index
    %277 = vector.load %arg9[%c0_72, %c0_73] : memref<1x128xf32, #tpu.memory_space<vmem>>, vector<1x128xf32>
    %278 = vector.shape_cast %277 : vector<1x128xf32> to vector<1x128xf32>
    %279 = vector.broadcast %278 : vector<1x128xf32> to vector<8x128xf32>
    %cst_74 = arith.constant 0.000000e+00 : f32
    %280 = vector.broadcast %cst_74 : f32 to vector<8x128xf32>
    %c0_i32_75 = arith.constant 0 : i32
    %c8_i32_76 = arith.constant 8 : i32
    %281 = arith.muli %c0_i32_75, %c8_i32_76 : i32
    %282 = tpu.assume_multiple %281, 8 : i32
    %283 = arith.index_cast %282 : i32 to index
    %c0_77 = arith.constant 0 : index
    %284 = vector.load %arg13[%283, %c0_77] : memref<64x384xf32, #tpu.memory_space<vmem>>, vector<8x384xf32>
    %cst_78 = arith.constant dense<0.000000e+00> : vector<8x384xf32>
    %285 = tpu.matmul %280, %276, %cst_78 {dimension_numbers = #tpu.dot_dimension_numbers<[1], [0], [0], [1], [0, 0, 1, 1], [], []>} : vector<8x128xf32>, vector<128x384xf32>, vector<8x384xf32> -> vector<8x384xf32>
    %286 = vector.extract_strided_slice %284 {offsets = [0, 0], sizes = [8, 128], strides = [1, 1]} : vector<8x384xf32> to vector<8x128xf32>
    %287 = vector.extract_strided_slice %285 {offsets = [0, 0], sizes = [8, 128], strides = [1, 1]} : vector<8x384xf32> to vector<8x128xf32>
    %288 = arith.addf %286, %287 : vector<8x128xf32>
    %289 = arith.negf %288 : vector<8x128xf32>
    %290 = math.exp %289 : vector<8x128xf32>
    %cst_79 = arith.constant 1.000000e+00 : f32
    %291 = vector.broadcast %cst_79 : f32 to vector<8x128xf32>
    %292 = arith.addf %291, %290 : vector<8x128xf32>
    %293 = arith.divf %291, %292 : vector<8x128xf32>
    %294 = vector.extract_strided_slice %284 {offsets = [0, 128], sizes = [8, 128], strides = [1, 1]} : vector<8x384xf32> to vector<8x128xf32>
    %295 = vector.extract_strided_slice %285 {offsets = [0, 128], sizes = [8, 128], strides = [1, 1]} : vector<8x384xf32> to vector<8x128xf32>
    %296 = arith.addf %294, %295 : vector<8x128xf32>
    %297 = arith.negf %296 : vector<8x128xf32>
    %298 = math.exp %297 : vector<8x128xf32>
    %cst_80 = arith.constant 1.000000e+00 : f32
    %299 = vector.broadcast %cst_80 : f32 to vector<8x128xf32>
    %300 = arith.addf %299, %298 : vector<8x128xf32>
    %301 = arith.divf %299, %300 : vector<8x128xf32>
    %302 = vector.extract_strided_slice %284 {offsets = [0, 256], sizes = [8, 128], strides = [1, 1]} : vector<8x384xf32> to vector<8x128xf32>
    %303 = vector.extract_strided_slice %285 {offsets = [0, 256], sizes = [8, 128], strides = [1, 1]} : vector<8x384xf32> to vector<8x128xf32>
    %304 = arith.addf %303, %279 : vector<8x128xf32>
    %305 = arith.mulf %293, %304 : vector<8x128xf32>
    %306 = arith.addf %302, %305 : vector<8x128xf32>
    %307 = math.tanh %306 : vector<8x128xf32>
    %308 = arith.subf %280, %307 : vector<8x128xf32>
    %309 = arith.mulf %301, %308 : vector<8x128xf32>
    %310 = arith.addf %307, %309 : vector<8x128xf32>
    %c1_i32_81 = arith.constant 1 : i32
    %c8_i32_82 = arith.constant 8 : i32
    %311 = arith.muli %c1_i32_81, %c8_i32_82 : i32
    %312 = tpu.assume_multiple %311, 8 : i32
    %313 = arith.index_cast %312 : i32 to index
    %c0_83 = arith.constant 0 : index
    %314 = vector.load %arg13[%313, %c0_83] : memref<64x384xf32, #tpu.memory_space<vmem>>, vector<8x384xf32>
    %cst_84 = arith.constant dense<0.000000e+00> : vector<8x384xf32>
    %315 = tpu.matmul %310, %276, %cst_84 {dimension_numbers = #tpu.dot_dimension_numbers<[1], [0], [0], [1], [0, 0, 1, 1], [], []>} : vector<8x128xf32>, vector<128x384xf32>, vector<8x384xf32> -> vector<8x384xf32>
    %316 = vector.extract_strided_slice %314 {offsets = [0, 0], sizes = [8, 128], strides = [1, 1]} : vector<8x384xf32> to vector<8x128xf32>
    %317 = vector.extract_strided_slice %315 {offsets = [0, 0], sizes = [8, 128], strides = [1, 1]} : vector<8x384xf32> to vector<8x128xf32>
    %318 = arith.addf %316, %317 : vector<8x128xf32>
    %319 = arith.negf %318 : vector<8x128xf32>
    %320 = math.exp %319 : vector<8x128xf32>
    %cst_85 = arith.constant 1.000000e+00 : f32
    %321 = vector.broadcast %cst_85 : f32 to vector<8x128xf32>
    %322 = arith.addf %321, %320 : vector<8x128xf32>
    %323 = arith.divf %321, %322 : vector<8x128xf32>
    %324 = vector.extract_strided_slice %314 {offsets = [0, 128], sizes = [8, 128], strides = [1, 1]} : vector<8x384xf32> to vector<8x128xf32>
    %325 = vector.extract_strided_slice %315 {offsets = [0, 128], sizes = [8, 128], strides = [1, 1]} : vector<8x384xf32> to vector<8x128xf32>
    %326 = arith.addf %324, %325 : vector<8x128xf32>
    %327 = arith.negf %326 : vector<8x128xf32>
    %328 = math.exp %327 : vector<8x128xf32>
    %cst_86 = arith.constant 1.000000e+00 : f32
    %329 = vector.broadcast %cst_86 : f32 to vector<8x128xf32>
    %330 = arith.addf %329, %328 : vector<8x128xf32>
    %331 = arith.divf %329, %330 : vector<8x128xf32>
    %332 = vector.extract_strided_slice %314 {offsets = [0, 256], sizes = [8, 128], strides = [1, 1]} : vector<8x384xf32> to vector<8x128xf32>
    %333 = vector.extract_strided_slice %315 {offsets = [0, 256], sizes = [8, 128], strides = [1, 1]} : vector<8x384xf32> to vector<8x128xf32>
    %334 = arith.addf %333, %279 : vector<8x128xf32>
    %335 = arith.mulf %323, %334 : vector<8x128xf32>
    %336 = arith.addf %332, %335 : vector<8x128xf32>
    %337 = math.tanh %336 : vector<8x128xf32>
    %338 = arith.subf %310, %337 : vector<8x128xf32>
    %339 = arith.mulf %331, %338 : vector<8x128xf32>
    %340 = arith.addf %337, %339 : vector<8x128xf32>
    %c2_i32_87 = arith.constant 2 : i32
    %c8_i32_88 = arith.constant 8 : i32
    %341 = arith.muli %c2_i32_87, %c8_i32_88 : i32
    %342 = tpu.assume_multiple %341, 8 : i32
    %343 = arith.index_cast %342 : i32 to index
    %c0_89 = arith.constant 0 : index
    %344 = vector.load %arg13[%343, %c0_89] : memref<64x384xf32, #tpu.memory_space<vmem>>, vector<8x384xf32>
    %cst_90 = arith.constant dense<0.000000e+00> : vector<8x384xf32>
    %345 = tpu.matmul %340, %276, %cst_90 {dimension_numbers = #tpu.dot_dimension_numbers<[1], [0], [0], [1], [0, 0, 1, 1], [], []>} : vector<8x128xf32>, vector<128x384xf32>, vector<8x384xf32> -> vector<8x384xf32>
    %346 = vector.extract_strided_slice %344 {offsets = [0, 0], sizes = [8, 128], strides = [1, 1]} : vector<8x384xf32> to vector<8x128xf32>
    %347 = vector.extract_strided_slice %345 {offsets = [0, 0], sizes = [8, 128], strides = [1, 1]} : vector<8x384xf32> to vector<8x128xf32>
    %348 = arith.addf %346, %347 : vector<8x128xf32>
    %349 = arith.negf %348 : vector<8x128xf32>
    %350 = math.exp %349 : vector<8x128xf32>
    %cst_91 = arith.constant 1.000000e+00 : f32
    %351 = vector.broadcast %cst_91 : f32 to vector<8x128xf32>
    %352 = arith.addf %351, %350 : vector<8x128xf32>
    %353 = arith.divf %351, %352 : vector<8x128xf32>
    %354 = vector.extract_strided_slice %344 {offsets = [0, 128], sizes = [8, 128], strides = [1, 1]} : vector<8x384xf32> to vector<8x128xf32>
    %355 = vector.extract_strided_slice %345 {offsets = [0, 128], sizes = [8, 128], strides = [1, 1]} : vector<8x384xf32> to vector<8x128xf32>
    %356 = arith.addf %354, %355 : vector<8x128xf32>
    %357 = arith.negf %356 : vector<8x128xf32>
    %358 = math.exp %357 : vector<8x128xf32>
    %cst_92 = arith.constant 1.000000e+00 : f32
    %359 = vector.broadcast %cst_92 : f32 to vector<8x128xf32>
    %360 = arith.addf %359, %358 : vector<8x128xf32>
    %361 = arith.divf %359, %360 : vector<8x128xf32>
    %362 = vector.extract_strided_slice %344 {offsets = [0, 256], sizes = [8, 128], strides = [1, 1]} : vector<8x384xf32> to vector<8x128xf32>
    %363 = vector.extract_strided_slice %345 {offsets = [0, 256], sizes = [8, 128], strides = [1, 1]} : vector<8x384xf32> to vector<8x128xf32>
    %364 = arith.addf %363, %279 : vector<8x128xf32>
    %365 = arith.mulf %353, %364 : vector<8x128xf32>
    %366 = arith.addf %362, %365 : vector<8x128xf32>
    %367 = math.tanh %366 : vector<8x128xf32>
    %368 = arith.subf %340, %367 : vector<8x128xf32>
    %369 = arith.mulf %361, %368 : vector<8x128xf32>
    %370 = arith.addf %367, %369 : vector<8x128xf32>
    %c3_i32_93 = arith.constant 3 : i32
    %c8_i32_94 = arith.constant 8 : i32
    %371 = arith.muli %c3_i32_93, %c8_i32_94 : i32
    %372 = tpu.assume_multiple %371, 8 : i32
    %373 = arith.index_cast %372 : i32 to index
    %c0_95 = arith.constant 0 : index
    %374 = vector.load %arg13[%373, %c0_95] : memref<64x384xf32, #tpu.memory_space<vmem>>, vector<8x384xf32>
    %cst_96 = arith.constant dense<0.000000e+00> : vector<8x384xf32>
    %375 = tpu.matmul %370, %276, %cst_96 {dimension_numbers = #tpu.dot_dimension_numbers<[1], [0], [0], [1], [0, 0, 1, 1], [], []>} : vector<8x128xf32>, vector<128x384xf32>, vector<8x384xf32> -> vector<8x384xf32>
    %376 = vector.extract_strided_slice %374 {offsets = [0, 0], sizes = [8, 128], strides = [1, 1]} : vector<8x384xf32> to vector<8x128xf32>
    %377 = vector.extract_strided_slice %375 {offsets = [0, 0], sizes = [8, 128], strides = [1, 1]} : vector<8x384xf32> to vector<8x128xf32>
    %378 = arith.addf %376, %377 : vector<8x128xf32>
    %379 = arith.negf %378 : vector<8x128xf32>
    %380 = math.exp %379 : vector<8x128xf32>
    %cst_97 = arith.constant 1.000000e+00 : f32
    %381 = vector.broadcast %cst_97 : f32 to vector<8x128xf32>
    %382 = arith.addf %381, %380 : vector<8x128xf32>
    %383 = arith.divf %381, %382 : vector<8x128xf32>
    %384 = vector.extract_strided_slice %374 {offsets = [0, 128], sizes = [8, 128], strides = [1, 1]} : vector<8x384xf32> to vector<8x128xf32>
    %385 = vector.extract_strided_slice %375 {offsets = [0, 128], sizes = [8, 128], strides = [1, 1]} : vector<8x384xf32> to vector<8x128xf32>
    %386 = arith.addf %384, %385 : vector<8x128xf32>
    %387 = arith.negf %386 : vector<8x128xf32>
    %388 = math.exp %387 : vector<8x128xf32>
    %cst_98 = arith.constant 1.000000e+00 : f32
    %389 = vector.broadcast %cst_98 : f32 to vector<8x128xf32>
    %390 = arith.addf %389, %388 : vector<8x128xf32>
    %391 = arith.divf %389, %390 : vector<8x128xf32>
    %392 = vector.extract_strided_slice %374 {offsets = [0, 256], sizes = [8, 128], strides = [1, 1]} : vector<8x384xf32> to vector<8x128xf32>
    %393 = vector.extract_strided_slice %375 {offsets = [0, 256], sizes = [8, 128], strides = [1, 1]} : vector<8x384xf32> to vector<8x128xf32>
    %394 = arith.addf %393, %279 : vector<8x128xf32>
    %395 = arith.mulf %383, %394 : vector<8x128xf32>
    %396 = arith.addf %392, %395 : vector<8x128xf32>
    %397 = math.tanh %396 : vector<8x128xf32>
    %398 = arith.subf %370, %397 : vector<8x128xf32>
    %399 = arith.mulf %391, %398 : vector<8x128xf32>
    %400 = arith.addf %397, %399 : vector<8x128xf32>
    %c4_i32_99 = arith.constant 4 : i32
    %c8_i32_100 = arith.constant 8 : i32
    %401 = arith.muli %c4_i32_99, %c8_i32_100 : i32
    %402 = tpu.assume_multiple %401, 8 : i32
    %403 = arith.index_cast %402 : i32 to index
    %c0_101 = arith.constant 0 : index
    %404 = vector.load %arg13[%403, %c0_101] : memref<64x384xf32, #tpu.memory_space<vmem>>, vector<8x384xf32>
    %cst_102 = arith.constant dense<0.000000e+00> : vector<8x384xf32>
    %405 = tpu.matmul %400, %276, %cst_102 {dimension_numbers = #tpu.dot_dimension_numbers<[1], [0], [0], [1], [0, 0, 1, 1], [], []>} : vector<8x128xf32>, vector<128x384xf32>, vector<8x384xf32> -> vector<8x384xf32>
    %406 = vector.extract_strided_slice %404 {offsets = [0, 0], sizes = [8, 128], strides = [1, 1]} : vector<8x384xf32> to vector<8x128xf32>
    %407 = vector.extract_strided_slice %405 {offsets = [0, 0], sizes = [8, 128], strides = [1, 1]} : vector<8x384xf32> to vector<8x128xf32>
    %408 = arith.addf %406, %407 : vector<8x128xf32>
    %409 = arith.negf %408 : vector<8x128xf32>
    %410 = math.exp %409 : vector<8x128xf32>
    %cst_103 = arith.constant 1.000000e+00 : f32
    %411 = vector.broadcast %cst_103 : f32 to vector<8x128xf32>
    %412 = arith.addf %411, %410 : vector<8x128xf32>
    %413 = arith.divf %411, %412 : vector<8x128xf32>
    %414 = vector.extract_strided_slice %404 {offsets = [0, 128], sizes = [8, 128], strides = [1, 1]} : vector<8x384xf32> to vector<8x128xf32>
    %415 = vector.extract_strided_slice %405 {offsets = [0, 128], sizes = [8, 128], strides = [1, 1]} : vector<8x384xf32> to vector<8x128xf32>
    %416 = arith.addf %414, %415 : vector<8x128xf32>
    %417 = arith.negf %416 : vector<8x128xf32>
    %418 = math.exp %417 : vector<8x128xf32>
    %cst_104 = arith.constant 1.000000e+00 : f32
    %419 = vector.broadcast %cst_104 : f32 to vector<8x128xf32>
    %420 = arith.addf %419, %418 : vector<8x128xf32>
    %421 = arith.divf %419, %420 : vector<8x128xf32>
    %422 = vector.extract_strided_slice %404 {offsets = [0, 256], sizes = [8, 128], strides = [1, 1]} : vector<8x384xf32> to vector<8x128xf32>
    %423 = vector.extract_strided_slice %405 {offsets = [0, 256], sizes = [8, 128], strides = [1, 1]} : vector<8x384xf32> to vector<8x128xf32>
    %424 = arith.addf %423, %279 : vector<8x128xf32>
    %425 = arith.mulf %413, %424 : vector<8x128xf32>
    %426 = arith.addf %422, %425 : vector<8x128xf32>
    %427 = math.tanh %426 : vector<8x128xf32>
    %428 = arith.subf %400, %427 : vector<8x128xf32>
    %429 = arith.mulf %421, %428 : vector<8x128xf32>
    %430 = arith.addf %427, %429 : vector<8x128xf32>
    %c5_i32_105 = arith.constant 5 : i32
    %c8_i32_106 = arith.constant 8 : i32
    %431 = arith.muli %c5_i32_105, %c8_i32_106 : i32
    %432 = tpu.assume_multiple %431, 8 : i32
    %433 = arith.index_cast %432 : i32 to index
    %c0_107 = arith.constant 0 : index
    %434 = vector.load %arg13[%433, %c0_107] : memref<64x384xf32, #tpu.memory_space<vmem>>, vector<8x384xf32>
    %cst_108 = arith.constant dense<0.000000e+00> : vector<8x384xf32>
    %435 = tpu.matmul %430, %276, %cst_108 {dimension_numbers = #tpu.dot_dimension_numbers<[1], [0], [0], [1], [0, 0, 1, 1], [], []>} : vector<8x128xf32>, vector<128x384xf32>, vector<8x384xf32> -> vector<8x384xf32>
    %436 = vector.extract_strided_slice %434 {offsets = [0, 0], sizes = [8, 128], strides = [1, 1]} : vector<8x384xf32> to vector<8x128xf32>
    %437 = vector.extract_strided_slice %435 {offsets = [0, 0], sizes = [8, 128], strides = [1, 1]} : vector<8x384xf32> to vector<8x128xf32>
    %438 = arith.addf %436, %437 : vector<8x128xf32>
    %439 = arith.negf %438 : vector<8x128xf32>
    %440 = math.exp %439 : vector<8x128xf32>
    %cst_109 = arith.constant 1.000000e+00 : f32
    %441 = vector.broadcast %cst_109 : f32 to vector<8x128xf32>
    %442 = arith.addf %441, %440 : vector<8x128xf32>
    %443 = arith.divf %441, %442 : vector<8x128xf32>
    %444 = vector.extract_strided_slice %434 {offsets = [0, 128], sizes = [8, 128], strides = [1, 1]} : vector<8x384xf32> to vector<8x128xf32>
    %445 = vector.extract_strided_slice %435 {offsets = [0, 128], sizes = [8, 128], strides = [1, 1]} : vector<8x384xf32> to vector<8x128xf32>
    %446 = arith.addf %444, %445 : vector<8x128xf32>
    %447 = arith.negf %446 : vector<8x128xf32>
    %448 = math.exp %447 : vector<8x128xf32>
    %cst_110 = arith.constant 1.000000e+00 : f32
    %449 = vector.broadcast %cst_110 : f32 to vector<8x128xf32>
    %450 = arith.addf %449, %448 : vector<8x128xf32>
    %451 = arith.divf %449, %450 : vector<8x128xf32>
    %452 = vector.extract_strided_slice %434 {offsets = [0, 256], sizes = [8, 128], strides = [1, 1]} : vector<8x384xf32> to vector<8x128xf32>
    %453 = vector.extract_strided_slice %435 {offsets = [0, 256], sizes = [8, 128], strides = [1, 1]} : vector<8x384xf32> to vector<8x128xf32>
    %454 = arith.addf %453, %279 : vector<8x128xf32>
    %455 = arith.mulf %443, %454 : vector<8x128xf32>
    %456 = arith.addf %452, %455 : vector<8x128xf32>
    %457 = math.tanh %456 : vector<8x128xf32>
    %458 = arith.subf %430, %457 : vector<8x128xf32>
    %459 = arith.mulf %451, %458 : vector<8x128xf32>
    %460 = arith.addf %457, %459 : vector<8x128xf32>
    %c6_i32_111 = arith.constant 6 : i32
    %c8_i32_112 = arith.constant 8 : i32
    %461 = arith.muli %c6_i32_111, %c8_i32_112 : i32
    %462 = tpu.assume_multiple %461, 8 : i32
    %463 = arith.index_cast %462 : i32 to index
    %c0_113 = arith.constant 0 : index
    %464 = vector.load %arg13[%463, %c0_113] : memref<64x384xf32, #tpu.memory_space<vmem>>, vector<8x384xf32>
    %cst_114 = arith.constant dense<0.000000e+00> : vector<8x384xf32>
    %465 = tpu.matmul %460, %276, %cst_114 {dimension_numbers = #tpu.dot_dimension_numbers<[1], [0], [0], [1], [0, 0, 1, 1], [], []>} : vector<8x128xf32>, vector<128x384xf32>, vector<8x384xf32> -> vector<8x384xf32>
    %466 = vector.extract_strided_slice %464 {offsets = [0, 0], sizes = [8, 128], strides = [1, 1]} : vector<8x384xf32> to vector<8x128xf32>
    %467 = vector.extract_strided_slice %465 {offsets = [0, 0], sizes = [8, 128], strides = [1, 1]} : vector<8x384xf32> to vector<8x128xf32>
    %468 = arith.addf %466, %467 : vector<8x128xf32>
    %469 = arith.negf %468 : vector<8x128xf32>
    %470 = math.exp %469 : vector<8x128xf32>
    %cst_115 = arith.constant 1.000000e+00 : f32
    %471 = vector.broadcast %cst_115 : f32 to vector<8x128xf32>
    %472 = arith.addf %471, %470 : vector<8x128xf32>
    %473 = arith.divf %471, %472 : vector<8x128xf32>
    %474 = vector.extract_strided_slice %464 {offsets = [0, 128], sizes = [8, 128], strides = [1, 1]} : vector<8x384xf32> to vector<8x128xf32>
    %475 = vector.extract_strided_slice %465 {offsets = [0, 128], sizes = [8, 128], strides = [1, 1]} : vector<8x384xf32> to vector<8x128xf32>
    %476 = arith.addf %474, %475 : vector<8x128xf32>
    %477 = arith.negf %476 : vector<8x128xf32>
    %478 = math.exp %477 : vector<8x128xf32>
    %cst_116 = arith.constant 1.000000e+00 : f32
    %479 = vector.broadcast %cst_116 : f32 to vector<8x128xf32>
    %480 = arith.addf %479, %478 : vector<8x128xf32>
    %481 = arith.divf %479, %480 : vector<8x128xf32>
    %482 = vector.extract_strided_slice %464 {offsets = [0, 256], sizes = [8, 128], strides = [1, 1]} : vector<8x384xf32> to vector<8x128xf32>
    %483 = vector.extract_strided_slice %465 {offsets = [0, 256], sizes = [8, 128], strides = [1, 1]} : vector<8x384xf32> to vector<8x128xf32>
    %484 = arith.addf %483, %279 : vector<8x128xf32>
    %485 = arith.mulf %473, %484 : vector<8x128xf32>
    %486 = arith.addf %482, %485 : vector<8x128xf32>
    %487 = math.tanh %486 : vector<8x128xf32>
    %488 = arith.subf %460, %487 : vector<8x128xf32>
    %489 = arith.mulf %481, %488 : vector<8x128xf32>
    %490 = arith.addf %487, %489 : vector<8x128xf32>
    %c7_i32_117 = arith.constant 7 : i32
    %c8_i32_118 = arith.constant 8 : i32
    %491 = arith.muli %c7_i32_117, %c8_i32_118 : i32
    %492 = tpu.assume_multiple %491, 8 : i32
    %493 = arith.index_cast %492 : i32 to index
    %c0_119 = arith.constant 0 : index
    %494 = vector.load %arg13[%493, %c0_119] : memref<64x384xf32, #tpu.memory_space<vmem>>, vector<8x384xf32>
    %cst_120 = arith.constant dense<0.000000e+00> : vector<8x384xf32>
    %495 = tpu.matmul %490, %276, %cst_120 {dimension_numbers = #tpu.dot_dimension_numbers<[1], [0], [0], [1], [0, 0, 1, 1], [], []>} : vector<8x128xf32>, vector<128x384xf32>, vector<8x384xf32> -> vector<8x384xf32>
    %496 = vector.extract_strided_slice %494 {offsets = [0, 0], sizes = [8, 128], strides = [1, 1]} : vector<8x384xf32> to vector<8x128xf32>
    %497 = vector.extract_strided_slice %495 {offsets = [0, 0], sizes = [8, 128], strides = [1, 1]} : vector<8x384xf32> to vector<8x128xf32>
    %498 = arith.addf %496, %497 : vector<8x128xf32>
    %499 = arith.negf %498 : vector<8x128xf32>
    %500 = math.exp %499 : vector<8x128xf32>
    %cst_121 = arith.constant 1.000000e+00 : f32
    %501 = vector.broadcast %cst_121 : f32 to vector<8x128xf32>
    %502 = arith.addf %501, %500 : vector<8x128xf32>
    %503 = arith.divf %501, %502 : vector<8x128xf32>
    %504 = vector.extract_strided_slice %494 {offsets = [0, 128], sizes = [8, 128], strides = [1, 1]} : vector<8x384xf32> to vector<8x128xf32>
    %505 = vector.extract_strided_slice %495 {offsets = [0, 128], sizes = [8, 128], strides = [1, 1]} : vector<8x384xf32> to vector<8x128xf32>
    %506 = arith.addf %504, %505 : vector<8x128xf32>
    %507 = arith.negf %506 : vector<8x128xf32>
    %508 = math.exp %507 : vector<8x128xf32>
    %cst_122 = arith.constant 1.000000e+00 : f32
    %509 = vector.broadcast %cst_122 : f32 to vector<8x128xf32>
    %510 = arith.addf %509, %508 : vector<8x128xf32>
    %511 = arith.divf %509, %510 : vector<8x128xf32>
    %512 = vector.extract_strided_slice %494 {offsets = [0, 256], sizes = [8, 128], strides = [1, 1]} : vector<8x384xf32> to vector<8x128xf32>
    %513 = vector.extract_strided_slice %495 {offsets = [0, 256], sizes = [8, 128], strides = [1, 1]} : vector<8x384xf32> to vector<8x128xf32>
    %514 = arith.addf %513, %279 : vector<8x128xf32>
    %515 = arith.mulf %503, %514 : vector<8x128xf32>
    %516 = arith.addf %512, %515 : vector<8x128xf32>
    %517 = math.tanh %516 : vector<8x128xf32>
    %518 = arith.subf %490, %517 : vector<8x128xf32>
    %519 = arith.mulf %511, %518 : vector<8x128xf32>
    %520 = arith.addf %517, %519 : vector<8x128xf32>
    %c8_i32_123 = arith.constant 8 : i32
    %c0_124 = arith.constant 0 : index
    %c0_125 = arith.constant 0 : index
    %521 = vector.load %arg10[%c0_124, %c0_125] : memref<128x128xf32, #tpu.memory_space<vmem>>, vector<128x128xf32>
    %cst_126 = arith.constant dense<0.000000e+00> : vector<8x128xf32>
    %522 = tpu.matmul %520, %521, %cst_126 {dimension_numbers = #tpu.dot_dimension_numbers<[1], [0], [0], [1], [0, 0, 1, 1], [], []>} : vector<8x128xf32>, vector<128x128xf32>, vector<8x128xf32> -> vector<8x128xf32>
    %c0_127 = arith.constant 0 : index
    %c0_128 = arith.constant 0 : index
    %523 = vector.load %arg11[%c0_127, %c0_128] : memref<1x128xf32, #tpu.memory_space<vmem>>, vector<1x128xf32>
    %524 = vector.broadcast %523 : vector<1x128xf32> to vector<8x128xf32>
    %525 = arith.addf %522, %524 : vector<8x128xf32>
    %c0_129 = arith.constant 0 : index
    %c0_130 = arith.constant 0 : index
    %526 = vector.load %arg12[%c0_129, %c0_130] : memref<8x128xf32, #tpu.memory_space<vmem>>, vector<8x128xf32>
    tpu.vector_store %arg12[%c0_129, %c0_130], %525 {strides = array<i32>} : memref<8x128xf32, #tpu.memory_space<vmem>>, vector<8x128xf32>,
    return
  }
  func.func @transform_0(%arg0: i32) -> (i32, i32, i32) {
    %c0_i32 = arith.constant 0 : i32
    %c0_i32_0 = arith.constant 0 : i32
    %c0_i32_1 = arith.constant 0 : i32
    return %arg0, %c0_i32, %c0_i32_0 : i32, i32, i32
  }
  func.func @transform_1(%arg0: i32) -> (i32, i32) {
    %c0_i32 = arith.constant 0 : i32
    %c0_i32_0 = arith.constant 0 : i32
    %c0_i32_1 = arith.constant 0 : i32
    return %c0_i32, %c0_i32_0 : i32, i32
  }
  func.func @transform_2(%arg0: i32) -> (i32, i32) {
    %c0_i32 = arith.constant 0 : i32
    %c0_i32_0 = arith.constant 0 : i32
    %c0_i32_1 = arith.constant 0 : i32
    return %c0_i32, %c0_i32_0 : i32, i32
  }
  func.func @transform_3(%arg0: i32) -> (i32, i32) {
    %c0_i32 = arith.constant 0 : i32
    %c0_i32_0 = arith.constant 0 : i32
    %c0_i32_1 = arith.constant 0 : i32
    return %c0_i32, %c0_i32_0 : i32, i32
  }
  func.func @transform_4(%arg0: i32) -> (i32, i32) {
    %c0_i32 = arith.constant 0 : i32
    %c0_i32_0 = arith.constant 0 : i32
    %c0_i32_1 = arith.constant 0 : i32
    return %c0_i32, %c0_i32_0 : i32, i32
  }
  func.func @transform_5(%arg0: i32) -> (i32, i32) {
    %c0_i32 = arith.constant 0 : i32
    %c0_i32_0 = arith.constant 0 : i32
    %c0_i32_1 = arith.constant 0 : i32
    return %c0_i32, %c0_i32_0 : i32, i32
  }
  func.func @transform_6(%arg0: i32) -> (i32, i32) {
    %c0_i32 = arith.constant 0 : i32
    %c0_i32_0 = arith.constant 0 : i32
    %c0_i32_1 = arith.constant 0 : i32
    return %c0_i32, %c0_i32_0 : i32, i32
  }
  func.func @transform_7(%arg0: i32) -> (i32, i32) {
    %c0_i32 = arith.constant 0 : i32
    %c0_i32_0 = arith.constant 0 : i32
    %c0_i32_1 = arith.constant 0 : i32
    return %c0_i32, %c0_i32_0 : i32, i32
  }
  func.func @transform_8(%arg0: i32) -> (i32, i32) {
    %c0_i32 = arith.constant 0 : i32
    %c0_i32_0 = arith.constant 0 : i32
    %c0_i32_1 = arith.constant 0 : i32
    return %c0_i32, %c0_i32_0 : i32, i32
  }
  func.func @transform_9(%arg0: i32) -> (i32, i32) {
    %c0_i32 = arith.constant 0 : i32
    %c0_i32_0 = arith.constant 0 : i32
    %c0_i32_1 = arith.constant 0 : i32
    return %c0_i32, %c0_i32_0 : i32, i32
  }
  func.func @transform_10(%arg0: i32) -> (i32, i32) {
    %c0_i32 = arith.constant 0 : i32
    %c0_i32_0 = arith.constant 0 : i32
    %c0_i32_1 = arith.constant 0 : i32
    return %c0_i32, %c0_i32_0 : i32, i32
  }
  func.func @transform_11(%arg0: i32) -> (i32, i32) {
    %c0_i32 = arith.constant 0 : i32
    %c0_i32_0 = arith.constant 0 : i32
    return %arg0, %c0_i32 : i32, i32
  }
}

</mosaic_0001>

<bundles_post_ra>
// kernel: gru_model_forward.1
= control target key start
LH: loop header
LB: loop body
LE: loop exit
PB: predicated region body
PF: predicated region fallthrough
CT: control target
= control target key end

     0   :  { %v5794_v3 = vmov 0.0   ;;  %vm69_vm0 = vcmask 130048   ;;  %v5795_v48 = vmov 0.0|0.0   ;;  %vm5796_vm1 = vmmov 0   ;;  %s7312_s1 = inlined_call_operand.vmem [shape: f32[16,384], index: 1, kind: input, shape index: {}]   ;;  %s7313_s0 = inlined_call_operand.vmem [shape: f32[1,64,16], index: 0, kind: input, shape index: {}]   ;;  %s7314_s2 = inlined_call_operand.vmem [shape: f32[128,384], index: 2, kind: input, shape index: {}]   ;;  %s7315_s3 = inlined_call_operand.vmem [shape: f32[1,384], index: 3, kind: input, shape index: {}]   ;;  %s7316_s4 = inlined_call_operand.vmem [shape: f32[1,128], index: 4, kind: input, shape index: {}]   ;;  %s7317_s5 = inlined_call_operand.vmem [shape: f32[128,384], index: 5, kind: input, shape index: {}]   ;;  %s7318_s6 = inlined_call_operand.vmem [shape: f32[128,384], index: 6, kind: input, shape index: {}]   ;;  %s7319_s7 = inlined_call_operand.vmem [shape: f32[1,384], index: 7, kind: input, shape index: {}]   ;;  %s7320_s8 = inlined_call_operand.vmem [shape: f32[1,128], index: 8, kind: input, shape index: {}]   ;;  %s7321_s9 = inlined_call_operand.vmem [shape: f32[128,128], index: 9, kind: input, shape index: {}]   ;;  %s7322_s10 = inlined_call_operand.vmem [shape: f32[1,128], index: 10, kind: input, shape index: {}]   ;;  %s7323_s11 = inlined_call_operand.vmem [shape: f32[8,128], index: 11, kind: output, shape index: {}]  }
   0x1   :  { %v47_v0 = vld [vmem:[%s7312_s1 + $0x8] sm:$0xff]  ;;  %v50_v1 = vld [vmem:[%s7312_s1 + $0x20] sm:$0xff]  ;;  %158 = vmatprep.mubr.f32.mxu0 %v5794_v3  ;;  %v49_v5 = vld [vmem:[%s7312_s1 + $0x18] sm:$0xff] }
   0x2   :  { %v46_v2 = vld [vmem:[%s7312_s1] sm:$0xff]  ;;  %v4574_v4 = vpack.c.bf16 %v50_v1, %v47_v0  ;;  %v337_v7 = vld [vmem:[%s7314_s2 + $0x8] sm:$0xff]  ;;  %v339_v11 = vld [vmem:[%s7314_s2 + $0x18] sm:$0xff] }
   0x3   :  { %v38_v6 = vld [vmem:[%s7313_s0] sm:$0xff]  ;;  %v4576_v8 = vpack.c.bf16 %v49_v5, %v46_v2  ;;  %v343_v13 = vld [vmem:[%s7314_s2 + $0x38] sm:$0xff]  ;;  %v346_v14 = vld [vmem:[%s7314_s2 + $0x50] sm:$0xff] }
   0x4   :  { %v340_v9 = vld [vmem:[%s7314_s2 + $0x20] sm:$0xff]  ;;  %3923 = vmatprep.mubr.msk.f32.mxu1 %vm69_vm0, %v38_v6  ;;  %4575 = vmatprep.subr.bf16.mxu0 %v4574_v4  ;;  %v5897_v16 = vpack.c.bf16 %v346_v14, %v343_v13  ;;  %v342_v17 = vld [vmem:[%s7314_s2 + $0x30] sm:$0xff]  ;;  %v345_v18 = vld [vmem:[%s7314_s2 + $0x48] sm:$0xff] }
   0x5   :  { %v336_v10 = vld [vmem:[%s7314_s2] sm:$0xff]  ;;  %v5886_v12 = vpack.c.bf16 %v340_v9, %v337_v7  ;;  %4577 = vmatpush1.bf16.msra.mxu0 %v4576_v8  ;;  %v349_v19 = vld [vmem:[%s7314_s2 + $0x68] sm:$0xff]  ;;  %v5917_v22 = vpack.c.bf16 %v345_v18, %v342_v17  ;;  %v351_v25 = vld [vmem:[%s7314_s2 + $0x78] sm:$0xff] }
   0x6   :  { %v5894_v15 = vpack.c.bf16 %v339_v11, %v336_v10  ;;  %v352_v20 = vld [vmem:[%s7314_s2 + $0x80] sm:$0xff]  ;;  %v39_v21 = vld [vmem:[%s7313_s0 + $0x8] sm:$0xff]  ;;  %v355_v26 = vld [vmem:[%s7314_s2 + $0x98] sm:$0xff] }
   0x7   :  { %4583 = vmatprep.subr.bf16.mxu0 %v5886_v12  ;;  %v5920_v23 = vpack.c.bf16 %v352_v20, %v349_v19  ;;  %v348_v24 = vld [vmem:[%s7314_s2 + $0x60] sm:$0xff]  ;;  %v358_v27 = vld [vmem:[%s7314_s2 + $0xb0] sm:$0xff]  ;;  %v51_v29 = vld [vmem:[%s7312_s1 + $0x28] sm:$0xff] }
   0x8   :  { %3545 = vmatmul.mubr.msk.f32.vlgmr.msra.gmra.mrb[0].mxu0 %vm69_vm0, %v38_v6  ;;  %v48_v28 = vld [vmem:[%s7312_s1 + $0x10] sm:$0xff]  ;;  %v5946_v31 = vpack.c.bf16 %v351_v25, %v348_v24  ;;  %v5949_v33 = vpack.c.bf16 %v358_v27, %v355_v26  ;;  %v357_v35 = vld [vmem:[%s7314_s2 + $0xa8] sm:$0xff]  ;;  %v364_v38 = vld [vmem:[%s7314_s2 + $0xe0] sm:$0xff] }
   0x9   :  { %4585 = vmatpush1.bf16.msra.mxu0 %v5894_v15  ;;  %164 = vmatprep.mubr.f32.mxu0 %v5794_v3  ;;  %v40_v30 = vld [vmem:[%s7313_s0 + $0x10] sm:$0xff]  ;;  %v4578_v32 = vpack.c.bf16 %v51_v29, %v48_v28  ;;  %v361_v37 = vld [vmem:[%s7314_s2 + $0xc8] sm:$0xff]  ;;  %v41_v41 = vld [vmem:[%s7313_s0 + $0x18] sm:$0xff] }
   0xa   :  { %4587 = vmatprep.subr.bf16.mxu0 %v5897_v16  ;;  %v354_v34 = vld [vmem:[%s7314_s2 + $0x90] sm:$0xff]  ;;  %v341_v39 = vld [vmem:[%s7314_s2 + $0x28] sm:$0xff]  ;;  %v344_v43 = vld [vmem:[%s7314_s2 + $0x40] sm:$0xff]  ;;  %v5986_v45 = vpack.c.bf16 %v364_v38, %v361_v37 }
   0xb   :  { %v338_v36 = vld [vmem:[%s7314_s2 + $0x10] sm:$0xff]  ;;  %4579 = vmatprep.subr.bf16.mxu1 %v4578_v32  ;;  %v5977_v42 = vpack.c.bf16 %v357_v35, %v354_v34  ;;  %v347_v44 = vld [vmem:[%s7314_s2 + $0x58] sm:$0xff]  ;;  %v360_v46 = vld [vmem:[%s7314_s2 + $0xc0] sm:$0xff]  ;;  %v54_v35 = vlaneseq }
   0xc   :  { %3546 = vmatmul.mubr.msk.f32.gmra.mrb[2].mxu0 %vm69_vm0, %v39_v21  ;;  %4581 = vmatpush3.bf16.msra.mxu1 %v4578_v32  ;;  %v5970_v40 = vpack.c.bf16 %v341_v39, %v338_v36  ;;  %v363_v47 = vld [vmem:[%s7314_s2 + $0xd8] sm:$0xff]  ;;  %v370_v50 = vld [vmem:[%s7314_s2 + $0x110] sm:$0xff]  ;;  %v6004_v51 = vpack.c.bf16 %v347_v44, %v344_v43  ;;  %v42_v52 = vld [vmem:[%s7313_s0 + $0x20] sm:$0xff] }
   0xd   :  { %4589 = vmatpush1.bf16.msra.mxu0 %v5917_v22  ;;  %170 = vmatprep.mubr.f32.mxu0 %v5794_v3  ;;  %v367_v49 = vld [vmem:[%s7314_s2 + $0xf8] sm:$0xff]  ;;  %v6011_v53 = vpack.c.bf16 %v363_v47, %v360_v46  ;;  %v350_v54 = vld [vmem:[%s7314_s2 + $0x70] sm:$0xff]  ;;  %v353_v55 = vld [vmem:[%s7314_s2 + $0x88] sm:$0xff]  ;;  %v6189_v36 = vshrl.u32 %v54_v35, 7 }
   0xe   :  { %4591 = vmatprep.subr.bf16.mxu0 %v5920_v23  ;;  %4614 = vmatprep.subr.bf16.mxu1 %v5795_v48  ;;  %v6020_v56 = vpack.c.bf16 %v370_v50, %v367_v49  ;;  %v366_v57 = vld [vmem:[%s7314_s2 + $0xf0] sm:$0xff]  ;;  %v369_v58 = vld [vmem:[%s7314_s2 + $0x108] sm:$0xff]  ;;  %v376_v60 = vld [vmem:[%s7314_s2 + $0x140] sm:$0xff]  ;;  %v6038_v61 = vpack.c.bf16 %v353_v55, %v350_v54 }
   0xf   :  { %3924 = vmatmul.mubr.msk.f32.vlgmr.msra.gmra.mrb[0].mxu1 %vm69_vm0, %v39_v21  ;;  %v373_v59 = vld [vmem:[%s7314_s2 + $0x128] sm:$0xff]  ;;  %v6045_v63 = vpack.c.bf16 %v369_v58, %v366_v57  ;;  %v356_v0 = vld [vmem:[%s7314_s2 + $0xa0] sm:$0xff]  ;;  %v359_v1 = vld [vmem:[%s7314_s2 + $0xb8] sm:$0xff]  ;;  %v64_v37 = vsub.s32 2, %v6189_v36 }
  0x10   :  { %3547 = vmatmul.mubr.msk.f32.gmra.mrb[4].mxu0 %vm69_vm0, %v40_v30  ;;  %4616 = vmatpush3.bf16.msra.mxu1 %v5970_v40  ;;  %v43_v62 = vld [vmem:[%s7313_s0 + $0x28] sm:$0xff]  ;;  %v6054_v2 = vpack.c.bf16 %v376_v60, %v373_v59  ;;  %v372_v4 = vld [vmem:[%s7314_s2 + $0x120] sm:$0xff]  ;;  %v375_v5 = vld [vmem:[%s7314_s2 + $0x138] sm:$0xff]  ;;  %v6072_v8 = vpack.c.bf16 %v359_v1, %v356_v0 }
  0x11   :  { %4593 = vmatpush1.bf16.msra.mxu0 %v5946_v31  ;;  %176 = vmatprep.mubr.f32.mxu0 %v5794_v3  ;;  %v379_v6 = vld [vmem:[%s7314_s2 + $0x158] sm:$0xff]  ;;  %v382_v7 = vld [vmem:[%s7314_s2 + $0x170] sm:$0xff]  ;;  %v6079_v10 = vpack.c.bf16 %v375_v5, %v372_v4  ;;  %v365_v13 = vld [vmem:[%s7314_s2 + $0xe8] sm:$0xff]  ;;  %v60_v5 = vsub.s32 1, %v6189_v36 }
  0x12   :  { %4595 = vmatprep.subr.bf16.mxu0 %v5949_v33  ;;  %4617 = vmatprep.subr.bf16.mxu1 %v5795_v48  ;;  %v44_v9 = vld [vmem:[%s7313_s0 + $0x30] sm:$0xff]  ;;  %v6088_v14 = vpack.c.bf16 %v382_v7, %v379_v6  ;;  %v381_v18 = vld [vmem:[%s7314_s2 + $0x168] sm:$0xff]  ;;  %v45_v20 = vld [vmem:[%s7313_s0 + $0x38] sm:$0xff] }
  0x13   :  { %3926 = vmatprep.mubr.msk.f32.mxu1 %vm69_vm0, %v40_v30  ;;  %v362_v11 = vld [vmem:[%s7314_s2 + $0xd0] sm:$0xff]  ;;  %v368_v24 = vld [vmem:[%s7314_s2 + $0x100] sm:$0xff]  ;;  %v371_v25 = vld [vmem:[%s7314_s2 + $0x118] sm:$0xff] }
  0x14   :  { %3548 = vmatmul.mubr.msk.f32.gmra.mrb[6].mxu0 %vm69_vm0, %v41_v41  ;;  %4619 = vmatpush3.bf16.msra.mxu1 %v6004_v51  ;;  %v378_v17 = vld [vmem:[%s7314_s2 + $0x150] sm:$0xff]  ;;  %v6100_v19 = vpack.c.bf16 %v365_v13, %v362_v11  ;;  %v6120_v26 = vpack.c.bf16 %v371_v25, %v368_v24  ;;  %v377_v28 = vld [vmem:[%s7314_s2 + $0x148] sm:$0xff]  ;;  %v380_v30 = vld [vmem:[%s7314_s2 + $0x160] sm:$0xff] }
  0x15   :  { %4597 = vmatpush1.bf16.msra.mxu0 %v5977_v42  ;;  %182 = vmatprep.mubr.f32.mxu0 %v5794_v3  ;;  %v6107_v21 = vpack.c.bf16 %v381_v18, %v378_v17  ;;  %v374_v27 = vld [vmem:[%s7314_s2 + $0x130] sm:$0xff]  ;;  %v383_v32 = vld [vmem:[%s7314_s2 + $0x178] sm:$0xff]  ;;  %v52_v38 = vld [vmem:[%s7315_s3] sm:$0x7] }
  0x16   :  { %4599 = vmatprep.subr.bf16.mxu0 %v5986_v45  ;;  %4620 = vmatprep.subr.bf16.mxu1 %v5795_v48  ;;  %v6136_v29 = vpack.c.bf16 %v377_v28, %v374_v27  ;;  %v6151_v34 = vpack.c.bf16 %v383_v32, %v380_v30  ;;  %v65_v39 = vrot.slane %v52_v38, %v64_v37  ;;  %v6226_v27 = vld [vmem:[%s7316_s4] ss:$0 sm:$0xff] }
  0x17   :  { %3927 = vmatmul.mubr.msk.f32.gmra.mrb[2].mxu1 %vm69_vm0, %v41_v41  ;;  %v6220_v11 = vrot.slane %v52_v38, %v60_v5 }
  0x18   :  { %3549 = vmatmul.mubr.msk.f32.gmra.mrb[8].mxu0 %vm69_vm0, %v42_v52  ;;  %4622 = vmatpush3.bf16.msra.mxu1 %v6038_v61 }
  0x19   :  { %4601 = vmatpush1.bf16.msra.mxu0 %v6011_v53  ;;  %188 = vmatprep.mubr.f32.mxu0 %v5794_v3 }
  0x1a   :  { %4603 = vmatprep.subr.bf16.mxu0 %v6020_v56  ;;  %4623 = vmatprep.subr.bf16.mxu1 %v5795_v48 }
  0x1b   :  { %3929 = vmatprep.mubr.msk.f32.mxu1 %vm69_vm0, %v42_v52  ;;  %v56_v52 = vsub.s32 0, %v6189_v36 }
  0x1c   :  { %3550 = vmatmul.mubr.msk.f32.gmra.mrb[10].mxu0 %vm69_vm0, %v43_v62  ;;  %4625 = vmatpush3.bf16.msra.mxu1 %v6072_v8 }
  0x1d   :  { %4605 = vmatpush1.bf16.msra.mxu0 %v6045_v63  ;;  %194 = vmatprep.mubr.f32.mxu0 %v5794_v3  ;;  %v6208_v58 = vrot.slane %v52_v38, %v56_v52 }
  0x1e   :  { %4607 = vmatprep.subr.bf16.mxu0 %v6054_v2  ;;  %4626 = vmatprep.subr.bf16.mxu1 %v5795_v48 }
  0x1f   :  { %3930 = vmatmul.mubr.msk.f32.gmra.mrb[4].mxu1 %vm69_vm0, %v43_v62 }
  0x20   :  { %3551 = vmatmul.mubr.msk.f32.gmra.mrb[12].mxu0 %vm69_vm0, %v44_v9  ;;  %4628 = vmatpush3.bf16.msra.mxu1 %v6100_v19 }
  0x21   :  { %4609 = vmatpush1.bf16.msra.mxu0 %v6079_v10  ;;  %200 = vmatprep.mubr.f32.mxu0 %v5794_v3 }
  0x22   :  { %4611 = vmatprep.subr.bf16.mxu0 %v6088_v14  ;;  %4629 = vmatprep.subr.bf16.mxu1 %v5795_v48 }
  0x23   :  { %3932 = vmatprep.mubr.msk.f32.mxu1 %vm69_vm0, %v44_v9 }
  0x24   :  { %3552 = vmatmul.mubr.msk.f32.gmra.mrb[14].mxu0 %vm69_vm0, %v45_v20  ;;  %3933 = vmatmul.mubr.msk.f32.gmra.mrb[6].mxu1 %vm69_vm0, %v45_v20 }
  0x25   :  { %4613 = vmatpush1.bf16.msra.mxu0 %v6107_v21  ;;  %461 = vmatprep.mubr.f32.mxu0 %v5794_v3 }
  0x26   :  { %4639 = vmatprep.subr.bf16.mxu0 %v5886_v12  ;;  %4631 = vmatpush3.bf16.msra.mxu1 %v6120_v26 }
  0x27   :  { %4632 = vmatprep.subr.bf16.mxu1 %v5795_v48  ;;  %3967 = vmatprep.mubr.msk.f32.mxu1 %vm5796_vm1, %v5794_v3 }
  0x28   :  { %462 = vmatmul.mubr.f32.vlgmr.msra.gmra.mrb[0].mxu0 %v5794_v3 }
  0x29   :  { %4641 = vmatpush1.bf16.msra.mxu0 %v5894_v15  ;;  %630 = vmatprep.mubr.f32.mxu0 %v5794_v3 }
  0x2a   :  { %4643 = vmatprep.subr.bf16.mxu0 %v5897_v16  ;;  %4634 = vmatpush3.bf16.msra.mxu1 %v6136_v29 }
  0x2b   :  { %4635 = vmatprep.subr.bf16.mxu1 %v5795_v48 }
  0x2d   :  { %4645 = vmatpush1.bf16.msra.mxu0 %v5917_v22 }
  0x2e   :  { %4647 = vmatprep.subr.bf16.mxu0 %v5920_v23  ;;  %4637 = vmatpush3.bf16.msra.mxu1 %v6151_v34 }
  0x2f   :  { %4670 = vmatprep.subr.bf16.mxu1 %v5795_v48 }
  0x31   :  { %4649 = vmatpush1.bf16.msra.mxu0 %v5946_v31  ;;  %3968 = vmatmul.mubr.f32.vlgmr.msra.gmra.mrb[8].mxu1 %v5794_v3 }
  0x32   :  { %4651 = vmatprep.subr.bf16.mxu0 %v5949_v33  ;;  %4672 = vmatpush3.bf16.msra.mxu1 %v5970_v40 }
  0x33   :  { %4002 = vmatprep.mubr.msk.f32.mxu1 %vm5796_vm1, %v5794_v3  ;;  %4673 = vmatprep.subr.bf16.mxu1 %v5795_v48 }
  0x35   :  { %4653 = vmatpush1.bf16.msra.mxu0 %v5977_v42 }
  0x36   :  { %4655 = vmatprep.subr.bf16.mxu0 %v5986_v45  ;;  %4675 = vmatpush3.bf16.msra.mxu1 %v6004_v51 }
  0x37   :  { %4676 = vmatprep.subr.bf16.mxu1 %v5795_v48 }
  0x39   :  { %4657 = vmatpush1.bf16.msra.mxu0 %v6011_v53 }
  0x3a   :  { %4659 = vmatprep.subr.bf16.mxu0 %v6020_v56  ;;  %4678 = vmatpush3.bf16.msra.mxu1 %v6038_v61 }
  0x3b   :  { %4679 = vmatprep.subr.bf16.mxu1 %v5795_v48 }
  0x3d   :  { %4661 = vmatpush1.bf16.msra.mxu0 %v6045_v63 }
  0x3e   :  { %4663 = vmatprep.subr.bf16.mxu0 %v6054_v2  ;;  %4681 = vmatpush3.bf16.msra.mxu1 %v6072_v8 }
  0x3f   :  { %4682 = vmatprep.subr.bf16.mxu1 %v5795_v48 }
  0x41   :  { %4665 = vmatpush1.bf16.msra.mxu0 %v6079_v10 }
  0x42   :  { %4667 = vmatprep.subr.bf16.mxu0 %v6088_v14  ;;  %4684 = vmatpush3.bf16.msra.mxu1 %v6100_v19 }
  0x43   :  { %4685 = vmatprep.subr.bf16.mxu1 %v5795_v48 }
  0x45   :  { %4669 = vmatpush1.bf16.msra.mxu0 %v6107_v21 }
  0x46   :  { %4695 = vmatprep.subr.bf16.mxu0 %v5886_v12  ;;  %4687 = vmatpush3.bf16.msra.mxu1 %v6120_v26 }
  0x47   :  { %4688 = vmatprep.subr.bf16.mxu1 %v5795_v48 }
  0x4a   :  { %4690 = vmatpush3.bf16.msra.mxu1 %v6136_v29 }
  0x4b   :  { %4691 = vmatprep.subr.bf16.mxu1 %v5795_v48 }
  0x4e   :  { %4693 = vmatpush3.bf16.msra.mxu1 %v6151_v34 }
  0x4f   :  { %4726 = vmatprep.subr.bf16.mxu1 %v5795_v48 }
  0xe2   :  { %v3925_v41 = vpop.f32.mrb[0].mxu1 }
  0xe3   :  { %v6197_v43 = vadd.f32 %v3925_v41, %v65_v39  ;;  %v273_v44 = vpop.f32.mrb[1].mxu1 }
  0xe4   :  { %v274_v35 = vadd.f32 %v273_v44, %v65_v39 }
  0xea   :  { %v3928_v46 = vpop.f32.mrb[2].mxu1 }
  0xeb   :  { %v6199_v47 = vadd.f32 %v3928_v46, %v65_v39  ;;  %v283_v49 = vpop.f32.mrb[3].mxu1 }
  0xec   :  { %v6201_v50 = vadd.f32 %v283_v49, %v65_v39 }
  0xf2   :  { %v3931_v54 = vpop.f32.mrb[4].mxu1 }
  0xf3   :  { %v6204_v55 = vadd.f32 %v3931_v54, %v65_v39  ;;  %v293_v57 = vpop.f32.mrb[5].mxu1 }
  0xf4   :  { %v6210_v59 = vadd.f32 %v293_v57, %v65_v39 }
  0xf7   :  { %v3934_v60 = vpop.f32.mrb[6].mxu1 }
  0xf8   :  { %v6212_v0 = vadd.f32 %v3934_v60, %v65_v39  ;;  %v303_v1 = vpop.f32.mrb[7].mxu1 }
  0xf9   :  { %v6216_v7 = vadd.f32 %v303_v1, %v65_v39 }
  0xfb   :  { %v463_v62 = vpop.f32.mrb[0].mxu0 }
  0xfc   :  { %v5566_v4 = vadd.f32 %v463_v62, %v6208_v58  ;;  %v465_v6 = vpop.f32.mrb[1].mxu0 }
  0xfd   :  { %v5567_v13 = vadd.f32 %v465_v6, %v6220_v11 }
  0xfe   :  { %v3562_v9 = vmul.f32 -1.442695, %v5566_v4 }
  0xff   :  { %v3563_v20 = vmul.f32 -1.442695, %v5567_v13 }
 0x100   :  { %5633 = vpow2.f32 %v3562_v9 }
 0x101   :  { %5635 = vpow2.f32 %v3563_v20 }
 0x104   :  { %v534_v17 = vpop.f32.mrb[8].mxu1 }
 0x105   :  { %v3969_v18 = vpop.f32.mrb[9].mxu1  ;;  %v552_v28 = vadd.f32 %v6226_v27, %v534_v17 }
 0x10a   :  { %v5634_v24 = vpop.eup %5633 }
 0x10b   :  { %v542_v25 = vadd.f32 1.0, %v5634_v24  ;;  %v5636_v30 = vpop.eup %5635 }
 0x10c   :  { %v549_v41 = vadd.f32 1.0, %v5636_v30 }
 0x10d   :  { %5637 = vrcp.f32 %v542_v25 }
 0x117   :  { %v5638_v32 = vpop.eup %5637 }
 0x118   :  { %v553_v38 = vmul.f32 %v5638_v32, %v552_v28 }
 0x11a   :  { %v554_v46 = vadd.f32 %v553_v38, %v274_v35 }
 0x11c   :  { %5639 = vtanh.f32 %v554_v46 }
 0x11d   :  { %5641 = vrcp.f32 %v549_v41 }
 0x126   :  { %v5640_v49 = vpop.eup %5639 }
 0x127   :  { %v556_v54 = vsub.f32 0.0, %v5640_v49  ;;  %v5642_v57 = vpop.eup %5641 }
 0x129   :  { %v557_v60 = vmul.f32 %v5642_v57, %v556_v54 }
 0x12b   :  { %v6229_v62 = vadd.f32 %v5640_v49, %v557_v60 }
 0x12d   :  { %631 = vmatmul.mubr.f32.vlgmr.msra.gmra.mrb[2].mxu0 %v6229_v62  ;;  %4003 = vmatmul.mubr.f32.vlgmr.msra.gmra.mrb[10].mxu1 %v6229_v62 }
 0x12e   :  { %4697 = vmatpush1.bf16.msra.mxu0 %v5894_v15  ;;  %4728 = vmatpush3.bf16.msra.mxu1 %v5970_v40 }
 0x12f   :  { %4699 = vmatprep.subr.bf16.mxu0 %v5897_v16  ;;  %4729 = vmatprep.subr.bf16.mxu1 %v5795_v48 }
 0x130   :  { %800 = vmatprep.mubr.f32.mxu0 %v5794_v3  ;;  %4037 = vmatprep.mubr.msk.f32.mxu1 %vm5796_vm1, %v5794_v3 }
 0x132   :  { %4701 = vmatpush1.bf16.msra.mxu0 %v5917_v22  ;;  %4731 = vmatpush3.bf16.msra.mxu1 %v6004_v51 }
 0x133   :  { %4703 = vmatprep.subr.bf16.mxu0 %v5920_v23  ;;  %4732 = vmatprep.subr.bf16.mxu1 %v5795_v48 }
 0x136   :  { %4705 = vmatpush1.bf16.msra.mxu0 %v5946_v31  ;;  %4734 = vmatpush3.bf16.msra.mxu1 %v6038_v61 }
 0x137   :  { %4707 = vmatprep.subr.bf16.mxu0 %v5949_v33  ;;  %4735 = vmatprep.subr.bf16.mxu1 %v5795_v48 }
 0x13a   :  { %4709 = vmatpush1.bf16.msra.mxu0 %v5977_v42  ;;  %4737 = vmatpush3.bf16.msra.mxu1 %v6072_v8 }
 0x13b   :  { %4711 = vmatprep.subr.bf16.mxu0 %v5986_v45  ;;  %4738 = vmatprep.subr.bf16.mxu1 %v5795_v48 }
 0x13e   :  { %4713 = vmatpush1.bf16.msra.mxu0 %v6011_v53  ;;  %4740 = vmatpush3.bf16.msra.mxu1 %v6100_v19 }
 0x13f   :  { %4715 = vmatprep.subr.bf16.mxu0 %v6020_v56  ;;  %4741 = vmatprep.subr.bf16.mxu1 %v5795_v48 }
 0x142   :  { %4717 = vmatpush1.bf16.msra.mxu0 %v6045_v63  ;;  %4743 = vmatpush3.bf16.msra.mxu1 %v6120_v26 }
 0x143   :  { %4719 = vmatprep.subr.bf16.mxu0 %v6054_v2  ;;  %4744 = vmatprep.subr.bf16.mxu1 %v5795_v48 }
 0x146   :  { %4721 = vmatpush1.bf16.msra.mxu0 %v6079_v10  ;;  %4746 = vmatpush3.bf16.msra.mxu1 %v6136_v29 }
 0x147   :  { %4723 = vmatprep.subr.bf16.mxu0 %v6088_v14  ;;  %4747 = vmatprep.subr.bf16.mxu1 %v5795_v48 }
 0x14a   :  { %4725 = vmatpush1.bf16.msra.mxu0 %v6107_v21  ;;  %4749 = vmatpush3.bf16.msra.mxu1 %v6151_v34 }
 0x14b   :  { %4751 = vmatprep.subr.bf16.mxu0 %v5886_v12  ;;  %4782 = vmatprep.subr.bf16.mxu1 %v5795_v48 }
 0x200   :  { %v632_v39 = vpop.f32.mrb[2].mxu0  ;;  %v703_v44 = vpop.f32.mrb[10].mxu1 }
 0x201   :  { %v5568_v1 = vadd.f32 %v632_v39, %v6208_v58  ;;  %v634_v4 = vpop.f32.mrb[3].mxu0  ;;  %v4004_v6 = vpop.f32.mrb[11].mxu1  ;;  %v721_v25 = vadd.f32 %v6226_v27, %v703_v44 }
 0x202   :  { %v5569_v13 = vadd.f32 %v634_v4, %v6220_v11 }
 0x203   :  { %v3564_v9 = vmul.f32 -1.442695, %v5568_v1 }
 0x204   :  { %v3565_v17 = vmul.f32 -1.442695, %v5569_v13 }
 0x205   :  { %5643 = vpow2.f32 %v3564_v9 }
 0x206   :  { %5645 = vpow2.f32 %v3565_v17 }
 0x20f   :  { %v5644_v18 = vpop.eup %5643 }
 0x210   :  { %v711_v20 = vadd.f32 1.0, %v5644_v18  ;;  %v5646_v24 = vpop.eup %5645 }
 0x211   :  { %v718_v35 = vadd.f32 1.0, %v5646_v24 }
 0x212   :  { %5647 = vrcp.f32 %v711_v20 }
 0x21c   :  { %v5648_v28 = vpop.eup %5647 }
 0x21d   :  { %v722_v30 = vmul.f32 %v5648_v28, %v721_v25 }
 0x21f   :  { %v723_v32 = vadd.f32 %v722_v30, %v6197_v43 }
 0x221   :  { %5649 = vtanh.f32 %v723_v32 }
 0x222   :  { %5651 = vrcp.f32 %v718_v35 }
 0x22b   :  { %v5650_v38 = vpop.eup %5649 }
 0x22c   :  { %v725_v41 = vsub.f32 %v6229_v62, %v5650_v38  ;;  %v5652_v46 = vpop.eup %5651 }
 0x22e   :  { %v726_v49 = vmul.f32 %v5652_v46, %v725_v41 }
 0x230   :  { %v6273_v54 = vadd.f32 %v5650_v38, %v726_v49 }
 0x232   :  { %801 = vmatmul.mubr.f32.vlgmr.msra.gmra.mrb[4].mxu0 %v6273_v54  ;;  %4038 = vmatmul.mubr.f32.vlgmr.msra.gmra.mrb[12].mxu1 %v6273_v54 }
 0x233   :  { %4753 = vmatpush1.bf16.msra.mxu0 %v5894_v15  ;;  %4784 = vmatpush3.bf16.msra.mxu1 %v5970_v40 }
 0x234   :  { %4755 = vmatprep.subr.bf16.mxu0 %v5897_v16  ;;  %4785 = vmatprep.subr.bf16.mxu1 %v5795_v48 }
 0x235   :  { %970 = vmatprep.mubr.f32.mxu0 %v5794_v3  ;;  %4072 = vmatprep.mubr.msk.f32.mxu1 %vm5796_vm1, %v5794_v3 }
 0x237   :  { %4757 = vmatpush1.bf16.msra.mxu0 %v5917_v22  ;;  %4787 = vmatpush3.bf16.msra.mxu1 %v6004_v51 }
 0x238   :  { %4759 = vmatprep.subr.bf16.mxu0 %v5920_v23  ;;  %4788 = vmatprep.subr.bf16.mxu1 %v5795_v48 }
 0x23b   :  { %4761 = vmatpush1.bf16.msra.mxu0 %v5946_v31  ;;  %4790 = vmatpush3.bf16.msra.mxu1 %v6038_v61 }
 0x23c   :  { %4763 = vmatprep.subr.bf16.mxu0 %v5949_v33  ;;  %4791 = vmatprep.subr.bf16.mxu1 %v5795_v48 }
 0x23f   :  { %4765 = vmatpush1.bf16.msra.mxu0 %v5977_v42  ;;  %4793 = vmatpush3.bf16.msra.mxu1 %v6072_v8 }
 0x240   :  { %4767 = vmatprep.subr.bf16.mxu0 %v5986_v45  ;;  %4794 = vmatprep.subr.bf16.mxu1 %v5795_v48 }
 0x243   :  { %4769 = vmatpush1.bf16.msra.mxu0 %v6011_v53  ;;  %4796 = vmatpush3.bf16.msra.mxu1 %v6100_v19 }
 0x244   :  { %4771 = vmatprep.subr.bf16.mxu0 %v6020_v56  ;;  %4797 = vmatprep.subr.bf16.mxu1 %v5795_v48 }
 0x247   :  { %4773 = vmatpush1.bf16.msra.mxu0 %v6045_v63  ;;  %4799 = vmatpush3.bf16.msra.mxu1 %v6120_v26 }
 0x248   :  { %4775 = vmatprep.subr.bf16.mxu0 %v6054_v2  ;;  %4800 = vmatprep.subr.bf16.mxu1 %v5795_v48 }
 0x24b   :  { %4777 = vmatpush1.bf16.msra.mxu0 %v6079_v10  ;;  %4802 = vmatpush3.bf16.msra.mxu1 %v6136_v29 }
 0x24c   :  { %4779 = vmatprep.subr.bf16.mxu0 %v6088_v14  ;;  %4803 = vmatprep.subr.bf16.mxu1 %v5795_v48 }
 0x24f   :  { %4781 = vmatpush1.bf16.msra.mxu0 %v6107_v21  ;;  %4805 = vmatpush3.bf16.msra.mxu1 %v6151_v34 }
 0x250   :  { %4807 = vmatprep.subr.bf16.mxu0 %v5886_v12  ;;  %4838 = vmatprep.subr.bf16.mxu1 %v5795_v48 }
 0x305   :  { %v802_v43 = vpop.f32.mrb[4].mxu0  ;;  %v873_v57 = vpop.f32.mrb[12].mxu1 }
 0x306   :  { %v5570_v60 = vadd.f32 %v802_v43, %v6208_v58  ;;  %v804_v39 = vpop.f32.mrb[5].mxu0  ;;  %v4039_v44 = vpop.f32.mrb[13].mxu1  ;;  %v891_v18 = vadd.f32 %v6226_v27, %v873_v57 }
 0x307   :  { %v5571_v4 = vadd.f32 %v804_v39, %v6220_v11 }
 0x308   :  { %v3566_v1 = vmul.f32 -1.442695, %v5570_v60 }
 0x309   :  { %v3567_v6 = vmul.f32 -1.442695, %v5571_v4 }
 0x30a   :  { %5653 = vpow2.f32 %v3566_v1 }
 0x30b   :  { %5655 = vpow2.f32 %v3567_v6 }
 0x314   :  { %v5654_v9 = vpop.eup %5653 }
 0x315   :  { %v881_v13 = vadd.f32 1.0, %v5654_v9  ;;  %v5656_v17 = vpop.eup %5655 }
 0x316   :  { %v888_v28 = vadd.f32 1.0, %v5656_v17 }
 0x317   :  { %5657 = vrcp.f32 %v881_v13 }
 0x321   :  { %v5658_v20 = vpop.eup %5657 }
 0x322   :  { %v892_v24 = vmul.f32 %v5658_v20, %v891_v18 }
 0x324   :  { %v893_v25 = vadd.f32 %v892_v24, %v6201_v50 }
 0x326   :  { %5659 = vtanh.f32 %v893_v25 }
 0x327   :  { %5661 = vrcp.f32 %v888_v28 }
 0x330   :  { %v5660_v30 = vpop.eup %5659 }
 0x331   :  { %v895_v32 = vsub.f32 %v6273_v54, %v5660_v30  ;;  %v5662_v35 = vpop.eup %5661 }
 0x333   :  { %v896_v38 = vmul.f32 %v5662_v35, %v895_v32 }
 0x335   :  { %v6317_v41 = vadd.f32 %v5660_v30, %v896_v38 }
 0x337   :  { %971 = vmatmul.mubr.f32.vlgmr.msra.gmra.mrb[6].mxu0 %v6317_v41  ;;  %4073 = vmatmul.mubr.f32.vlgmr.msra.gmra.mrb[14].mxu1 %v6317_v41 }
 0x338   :  { %4809 = vmatpush1.bf16.msra.mxu0 %v5894_v15  ;;  %4840 = vmatpush3.bf16.msra.mxu1 %v5970_v40 }
 0x339   :  { %4811 = vmatprep.subr.bf16.mxu0 %v5897_v16  ;;  %4841 = vmatprep.subr.bf16.mxu1 %v5795_v48 }
 0x33a   :  { %1140 = vmatprep.mubr.f32.mxu0 %v5794_v3  ;;  %4107 = vmatprep.mubr.msk.f32.mxu1 %vm5796_vm1, %v5794_v3 }
 0x33c   :  { %4813 = vmatpush1.bf16.msra.mxu0 %v5917_v22  ;;  %4843 = vmatpush3.bf16.msra.mxu1 %v6004_v51 }
 0x33d   :  { %4815 = vmatprep.subr.bf16.mxu0 %v5920_v23  ;;  %4844 = vmatprep.subr.bf16.mxu1 %v5795_v48 }
 0x340   :  { %4817 = vmatpush1.bf16.msra.mxu0 %v5946_v31  ;;  %4846 = vmatpush3.bf16.msra.mxu1 %v6038_v61 }
 0x341   :  { %4819 = vmatprep.subr.bf16.mxu0 %v5949_v33  ;;  %4847 = vmatprep.subr.bf16.mxu1 %v5795_v48 }
 0x344   :  { %4821 = vmatpush1.bf16.msra.mxu0 %v5977_v42  ;;  %4849 = vmatpush3.bf16.msra.mxu1 %v6072_v8 }
 0x345   :  { %4823 = vmatprep.subr.bf16.mxu0 %v5986_v45  ;;  %4850 = vmatprep.subr.bf16.mxu1 %v5795_v48 }
 0x348   :  { %4825 = vmatpush1.bf16.msra.mxu0 %v6011_v53  ;;  %4852 = vmatpush3.bf16.msra.mxu1 %v6100_v19 }
 0x349   :  { %4827 = vmatprep.subr.bf16.mxu0 %v6020_v56  ;;  %4853 = vmatprep.subr.bf16.mxu1 %v5795_v48 }
 0x34c   :  { %4829 = vmatpush1.bf16.msra.mxu0 %v6045_v63  ;;  %4855 = vmatpush3.bf16.msra.mxu1 %v6120_v26 }
 0x34d   :  { %4831 = vmatprep.subr.bf16.mxu0 %v6054_v2  ;;  %4856 = vmatprep.subr.bf16.mxu1 %v5795_v48 }
 0x350   :  { %4833 = vmatpush1.bf16.msra.mxu0 %v6079_v10  ;;  %4858 = vmatpush3.bf16.msra.mxu1 %v6136_v29 }
 0x351   :  { %4835 = vmatprep.subr.bf16.mxu0 %v6088_v14  ;;  %4859 = vmatprep.subr.bf16.mxu1 %v5795_v48 }
 0x354   :  { %4837 = vmatpush1.bf16.msra.mxu0 %v6107_v21  ;;  %4861 = vmatpush3.bf16.msra.mxu1 %v6151_v34 }
 0x355   :  { %4863 = vmatprep.subr.bf16.mxu0 %v5886_v12  ;;  %4894 = vmatprep.subr.bf16.mxu1 %v5795_v48 }
 0x40a   :  { %v972_v50 = vpop.f32.mrb[6].mxu0  ;;  %v1043_v46 = vpop.f32.mrb[14].mxu1 }
 0x40b   :  { %v5572_v49 = vadd.f32 %v972_v50, %v6208_v58  ;;  %v974_v43 = vpop.f32.mrb[7].mxu0  ;;  %v4074_v57 = vpop.f32.mrb[15].mxu1  ;;  %v1061_v9 = vadd.f32 %v6226_v27, %v1043_v46 }
 0x40c   :  { %v5573_v39 = vadd.f32 %v974_v43, %v6220_v11 }
 0x40d   :  { %v3568_v60 = vmul.f32 -1.442695, %v5572_v49 }
 0x40e   :  { %v3569_v44 = vmul.f32 -1.442695, %v5573_v39 }
 0x40f   :  { %5663 = vpow2.f32 %v3568_v60 }
 0x410   :  { %5665 = vpow2.f32 %v3569_v44 }
 0x419   :  { %v5664_v1 = vpop.eup %5663 }
 0x41a   :  { %v1051_v4 = vadd.f32 1.0, %v5664_v1  ;;  %v5666_v6 = vpop.eup %5665 }
 0x41b   :  { %v1058_v20 = vadd.f32 1.0, %v5666_v6 }
 0x41c   :  { %5667 = vrcp.f32 %v1051_v4 }
 0x426   :  { %v5668_v13 = vpop.eup %5667 }
 0x427   :  { %v1062_v17 = vmul.f32 %v5668_v13, %v1061_v9 }
 0x429   :  { %v1063_v18 = vadd.f32 %v1062_v17, %v6199_v47 }
 0x42b   :  { %5669 = vtanh.f32 %v1063_v18 }
 0x42c   :  { %5671 = vrcp.f32 %v1058_v20 }
 0x435   :  { %v5670_v24 = vpop.eup %5669 }
 0x436   :  { %v1065_v25 = vsub.f32 %v6317_v41, %v5670_v24  ;;  %v5672_v28 = vpop.eup %5671 }
 0x438   :  { %v1066_v30 = vmul.f32 %v5672_v28, %v1065_v25 }
 0x43a   :  { %v6361_v32 = vadd.f32 %v5670_v24, %v1066_v30 }
 0x43c   :  { %1141 = vmatmul.mubr.f32.vlgmr.msra.gmra.mrb[8].mxu0 %v6361_v32  ;;  %4108 = vmatmul.mubr.f32.vlgmr.msra.gmra.mrb[16].mxu1 %v6361_v32 }
 0x43d   :  { %4865 = vmatpush1.bf16.msra.mxu0 %v5894_v15  ;;  %4896 = vmatpush3.bf16.msra.mxu1 %v5970_v40 }
 0x43e   :  { %4867 = vmatprep.subr.bf16.mxu0 %v5897_v16  ;;  %4897 = vmatprep.subr.bf16.mxu1 %v5795_v48 }
 0x43f   :  { %1310 = vmatprep.mubr.f32.mxu0 %v5794_v3  ;;  %4142 = vmatprep.mubr.msk.f32.mxu1 %vm5796_vm1, %v5794_v3 }
 0x441   :  { %4869 = vmatpush1.bf16.msra.mxu0 %v5917_v22  ;;  %4899 = vmatpush3.bf16.msra.mxu1 %v6004_v51 }
 0x442   :  { %4871 = vmatprep.subr.bf16.mxu0 %v5920_v23  ;;  %4900 = vmatprep.subr.bf16.mxu1 %v5795_v48 }
 0x445   :  { %4873 = vmatpush1.bf16.msra.mxu0 %v5946_v31  ;;  %4902 = vmatpush3.bf16.msra.mxu1 %v6038_v61 }
 0x446   :  { %4875 = vmatprep.subr.bf16.mxu0 %v5949_v33  ;;  %4903 = vmatprep.subr.bf16.mxu1 %v5795_v48 }
 0x449   :  { %4877 = vmatpush1.bf16.msra.mxu0 %v5977_v42  ;;  %4905 = vmatpush3.bf16.msra.mxu1 %v6072_v8 }
 0x44a   :  { %4879 = vmatprep.subr.bf16.mxu0 %v5986_v45  ;;  %4906 = vmatprep.subr.bf16.mxu1 %v5795_v48 }
 0x44d   :  { %4881 = vmatpush1.bf16.msra.mxu0 %v6011_v53  ;;  %4908 = vmatpush3.bf16.msra.mxu1 %v6100_v19 }
 0x44e   :  { %4883 = vmatprep.subr.bf16.mxu0 %v6020_v56  ;;  %4909 = vmatprep.subr.bf16.mxu1 %v5795_v48 }
 0x451   :  { %4885 = vmatpush1.bf16.msra.mxu0 %v6045_v63  ;;  %4911 = vmatpush3.bf16.msra.mxu1 %v6120_v26 }
 0x452   :  { %4887 = vmatprep.subr.bf16.mxu0 %v6054_v2  ;;  %4912 = vmatprep.subr.bf16.mxu1 %v5795_v48 }
 0x455   :  { %4889 = vmatpush1.bf16.msra.mxu0 %v6079_v10  ;;  %4914 = vmatpush3.bf16.msra.mxu1 %v6136_v29 }
 0x456   :  { %4891 = vmatprep.subr.bf16.mxu0 %v6088_v14  ;;  %4915 = vmatprep.subr.bf16.mxu1 %v5795_v48 }
 0x459   :  { %4893 = vmatpush1.bf16.msra.mxu0 %v6107_v21  ;;  %4917 = vmatpush3.bf16.msra.mxu1 %v6151_v34 }
 0x45a   :  { %4919 = vmatprep.subr.bf16.mxu0 %v5886_v12  ;;  %4950 = vmatprep.subr.bf16.mxu1 %v5795_v48 }
 0x50f   :  { %v1142_v47 = vpop.f32.mrb[8].mxu0  ;;  %v1213_v35 = vpop.f32.mrb[16].mxu1 }
 0x510   :  { %v5574_v38 = vadd.f32 %v1142_v47, %v6208_v58  ;;  %v1144_v50 = vpop.f32.mrb[9].mxu0  ;;  %v4109_v46 = vpop.f32.mrb[17].mxu1  ;;  %v1231_v1 = vadd.f32 %v6226_v27, %v1213_v35 }
 0x511   :  { %v5575_v43 = vadd.f32 %v1144_v50, %v6220_v11 }
 0x512   :  { %v3570_v49 = vmul.f32 -1.442695, %v5574_v38 }
 0x513   :  { %v3571_v57 = vmul.f32 -1.442695, %v5575_v43 }
 0x514   :  { %5673 = vpow2.f32 %v3570_v49 }
 0x515   :  { %5675 = vpow2.f32 %v3571_v57 }
 0x51e   :  { %v5674_v60 = vpop.eup %5673 }
 0x51f   :  { %v1221_v39 = vadd.f32 1.0, %v5674_v60  ;;  %v5676_v44 = vpop.eup %5675 }
 0x520   :  { %v1228_v13 = vadd.f32 1.0, %v5676_v44 }
 0x521   :  { %5677 = vrcp.f32 %v1221_v39 }
 0x52b   :  { %v5678_v4 = vpop.eup %5677 }
 0x52c   :  { %v1232_v6 = vmul.f32 %v5678_v4, %v1231_v1 }
 0x52e   :  { %v1233_v9 = vadd.f32 %v1232_v6, %v6210_v59 }
 0x530   :  { %5679 = vtanh.f32 %v1233_v9 }
 0x531   :  { %5681 = vrcp.f32 %v1228_v13 }
 0x53a   :  { %v5680_v17 = vpop.eup %5679 }
 0x53b   :  { %v1235_v18 = vsub.f32 %v6361_v32, %v5680_v17  ;;  %v5682_v20 = vpop.eup %5681 }
 0x53d   :  { %v1236_v24 = vmul.f32 %v5682_v20, %v1235_v18  ;;  %v1758_v18 = vld [vmem:[%s7317_s5] sm:$0xff]  ;;  %v1761_v20 = vld [vmem:[%s7317_s5 + $0x18] sm:$0xff] }
 0x53f   :  { %v6405_v25 = vadd.f32 %v5680_v17, %v1236_v24 }
 0x541   :  { %1311 = vmatmul.mubr.f32.vlgmr.msra.gmra.mrb[10].mxu0 %v6405_v25  ;;  %4143 = vmatmul.mubr.f32.vlgmr.msra.gmra.mrb[18].mxu1 %v6405_v25 }
 0x542   :  { %4921 = vmatpush1.bf16.msra.mxu0 %v5894_v15  ;;  %4952 = vmatpush3.bf16.msra.mxu1 %v5970_v40 }
 0x543   :  { %4923 = vmatprep.subr.bf16.mxu0 %v5897_v16  ;;  %4953 = vmatprep.subr.bf16.mxu1 %v5795_v48 }
 0x544   :  { %1480 = vmatprep.mubr.f32.mxu0 %v5794_v3  ;;  %4177 = vmatprep.mubr.msk.f32.mxu1 %vm5796_vm1, %v5794_v3 }
 0x546   :  { %4925 = vmatpush1.bf16.msra.mxu0 %v5917_v22  ;;  %4955 = vmatpush3.bf16.msra.mxu1 %v6004_v51 }
 0x547   :  { %4927 = vmatprep.subr.bf16.mxu0 %v5920_v23  ;;  %4956 = vmatprep.subr.bf16.mxu1 %v5795_v48 }
 0x54a   :  { %4929 = vmatpush1.bf16.msra.mxu0 %v5946_v31  ;;  %4958 = vmatpush3.bf16.msra.mxu1 %v6038_v61 }
 0x54b   :  { %4931 = vmatprep.subr.bf16.mxu0 %v5949_v33  ;;  %4959 = vmatprep.subr.bf16.mxu1 %v5795_v48 }
 0x54e   :  { %4933 = vmatpush1.bf16.msra.mxu0 %v5977_v42  ;;  %4961 = vmatpush3.bf16.msra.mxu1 %v6072_v8 }
 0x54f   :  { %4935 = vmatprep.subr.bf16.mxu0 %v5986_v45  ;;  %4962 = vmatprep.subr.bf16.mxu1 %v5795_v48 }
 0x552   :  { %4937 = vmatpush1.bf16.msra.mxu0 %v6011_v53  ;;  %4964 = vmatpush3.bf16.msra.mxu1 %v6100_v19 }
 0x553   :  { %4939 = vmatprep.subr.bf16.mxu0 %v6020_v56  ;;  %4965 = vmatprep.subr.bf16.mxu1 %v5795_v48 }
 0x556   :  { %4941 = vmatpush1.bf16.msra.mxu0 %v6045_v63  ;;  %4967 = vmatpush3.bf16.msra.mxu1 %v6120_v26 }
 0x557   :  { %4943 = vmatprep.subr.bf16.mxu0 %v6054_v2  ;;  %4968 = vmatprep.subr.bf16.mxu1 %v5795_v48 }
 0x55a   :  { %4945 = vmatpush1.bf16.msra.mxu0 %v6079_v10  ;;  %4970 = vmatpush3.bf16.msra.mxu1 %v6136_v29 }
 0x55b   :  { %4947 = vmatprep.subr.bf16.mxu0 %v6088_v14  ;;  %4971 = vmatprep.subr.bf16.mxu1 %v5795_v48 }
 0x55e   :  { %4949 = vmatpush1.bf16.msra.mxu0 %v6107_v21  ;;  %4973 = vmatpush3.bf16.msra.mxu1 %v6151_v34 }
 0x55f   :  { %4975 = vmatprep.subr.bf16.mxu0 %v5886_v12  ;;  %5006 = vmatprep.subr.bf16.mxu1 %v5795_v48 }
 0x614   :  { %v1312_v59 = vpop.f32.mrb[10].mxu0  ;;  %v1383_v28 = vpop.f32.mrb[18].mxu1 }
 0x615   :  { %v5576_v30 = vadd.f32 %v1312_v59, %v6208_v58  ;;  %v1314_v47 = vpop.f32.mrb[11].mxu0  ;;  %v4144_v35 = vpop.f32.mrb[19].mxu1  ;;  %v1401_v12 = vadd.f32 %v6226_v27, %v1383_v28  ;;  %v1766_v28 = vld [vmem:[%s7317_s5 + $0x40] sm:$0xff] }
 0x616   :  { %v5577_v50 = vadd.f32 %v1314_v47, %v6220_v11  ;;  %v5032_v47 = vpack.c.bf16 %v1761_v20, %v1758_v18  ;;  %v1791_v18 = vld [vmem:[%s7317_s5 + $0x108] sm:$0xff] }
 0x617   :  { %v3572_v38 = vmul.f32 -1.442695, %v5576_v30  ;;  %v1769_v30 = vld [vmem:[%s7317_s5 + $0x58] sm:$0xff]  ;;  %v1795_v20 = vld [vmem:[%s7317_s5 + $0x128] sm:$0xff] }
 0x618   :  { %v3573_v46 = vmul.f32 -1.442695, %v5577_v50  ;;  %v1764_v50 = vld [vmem:[%s7317_s5 + $0x30] sm:$0xff] }
 0x619   :  { %5683 = vpow2.f32 %v3572_v38 }
 0x61a   :  { %5685 = vpow2.f32 %v3573_v46  ;;  %v1767_v46 = vld [vmem:[%s7317_s5 + $0x48] sm:$0xff] }
 0x623   :  { %v5684_v49 = vpop.eup %5683 }
 0x624   :  { %v1391_v43 = vadd.f32 1.0, %v5684_v49  ;;  %v5686_v57 = vpop.eup %5685  ;;  %v1771_v49 = vld [vmem:[%s7317_s5 + $0x68] sm:$0xff] }
 0x625   :  { %v1398_v1 = vadd.f32 1.0, %v5686_v57  ;;  %v1774_v57 = vld [vmem:[%s7317_s5 + $0x80] sm:$0xff] }
 0x626   :  { %5687 = vrcp.f32 %v1391_v43  ;;  %v5066_v43 = vpack.c.bf16 %v1769_v30, %v1766_v28 }
 0x630   :  { %v5688_v60 = vpop.eup %5687 }
 0x631   :  { %v1402_v39 = vmul.f32 %v5688_v60, %v1401_v12  ;;  %v1772_v12 = vld [vmem:[%s7317_s5 + $0x70] sm:$0xff]  ;;  %v1775_v60 = vld [vmem:[%s7317_s5 + $0x88] sm:$0xff] }
 0x633   :  { %v1403_v44 = vadd.f32 %v1402_v39, %v6204_v55  ;;  %v5036_v39 = vpack.c.bf16 %v1767_v46, %v1764_v50  ;;  %v1801_v50 = vld [vmem:[%s7317_s5 + $0x158] sm:$0xff]  ;;  %v1804_v46 = vld [vmem:[%s7317_s5 + $0x170] sm:$0xff] }
 0x635   :  { %5689 = vtanh.f32 %v1403_v44  ;;  %v5038_v44 = vpack.c.bf16 %v1774_v57, %v1771_v49  ;;  %v1802_v49 = vld [vmem:[%s7317_s5 + $0x160] sm:$0xff] }
 0x636   :  { %5691 = vrcp.f32 %v1398_v1  ;;  %v5070_v1 = vpack.c.bf16 %v1775_v60, %v1772_v12  ;;  %v5058_v12 = vpack.c.bf16 %v1804_v46, %v1801_v50  ;;  %v2108_v46 = vld [vmem:[%s7318_s6 + $0x158] sm:$0xff] }
 0x63f   :  { %v5690_v4 = vpop.eup %5689 }
 0x640   :  { %v1405_v6 = vsub.f32 %v6405_v25, %v5690_v4  ;;  %v5692_v9 = vpop.eup %5691 }
 0x642   :  { %v1406_v13 = vmul.f32 %v5692_v9, %v1405_v6  ;;  %v1773_v6 = vld [vmem:[%s7317_s5 + $0x78] sm:$0xff] }
 0x643   :  { %v1777_v9 = vld [vmem:[%s7317_s5 + $0x98] sm:$0xff] }
 0x644   :  { %v6449_v17 = vadd.f32 %v5690_v4, %v1406_v13  ;;  %v1770_v4 = vld [vmem:[%s7317_s5 + $0x60] sm:$0xff]  ;;  %v1780_v13 = vld [vmem:[%s7317_s5 + $0xb0] sm:$0xff] }
 0x646   :  { %1481 = vmatmul.mubr.f32.vlgmr.msra.gmra.mrb[12].mxu0 %v6449_v17  ;;  %4178 = vmatmul.mubr.f32.vlgmr.msra.gmra.mrb[20].mxu1 %v6449_v17 }
 0x647   :  { %4977 = vmatpush1.bf16.msra.mxu0 %v5894_v15  ;;  %5008 = vmatpush3.bf16.msra.mxu1 %v5970_v40  ;;  %v1759_v15 = vld [vmem:[%s7317_s5 + $0x8] sm:$0xff] }
 0x648   :  { %4979 = vmatprep.subr.bf16.mxu0 %v5897_v16  ;;  %5009 = vmatprep.subr.bf16.mxu1 %v5795_v48  ;;  %v1762_v16 = vld [vmem:[%s7317_s5 + $0x20] sm:$0xff] }
 0x649   :  { %1650 = vmatprep.mubr.f32.mxu0 %v5794_v3  ;;  %4212 = vmatprep.mubr.msk.f32.mxu1 %vm5796_vm1, %v5794_v3 }
 0x64b   :  { %4981 = vmatpush1.bf16.msra.mxu0 %v5917_v22  ;;  %5011 = vmatpush3.bf16.msra.mxu1 %v6004_v51  ;;  %v1760_v22 = vld [vmem:[%s7317_s5 + $0x10] sm:$0xff] }
 0x64c   :  { %4983 = vmatprep.subr.bf16.mxu0 %v5920_v23  ;;  %5012 = vmatprep.subr.bf16.mxu1 %v5795_v48  ;;  %v5030_v23 = vpack.c.bf16 %v1762_v16, %v1759_v15  ;;  %v1778_v15 = vld [vmem:[%s7317_s5 + $0xa0] sm:$0xff]  ;;  %v1781_v16 = vld [vmem:[%s7317_s5 + $0xb8] sm:$0xff] }
 0x64f   :  { %4985 = vmatpush1.bf16.msra.mxu0 %v5946_v31  ;;  %5014 = vmatpush3.bf16.msra.mxu1 %v6038_v61  ;;  %v1763_v31 = vld [vmem:[%s7317_s5 + $0x28] sm:$0xff] }
 0x650   :  { %4987 = vmatprep.subr.bf16.mxu0 %v5949_v33  ;;  %5015 = vmatprep.subr.bf16.mxu1 %v5795_v48  ;;  %v5062_v33 = vpack.c.bf16 %v1763_v31, %v1760_v22  ;;  %v5040_v22 = vpack.c.bf16 %v1773_v6, %v1770_v4  ;;  %v5074_v31 = vpack.c.bf16 %v1781_v16, %v1778_v15  ;;  %v2072_v4 = vld [vmem:[%s7318_s6 + $0x38] sm:$0xff]  ;;  %v2075_v6 = vld [vmem:[%s7318_s6 + $0x50] sm:$0xff]  ;;  %v2074_v15 = vld [vmem:[%s7318_s6 + $0x48] sm:$0xff] }
 0x653   :  { %4989 = vmatpush1.bf16.msra.mxu0 %v5977_v42  ;;  %5017 = vmatpush3.bf16.msra.mxu1 %v6072_v8 }
 0x654   :  { %4991 = vmatprep.subr.bf16.mxu0 %v5986_v45  ;;  %5018 = vmatprep.subr.bf16.mxu1 %v5795_v48 }
 0x657   :  { %4993 = vmatpush1.bf16.msra.mxu0 %v6011_v53  ;;  %5020 = vmatpush3.bf16.msra.mxu1 %v6100_v19 }
 0x658   :  { %4995 = vmatprep.subr.bf16.mxu0 %v6020_v56  ;;  %5021 = vmatprep.subr.bf16.mxu1 %v5795_v48 }
 0x65b   :  { %4997 = vmatpush1.bf16.msra.mxu0 %v6045_v63  ;;  %5023 = vmatpush3.bf16.msra.mxu1 %v6120_v26 }
 0x65c   :  { %4999 = vmatprep.subr.bf16.mxu0 %v6054_v2  ;;  %5024 = vmatprep.subr.bf16.mxu1 %v5795_v48 }
 0x65f   :  { %5001 = vmatpush1.bf16.msra.mxu0 %v6079_v10  ;;  %5026 = vmatpush3.bf16.msra.mxu1 %v6136_v29 }
 0x660   :  { %5003 = vmatprep.subr.bf16.mxu0 %v6088_v14  ;;  %5027 = vmatprep.subr.bf16.mxu1 %v5795_v48 }
 0x663   :  { %5005 = vmatpush1.bf16.msra.mxu0 %v6107_v21  ;;  %5029 = vmatpush3.bf16.msra.mxu1 %v6151_v34 }
 0x664   :  { %5031 = vmatprep.subr.bf16.mxu0 %v5030_v23  ;;  %5063 = vmatprep.subr.bf16.mxu1 %v5062_v33  ;;  %v5042_v23 = vpack.c.bf16 %v1780_v13, %v1777_v9  ;;  %v6686_v9 = vpack.c.bf16 %v2075_v6, %v2072_v4  ;;  %v2071_v13 = vld [vmem:[%s7318_s6 + $0x30] sm:$0xff]  ;;  %v2088_v4 = vld [vmem:[%s7318_s6 + $0xb8] sm:$0xff] }
 0x665   :  { %v6694_v16 = vpack.c.bf16 %v2074_v15, %v2071_v13  ;;  %v2091_v13 = vld [vmem:[%s7318_s6 + $0xd0] sm:$0xff]  ;;  %v2094_v15 = vld [vmem:[%s7318_s6 + $0xe8] sm:$0xff] }
 0x719   :  { %v1482_v40 = vpop.f32.mrb[12].mxu0  ;;  %v1553_v42 = vpop.f32.mrb[20].mxu1 }
 0x71a   :  { %v5578_v45 = vadd.f32 %v1482_v40, %v6208_v58  ;;  %v1484_v51 = vpop.f32.mrb[13].mxu0  ;;  %v4179_v53 = vpop.f32.mrb[21].mxu1  ;;  %v1571_v14 = vadd.f32 %v6226_v27, %v1553_v42  ;;  %v1765_v27 = vld [vmem:[%s7317_s5 + $0x38] sm:$0xff]  ;;  %v1779_v40 = vld [vmem:[%s7317_s5 + $0xa8] sm:$0xff] }
 0x71b   :  { %v5579_v61 = vadd.f32 %v1484_v51, %v6220_v11  ;;  %v1783_v42 = vld [vmem:[%s7317_s5 + $0xc8] sm:$0xff]  ;;  %v1784_v51 = vld [vmem:[%s7317_s5 + $0xd0] sm:$0xff] }
 0x71c   :  { %v3574_v56 = vmul.f32 -1.442695, %v5578_v45  ;;  %v1786_v45 = vld [vmem:[%s7317_s5 + $0xe0] sm:$0xff]  ;;  %v1787_v53 = vld [vmem:[%s7317_s5 + $0xe8] sm:$0xff] }
 0x71d   :  { %v3575_v63 = vmul.f32 -1.442695, %v5579_v61  ;;  %v5046_v61 = vpack.c.bf16 %v1786_v45, %v1783_v42  ;;  %v2084_v45 = vld [vmem:[%s7318_s6 + $0x98] sm:$0xff] }
 0x71e   :  { %5693 = vpow2.f32 %v3574_v56 }
 0x71f   :  { %5695 = vpow2.f32 %v3575_v63  ;;  %v5078_v63 = vpack.c.bf16 %v1787_v53, %v1784_v51  ;;  %v2087_v51 = vld [vmem:[%s7318_s6 + $0xb0] sm:$0xff] }
 0x720   :  { %v6722_v53 = vpack.c.bf16 %v2087_v51, %v2084_v45  ;;  %v2103_v45 = vld [vmem:[%s7318_s6 + $0x130] sm:$0xff]  ;;  %v2106_v51 = vld [vmem:[%s7318_s6 + $0x148] sm:$0xff] }
 0x728   :  { %v5694_v2 = vpop.eup %5693 }
 0x729   :  { %v1561_v8 = vadd.f32 1.0, %v5694_v2  ;;  %v5696_v10 = vpop.eup %5695  ;;  %v1782_v2 = vld [vmem:[%s7317_s5 + $0xc0] sm:$0xff] }
 0x72a   :  { %v1568_v29 = vadd.f32 1.0, %v5696_v10  ;;  %v1789_v10 = vld [vmem:[%s7317_s5 + $0xf8] sm:$0xff] }
 0x72b   :  { %5697 = vrcp.f32 %v1561_v8  ;;  %v1785_v8 = vld [vmem:[%s7317_s5 + $0xd8] sm:$0xff] }
 0x735   :  { %v5698_v19 = vpop.eup %5697 }
 0x736   :  { %v1572_v21 = vmul.f32 %v5698_v19, %v1571_v14  ;;  %v1792_v14 = vld [vmem:[%s7317_s5 + $0x110] sm:$0xff]  ;;  %v1790_v19 = vld [vmem:[%s7317_s5 + $0x100] sm:$0xff] }
 0x738   :  { %v1573_v26 = vadd.f32 %v1572_v21, %v6216_v7  ;;  %v1768_v7 = vld [vmem:[%s7317_s5 + $0x50] sm:$0xff]  ;;  %v1793_v21 = vld [vmem:[%s7317_s5 + $0x118] sm:$0xff] }
 0x739   :  { %v5034_v38 = vpack.c.bf16 %v1768_v7, %v1765_v27  ;;  %v1796_v27 = vld [vmem:[%s7317_s5 + $0x130] sm:$0xff]  ;;  %v1799_v7 = vld [vmem:[%s7317_s5 + $0x148] sm:$0xff] }
 0x73a   :  { %5699 = vtanh.f32 %v1573_v26  ;;  %v5048_v26 = vpack.c.bf16 %v1785_v8, %v1782_v2  ;;  %v5086_v30 = vpack.c.bf16 %v1799_v7, %v1796_v27  ;;  %v2090_v2 = vld [vmem:[%s7318_s6 + $0xc8] sm:$0xff]  ;;  %v2093_v8 = vld [vmem:[%s7318_s6 + $0xe0] sm:$0xff] }
 0x73b   :  { %5701 = vrcp.f32 %v1568_v29  ;;  %v5050_v29 = vpack.c.bf16 %v1792_v14, %v1789_v10  ;;  %v6740_v10 = vpack.c.bf16 %v2093_v8, %v2090_v2  ;;  %v2089_v14 = vld [vmem:[%s7318_s6 + $0xc0] sm:$0xff]  ;;  %v2112_v2 = vld [vmem:[%s7318_s6 + $0x178] sm:$0xff] }
 0x73c   :  { %v2105_v27 = vld [vmem:[%s7318_s6 + $0x140] sm:$0xff] }
 0x73d   :  { %v2101_v7 = vld [vmem:[%s7318_s6 + $0x120] sm:$0xff] }
 0x744   :  { %v5700_v34 = vpop.eup %5699 }
 0x745   :  { %v1575_v55 = vsub.f32 %v6449_v17, %v5700_v34  ;;  %v5702_v24 = vpop.eup %5701 }
 0x747   :  { %v1576_v59 = vmul.f32 %v5702_v24, %v1575_v55  ;;  %v1788_v55 = vld [vmem:[%s7317_s5 + $0xf0] sm:$0xff]  ;;  %v1798_v24 = vld [vmem:[%s7317_s5 + $0x140] sm:$0xff] }
 0x748   :  { %v5054_v28 = vpack.c.bf16 %v1798_v24, %v1795_v20  ;;  %v2102_v24 = vld [vmem:[%s7318_s6 + $0x128] sm:$0xff] }
 0x749   :  { %v6521_v35 = vadd.f32 %v5700_v34, %v1576_v59  ;;  %v5082_v34 = vpack.c.bf16 %v1793_v21, %v1790_v19  ;;  %v5052_v59 = vpack.c.bf16 %v1791_v18, %v1788_v55  ;;  %v2092_v19 = vld [vmem:[%s7318_s6 + $0xd8] sm:$0xff]  ;;  %v2095_v55 = vld [vmem:[%s7318_s6 + $0xf0] sm:$0xff]  ;;  %v2098_v18 = vld [vmem:[%s7318_s6 + $0x108] sm:$0xff] }
 0x74a   :  { %v6748_v21 = vpack.c.bf16 %v2092_v19, %v2089_v14  ;;  %v6766_v20 = vpack.c.bf16 %v2098_v18, %v2095_v55 }
 0x74b   :  { %1651 = vmatmul.mubr.f32.vlgmr.msra.gmra.mrb[14].mxu0 %v6521_v35  ;;  %4213 = vmatmul.mubr.f32.vlgmr.msra.gmra.mrb[22].mxu1 %v6521_v35 }
 0x74c   :  { %5033 = vmatpush1.bf16.msra.mxu0 %v5032_v47  ;;  %5065 = vmatpush3.bf16.msra.mxu1 %v5062_v33  ;;  %v1776_v33 = vld [vmem:[%s7317_s5 + $0x90] sm:$0xff]  ;;  %v1794_v47 = vld [vmem:[%s7317_s5 + $0x120] sm:$0xff] }
 0x74d   :  { %4247 = vmatprep.mubr.f32.mxu1 %v6229_v62  ;;  %5035 = vmatprep.subr.bf16.mxu0 %v5034_v38  ;;  %v5044_v56 = vpack.c.bf16 %v1779_v40, %v1776_v33  ;;  %v1797_v38 = vld [vmem:[%s7317_s5 + $0x138] sm:$0xff]  ;;  %v2077_v33 = vld [vmem:[%s7318_s6 + $0x60] sm:$0xff] }
 0x74e   :  { %5067 = vmatprep.subr.bf16.mxu1 %v5066_v43  ;;  %1887 = vmatprep.mubr.f32.mxu0 %v5794_v3  ;;  %v5056_v57 = vpack.c.bf16 %v1797_v38, %v1794_v47  ;;  %v2080_v40 = vld [vmem:[%s7318_s6 + $0x78] sm:$0xff]  ;;  %v2070_v47 = vld [vmem:[%s7318_s6 + $0x28] sm:$0xff] }
 0x74f   :  { %v6712_v42 = vpack.c.bf16 %v2080_v40, %v2077_v33  ;;  %v2100_v33 = vld [vmem:[%s7318_s6 + $0x118] sm:$0xff] }
 0x750   :  { %5037 = vmatpush1.bf16.msra.mxu0 %v5036_v39  ;;  %5069 = vmatpush3.bf16.msra.mxu1 %v5066_v43  ;;  %v1805_v43 = vld [vmem:[%s7317_s5 + $0x178] sm:$0xff]  ;;  %v1800_v39 = vld [vmem:[%s7317_s5 + $0x150] sm:$0xff] }
 0x751   :  { %5039 = vmatprep.subr.bf16.mxu0 %v5038_v44  ;;  %5071 = vmatprep.subr.bf16.mxu1 %v5070_v1  ;;  %v5090_v60 = vpack.c.bf16 %v1805_v43, %v1802_v49  ;;  %v1803_v44 = vld [vmem:[%s7317_s5 + $0x168] sm:$0xff]  ;;  %v2111_v49 = vld [vmem:[%s7318_s6 + $0x170] sm:$0xff] }
 0x752   :  { %v6804_v43 = vpack.c.bf16 %v2111_v49, %v2108_v46 }
 0x754   :  { %5041 = vmatpush1.bf16.msra.mxu0 %v5040_v22  ;;  %5073 = vmatpush3.bf16.msra.mxu1 %v5070_v1  ;;  %v5060_v1 = vpack.c.bf16 %v1803_v44, %v1800_v39  ;;  %v2078_v22 = vld [vmem:[%s7318_s6 + $0x68] sm:$0xff]  ;;  %v2073_v39 = vld [vmem:[%s7318_s6 + $0x40] sm:$0xff]  ;;  %v2076_v44 = vld [vmem:[%s7318_s6 + $0x58] sm:$0xff] }
 0x755   :  { %5043 = vmatprep.subr.bf16.mxu0 %v5042_v23  ;;  %5075 = vmatprep.subr.bf16.mxu1 %v5074_v31  ;;  %v2081_v23 = vld [vmem:[%s7318_s6 + $0x80] sm:$0xff] }
 0x758   :  { %5045 = vmatpush1.bf16.msra.mxu0 %v5044_v56  ;;  %5077 = vmatpush3.bf16.msra.mxu1 %v5074_v31  ;;  %v6704_v31 = vpack.c.bf16 %v2081_v23, %v2078_v22  ;;  %v2083_v56 = vld [vmem:[%s7318_s6 + $0x90] sm:$0xff]  ;;  %v6852_v22 = vpack.c.bf16 %v2094_v15, %v2091_v13  ;;  %v2097_v23 = vld [vmem:[%s7318_s6 + $0x100] sm:$0xff] }
 0x759   :  { %5047 = vmatprep.subr.bf16.mxu0 %v5046_v61  ;;  %5079 = vmatprep.subr.bf16.mxu1 %v5078_v63  ;;  %v2086_v61 = vld [vmem:[%s7318_s6 + $0xa8] sm:$0xff]  ;;  %v6862_v40 = vpack.c.bf16 %v2100_v33, %v2097_v23 }
 0x75c   :  { %5049 = vmatpush1.bf16.msra.mxu0 %v5048_v26  ;;  %5081 = vmatpush3.bf16.msra.mxu1 %v5078_v63  ;;  %v6730_v63 = vpack.c.bf16 %v2086_v61, %v2083_v56  ;;  %v2096_v26 = vld [vmem:[%s7318_s6 + $0xf8] sm:$0xff]  ;;  %v6872_v56 = vpack.c.bf16 %v2106_v51, %v2103_v45  ;;  %v2109_v61 = vld [vmem:[%s7318_s6 + $0x160] sm:$0xff] }
 0x75d   :  { %5051 = vmatprep.subr.bf16.mxu0 %v5050_v29  ;;  %5083 = vmatprep.subr.bf16.mxu1 %v5082_v34  ;;  %v2099_v29 = vld [vmem:[%s7318_s6 + $0x110] sm:$0xff]  ;;  %v6882_v8 = vpack.c.bf16 %v2112_v2, %v2109_v61 }
 0x760   :  { %5053 = vmatpush1.bf16.msra.mxu0 %v5052_v59  ;;  %5085 = vmatpush3.bf16.msra.mxu1 %v5082_v34  ;;  %v6758_v34 = vpack.c.bf16 %v2099_v29, %v2096_v26  ;;  %v6778_v59 = vpack.c.bf16 %v2105_v27, %v2102_v24 }
 0x761   :  { %5055 = vmatprep.subr.bf16.mxu0 %v5054_v28  ;;  %5087 = vmatprep.subr.bf16.mxu1 %v5086_v30  ;;  %v2104_v28 = vld [vmem:[%s7318_s6 + $0x138] sm:$0xff] }
 0x762   :  { %v6790_v38 = vpack.c.bf16 %v2104_v28, %v2101_v7 }
 0x764   :  { %5057 = vmatpush1.bf16.msra.mxu0 %v5056_v57  ;;  %5089 = vmatpush3.bf16.msra.mxu1 %v5086_v30  ;;  %v2067_v30 = vld [vmem:[%s7318_s6 + $0x10] sm:$0xff] }
 0x765   :  { %5059 = vmatprep.subr.bf16.mxu0 %v5058_v12  ;;  %5091 = vmatprep.subr.bf16.mxu1 %v5090_v60  ;;  %v6792_v50 = vpack.c.bf16 %v2070_v47, %v2067_v30  ;;  %v2107_v57 = vld [vmem:[%s7318_s6 + $0x150] sm:$0xff]  ;;  %v2110_v12 = vld [vmem:[%s7318_s6 + $0x168] sm:$0xff]  ;;  %v5793_v47 = vld [vmem:[%s7316_s4] ss:$0 sm:$0xff] }
 0x768   :  { %5061 = vmatpush1.bf16.msra.mxu0 %v5060_v1  ;;  %5093 = vmatpush3.bf16.msra.mxu1 %v5090_v60  ;;  %v6812_v60 = vpack.c.bf16 %v2110_v12, %v2107_v57  ;;  %v6821_v1 = vpack.c.bf16 %v2076_v44, %v2073_v39 }
 0x769   :  { %5126 = vmatprep.subr.bf16.mxu1 %v5795_v48 }
 0x76b   :  { %1888 = vmatmul.mubr.f32.vlgmr.msra.gmra.mrb[16].mxu0 %v6229_v62  ;;  %4248 = vmatmul.mubr.f32.vlgmr.msra.gmra.mrb[24].mxu1 %v6273_v54  ;;  %v2066_v62 = vld [vmem:[%s7318_s6 + $0x8] sm:$0xff] }
 0x76c   :  { %4250 = vmatprep.mubr.f32.mxu1 %v6317_v41  ;;  %1893 = vmatprep.mubr.f32.mxu0 %v5794_v3 }
 0x76d   :  { %5128 = vmatpush3.bf16.msra.mxu1 %v6792_v50 }
 0x76e   :  { %5129 = vmatprep.subr.bf16.mxu1 %v5795_v48 }
 0x76f   :  { %1894 = vmatmul.mubr.f32.gmra.mrb[18].mxu0 %v6273_v54  ;;  %4251 = vmatmul.mubr.f32.gmra.mrb[26].mxu1 %v6361_v32  ;;  %v2069_v54 = vld [vmem:[%s7318_s6 + $0x20] sm:$0xff] }
 0x770   :  { %4253 = vmatprep.mubr.f32.mxu1 %v6405_v25  ;;  %1899 = vmatprep.mubr.f32.mxu0 %v5794_v3 }
 0x771   :  { %5131 = vmatpush3.bf16.msra.mxu1 %v6821_v1 }
 0x772   :  { %5132 = vmatprep.subr.bf16.mxu1 %v5795_v48 }
 0x773   :  { %1900 = vmatmul.mubr.f32.gmra.mrb[20].mxu0 %v6317_v41  ;;  %4254 = vmatmul.mubr.f32.gmra.mrb[28].mxu1 %v6449_v17  ;;  %v6668_v41 = vpack.c.bf16 %v2069_v54, %v2066_v62  ;;  %v2079_v62 = vld [vmem:[%s7318_s6 + $0x70] sm:$0xff]  ;;  %v2082_v54 = vld [vmem:[%s7318_s6 + $0x88] sm:$0xff] }
 0x774   :  { %4256 = vmatprep.mubr.f32.mxu1 %v6521_v35  ;;  %1905 = vmatprep.mubr.f32.mxu0 %v5794_v3 }
 0x775   :  { %5095 = vmatprep.subr.bf16.mxu0 %v6668_v41 }
 0x777   :  { %1906 = vmatmul.mubr.f32.gmra.mrb[22].mxu0 %v6361_v32  ;;  %v2065_v32 = vld [vmem:[%s7318_s6] sm:$0xff] }
 0x778   :  { %1911 = vmatprep.mubr.f32.mxu0 %v5794_v3 }
 0x77b   :  { %1912 = vmatmul.mubr.f32.gmra.mrb[24].mxu0 %v6405_v25  ;;  %v2068_v25 = vld [vmem:[%s7318_s6 + $0x18] sm:$0xff] }
 0x77c   :  { %1917 = vmatprep.mubr.f32.mxu0 %v5794_v3 }
 0x77f   :  { %1918 = vmatmul.mubr.f32.gmra.mrb[26].mxu0 %v6449_v17  ;;  %v6676_v17 = vpack.c.bf16 %v2068_v25, %v2065_v32  ;;  %v2085_v32 = vld [vmem:[%s7318_s6 + $0xa0] sm:$0xff]  ;;  %v6836_v25 = vpack.c.bf16 %v2082_v54, %v2079_v62 }
 0x780   :  { %1923 = vmatprep.mubr.f32.mxu0 %v5794_v3  ;;  %v6842_v6 = vpack.c.bf16 %v2088_v4, %v2085_v32 }
 0x781   :  { %5097 = vmatpush1.bf16.msra.mxu0 %v6676_v17  ;;  %5134 = vmatpush3.bf16.msra.mxu1 %v6836_v25 }
 0x782   :  { %5099 = vmatprep.subr.bf16.mxu0 %v6686_v9  ;;  %5135 = vmatprep.subr.bf16.mxu1 %v5795_v48 }
 0x783   :  { %1924 = vmatmul.mubr.f32.gmra.mrb[28].mxu0 %v6521_v35 }
 0x784   :  { %1929 = vmatprep.mubr.f32.mxu0 %v5794_v3 }
 0x785   :  { %5101 = vmatpush1.bf16.msra.mxu0 %v6694_v16  ;;  %5137 = vmatpush3.bf16.msra.mxu1 %v6842_v6 }
 0x786   :  { %5103 = vmatprep.subr.bf16.mxu0 %v6704_v31  ;;  %5138 = vmatprep.subr.bf16.mxu1 %v5795_v48 }
 0x789   :  { %5105 = vmatpush1.bf16.msra.mxu0 %v6712_v42  ;;  %5140 = vmatpush3.bf16.msra.mxu1 %v6852_v22 }
 0x78a   :  { %5107 = vmatprep.subr.bf16.mxu0 %v6722_v53  ;;  %5141 = vmatprep.subr.bf16.mxu1 %v5795_v48 }
 0x78d   :  { %5109 = vmatpush1.bf16.msra.mxu0 %v6730_v63  ;;  %5143 = vmatpush3.bf16.msra.mxu1 %v6862_v40 }
 0x78e   :  { %5111 = vmatprep.subr.bf16.mxu0 %v6740_v10  ;;  %5144 = vmatprep.subr.bf16.mxu1 %v5795_v48 }
 0x791   :  { %5113 = vmatpush1.bf16.msra.mxu0 %v6748_v21  ;;  %5146 = vmatpush3.bf16.msra.mxu1 %v6872_v56 }
 0x792   :  { %5115 = vmatprep.subr.bf16.mxu0 %v6758_v34  ;;  %5147 = vmatprep.subr.bf16.mxu1 %v5795_v48 }
 0x795   :  { %5117 = vmatpush1.bf16.msra.mxu0 %v6766_v20  ;;  %5149 = vmatpush3.bf16.msra.mxu1 %v6882_v8 }
 0x796   :  { %5119 = vmatprep.subr.bf16.mxu0 %v6778_v59  ;;  %5182 = vmatprep.subr.bf16.mxu1 %v5795_v48 }
 0x799   :  { %5121 = vmatpush1.bf16.msra.mxu0 %v6790_v38 }
 0x79a   :  { %5123 = vmatprep.subr.bf16.mxu0 %v6804_v43 }
 0x79d   :  { %5125 = vmatpush1.bf16.msra.mxu0 %v6812_v60 }
 0x79e   :  { %5151 = vmatprep.subr.bf16.mxu0 %v6668_v41 }
 0x81e   :  { %v1652_v14 = vpop.f32.mrb[14].mxu0  ;;  %v1723_v19 = vpop.f32.mrb[22].mxu1 }
 0x81f   :  { %v5580_v26 = vadd.f32 %v1652_v14, %v6208_v58  ;;  %v1654_v29 = vpop.f32.mrb[15].mxu0  ;;  %v4214_v55 = vpop.f32.mrb[23].mxu1  ;;  %v1741_v46 = vadd.f32 %v5793_v47, %v1723_v19 }
 0x820   :  { %v5581_v24 = vadd.f32 %v1654_v29, %v6220_v11 }
 0x821   :  { %v3576_v18 = vmul.f32 -1.442695, %v5580_v26 }
 0x822   :  { %v3577_v27 = vmul.f32 -1.442695, %v5581_v24 }
 0x823   :  { %5703 = vpow2.f32 %v3576_v18 }
 0x824   :  { %5705 = vpow2.f32 %v3577_v27 }
 0x82d   :  { %v5704_v7 = vpop.eup %5703 }
 0x82e   :  { %v1731_v28 = vadd.f32 1.0, %v5704_v7  ;;  %v5706_v30 = vpop.eup %5705 }
 0x82f   :  { %v1738_v12 = vadd.f32 1.0, %v5706_v30 }
 0x830   :  { %5707 = vrcp.f32 %v1731_v28 }
 0x83a   :  { %v5708_v49 = vpop.eup %5707 }
 0x83b   :  { %v1742_v57 = vmul.f32 %v5708_v49, %v1741_v46 }
 0x83d   :  { %v1743_v58 = vadd.f32 %v1742_v57, %v6212_v0 }
 0x83e   :  { %v6893_v39 = vpop.f32.mrb[24].mxu1 }
 0x83f   :  { %5709 = vtanh.f32 %v1743_v58  ;;  %v6895_v11 = vpop.f32.mrb[25].mxu1 }
 0x840   :  { %5711 = vrcp.f32 %v1738_v12 }
 0x842   :  { %v6897_v44 = vpop.f32.mrb[26].mxu1 }
 0x843   :  { %v6899_v62 = vpop.f32.mrb[27].mxu1 }
 0x846   :  { %v6901_v54 = vpop.f32.mrb[28].mxu1 }
 0x847   :  { %v6903_v32 = vpop.f32.mrb[29].mxu1 }
 0x849   :  { %v5710_v4 = vpop.eup %5709 }
 0x84a   :  { %v1745_v13 = vsub.f32 %v6521_v35, %v5710_v4  ;;  %v5712_v15 = vpop.eup %5711  ;;  %v1806_v35 = vld [vmem:[%s7319_s7] sm:$0x7] }
 0x84b   :  { %v6955_v51 = vrot.slane %v1806_v35, %v56_v52  ;;  %v6960_v55 = vrot.slane %v1806_v35, %v60_v5  ;;  %v6966_v52 = vld [vmem:[%s7320_s8] ss:$0 sm:$0xff]  ;;  %v6970_v28 = vrot.slane %v1806_v35, %v64_v37 }
 0x84c   :  { %v1746_v0 = vmul.f32 %v5712_v15, %v1745_v13 }
 0x84d   :  { %v2003_v46 = vadd.f32 %v6895_v11, %v6970_v28 }
 0x84e   :  { %v1747_v23 = vadd.f32 %v5710_v4, %v1746_v0 }
 0x850   :  { %1930 = vmatmul.mubr.f32.gmra.mrb[30].mxu0 %v1747_v23  ;;  %4257 = vmatmul.mubr.f32.gmra.mrb[30].mxu1 %v1747_v23 }
 0x851   :  { %2187 = vmatprep.mubr.f32.mxu0 %v5794_v3  ;;  %4291 = vmatprep.mubr.msk.f32.mxu1 %vm5796_vm1, %v5794_v3 }
 0x854   :  { %2188 = vmatmul.mubr.f32.vlgmr.msra.gmra.mrb[16].mxu0 %v5794_v3  ;;  %4292 = vmatmul.mubr.f32.vlgmr.msra.gmra.mrb[32].mxu1 %v5794_v3 }
 0x855   :  { %5153 = vmatpush1.bf16.msra.mxu0 %v6676_v17  ;;  %5184 = vmatpush3.bf16.msra.mxu1 %v6792_v50 }
 0x856   :  { %5155 = vmatprep.subr.bf16.mxu0 %v6686_v9  ;;  %5185 = vmatprep.subr.bf16.mxu1 %v5795_v48 }
 0x857   :  { %2352 = vmatprep.mubr.f32.mxu0 %v5794_v3  ;;  %4326 = vmatprep.mubr.msk.f32.mxu1 %vm5796_vm1, %v5794_v3 }
 0x859   :  { %5157 = vmatpush1.bf16.msra.mxu0 %v6694_v16  ;;  %5187 = vmatpush3.bf16.msra.mxu1 %v6821_v1 }
 0x85a   :  { %5159 = vmatprep.subr.bf16.mxu0 %v6704_v31  ;;  %5188 = vmatprep.subr.bf16.mxu1 %v5795_v48 }
 0x85d   :  { %5161 = vmatpush1.bf16.msra.mxu0 %v6712_v42  ;;  %5190 = vmatpush3.bf16.msra.mxu1 %v6836_v25 }
 0x85e   :  { %5163 = vmatprep.subr.bf16.mxu0 %v6722_v53  ;;  %5191 = vmatprep.subr.bf16.mxu1 %v5795_v48 }
 0x861   :  { %5165 = vmatpush1.bf16.msra.mxu0 %v6730_v63  ;;  %5193 = vmatpush3.bf16.msra.mxu1 %v6842_v6 }
 0x862   :  { %5167 = vmatprep.subr.bf16.mxu0 %v6740_v10  ;;  %5194 = vmatprep.subr.bf16.mxu1 %v5795_v48 }
 0x865   :  { %5169 = vmatpush1.bf16.msra.mxu0 %v6748_v21  ;;  %5196 = vmatpush3.bf16.msra.mxu1 %v6852_v22 }
 0x866   :  { %5171 = vmatprep.subr.bf16.mxu0 %v6758_v34  ;;  %5197 = vmatprep.subr.bf16.mxu1 %v5795_v48 }
 0x869   :  { %5173 = vmatpush1.bf16.msra.mxu0 %v6766_v20  ;;  %5199 = vmatpush3.bf16.msra.mxu1 %v6862_v40 }
 0x86a   :  { %5175 = vmatprep.subr.bf16.mxu0 %v6778_v59  ;;  %5200 = vmatprep.subr.bf16.mxu1 %v5795_v48 }
 0x86d   :  { %5177 = vmatpush1.bf16.msra.mxu0 %v6790_v38  ;;  %5202 = vmatpush3.bf16.msra.mxu1 %v6872_v56 }
 0x86e   :  { %5179 = vmatprep.subr.bf16.mxu0 %v6804_v43  ;;  %5203 = vmatprep.subr.bf16.mxu1 %v5795_v48 }
 0x871   :  { %5181 = vmatpush1.bf16.msra.mxu0 %v6812_v60  ;;  %5205 = vmatpush3.bf16.msra.mxu1 %v6882_v8 }
 0x872   :  { %5207 = vmatprep.subr.bf16.mxu0 %v6668_v41  ;;  %5238 = vmatprep.subr.bf16.mxu1 %v5795_v48 }
 0x923   :  { %v6949_v33 = vpop.f32.mrb[30].mxu1 }
 0x924   :  { %v6951_v45 = vpop.f32.mrb[31].mxu1 }
 0x927   :  { %v2189_v61 = vpop.f32.mrb[16].mxu0  ;;  %v2260_v2 = vpop.f32.mrb[32].mxu1 }
 0x928   :  { %v5582_v14 = vadd.f32 %v2189_v61, %v6955_v51  ;;  %v2191_v19 = vpop.f32.mrb[17].mxu0  ;;  %v4293_v26 = vpop.f32.mrb[33].mxu1  ;;  %v2278_v30 = vadd.f32 %v6966_v52, %v2260_v2 }
 0x929   :  { %v5583_v18 = vadd.f32 %v2191_v19, %v6960_v55 }
 0x92a   :  { %v3579_v29 = vmul.f32 -1.442695, %v5582_v14 }
 0x92b   :  { %v3580_v24 = vmul.f32 -1.442695, %v5583_v18 }
 0x92c   :  { %5713 = vpow2.f32 %v3579_v29 }
 0x92d   :  { %5715 = vpow2.f32 %v3580_v24 }
 0x936   :  { %v5714_v27 = vpop.eup %5713 }
 0x937   :  { %v2268_v7 = vadd.f32 1.0, %v5714_v27  ;;  %v5716_v5 = vpop.eup %5715  ;;  %v2008_v27 = vadd.f32 %v6893_v39, %v6970_v28 }
 0x938   :  { %v2275_v57 = vadd.f32 1.0, %v5716_v5 }
 0x939   :  { %5717 = vrcp.f32 %v2268_v7 }
 0x943   :  { %v5718_v47 = vpop.eup %5717 }
 0x944   :  { %v2279_v49 = vmul.f32 %v5718_v47, %v2278_v30 }
 0x946   :  { %v2280_v58 = vadd.f32 %v2279_v49, %v2003_v46 }
 0x948   :  { %5719 = vtanh.f32 %v2280_v58 }
 0x949   :  { %5721 = vrcp.f32 %v2275_v57 }
 0x952   :  { %v5720_v12 = vpop.eup %5719 }
 0x953   :  { %v2282_v4 = vsub.f32 0.0, %v5720_v12  ;;  %v5722_v13 = vpop.eup %5721 }
 0x955   :  { %v2283_v15 = vmul.f32 %v5722_v13, %v2282_v4 }
 0x957   :  { %v6975_v0 = vadd.f32 %v5720_v12, %v2283_v15 }
 0x959   :  { %2353 = vmatmul.mubr.f32.vlgmr.msra.gmra.mrb[18].mxu0 %v6975_v0  ;;  %4327 = vmatmul.mubr.f32.vlgmr.msra.gmra.mrb[34].mxu1 %v6975_v0 }
 0x95a   :  { %5209 = vmatpush1.bf16.msra.mxu0 %v6676_v17  ;;  %5240 = vmatpush3.bf16.msra.mxu1 %v6792_v50 }
 0x95b   :  { %5211 = vmatprep.subr.bf16.mxu0 %v6686_v9  ;;  %5241 = vmatprep.subr.bf16.mxu1 %v5795_v48 }
 0x95c   :  { %2517 = vmatprep.mubr.f32.mxu0 %v5794_v3  ;;  %4361 = vmatprep.mubr.msk.f32.mxu1 %vm5796_vm1, %v5794_v3 }
 0x95e   :  { %5213 = vmatpush1.bf16.msra.mxu0 %v6694_v16  ;;  %5243 = vmatpush3.bf16.msra.mxu1 %v6821_v1 }
 0x95f   :  { %5215 = vmatprep.subr.bf16.mxu0 %v6704_v31  ;;  %5244 = vmatprep.subr.bf16.mxu1 %v5795_v48 }
 0x962   :  { %5217 = vmatpush1.bf16.msra.mxu0 %v6712_v42  ;;  %5246 = vmatpush3.bf16.msra.mxu1 %v6836_v25 }
 0x963   :  { %5219 = vmatprep.subr.bf16.mxu0 %v6722_v53  ;;  %5247 = vmatprep.subr.bf16.mxu1 %v5795_v48 }
 0x966   :  { %5221 = vmatpush1.bf16.msra.mxu0 %v6730_v63  ;;  %5249 = vmatpush3.bf16.msra.mxu1 %v6842_v6 }
 0x967   :  { %5223 = vmatprep.subr.bf16.mxu0 %v6740_v10  ;;  %5250 = vmatprep.subr.bf16.mxu1 %v5795_v48 }
 0x96a   :  { %5225 = vmatpush1.bf16.msra.mxu0 %v6748_v21  ;;  %5252 = vmatpush3.bf16.msra.mxu1 %v6852_v22 }
 0x96b   :  { %5227 = vmatprep.subr.bf16.mxu0 %v6758_v34  ;;  %5253 = vmatprep.subr.bf16.mxu1 %v5795_v48 }
 0x96e   :  { %5229 = vmatpush1.bf16.msra.mxu0 %v6766_v20  ;;  %5255 = vmatpush3.bf16.msra.mxu1 %v6862_v40 }
 0x96f   :  { %5231 = vmatprep.subr.bf16.mxu0 %v6778_v59  ;;  %5256 = vmatprep.subr.bf16.mxu1 %v5795_v48 }
 0x972   :  { %5233 = vmatpush1.bf16.msra.mxu0 %v6790_v38  ;;  %5258 = vmatpush3.bf16.msra.mxu1 %v6872_v56 }
 0x973   :  { %5235 = vmatprep.subr.bf16.mxu0 %v6804_v43  ;;  %5259 = vmatprep.subr.bf16.mxu1 %v5795_v48 }
 0x976   :  { %5237 = vmatpush1.bf16.msra.mxu0 %v6812_v60  ;;  %5261 = vmatpush3.bf16.msra.mxu1 %v6882_v8 }
 0x977   :  { %5263 = vmatprep.subr.bf16.mxu0 %v6668_v41  ;;  %5294 = vmatprep.subr.bf16.mxu1 %v5795_v48 }
 0xa2c   :  { %v2354_v36 = vpop.f32.mrb[18].mxu0  ;;  %v2425_v37 = vpop.f32.mrb[34].mxu1 }
 0xa2d   :  { %v5584_v11 = vadd.f32 %v2354_v36, %v6955_v51  ;;  %v2356_v23 = vpop.f32.mrb[19].mxu0  ;;  %v4328_v35 = vpop.f32.mrb[35].mxu1  ;;  %v2443_v18 = vadd.f32 %v6966_v52, %v2425_v37 }
 0xa2e   :  { %v5585_v2 = vadd.f32 %v2356_v23, %v6960_v55 }
 0xa2f   :  { %v3581_v61 = vmul.f32 -1.442695, %v5584_v11 }
 0xa30   :  { %v3582_v14 = vmul.f32 -1.442695, %v5585_v2 }
 0xa31   :  { %5723 = vpow2.f32 %v3581_v61 }
 0xa32   :  { %5725 = vpow2.f32 %v3582_v14  ;;  %v2013_v14 = vadd.f32 %v6899_v62, %v6970_v28 }
 0xa3b   :  { %v5724_v19 = vpop.eup %5723 }
 0xa3c   :  { %v2433_v26 = vadd.f32 1.0, %v5724_v19  ;;  %v5726_v29 = vpop.eup %5725 }
 0xa3d   :  { %v2440_v5 = vadd.f32 1.0, %v5726_v29 }
 0xa3e   :  { %5727 = vrcp.f32 %v2433_v26 }
 0xa48   :  { %v5728_v24 = vpop.eup %5727 }
 0xa49   :  { %v2444_v7 = vmul.f32 %v5728_v24, %v2443_v18 }
 0xa4b   :  { %v2445_v30 = vadd.f32 %v2444_v7, %v2008_v27 }
 0xa4d   :  { %5729 = vtanh.f32 %v2445_v30 }
 0xa4e   :  { %5731 = vrcp.f32 %v2440_v5 }
 0xa57   :  { %v5730_v47 = vpop.eup %5729 }
 0xa58   :  { %v2447_v46 = vsub.f32 %v6975_v0, %v5730_v47  ;;  %v5732_v49 = vpop.eup %5731 }
 0xa5a   :  { %v2448_v57 = vmul.f32 %v5732_v49, %v2447_v46 }
 0xa5c   :  { %v7020_v58 = vadd.f32 %v5730_v47, %v2448_v57 }
 0xa5e   :  { %2518 = vmatmul.mubr.f32.vlgmr.msra.gmra.mrb[20].mxu0 %v7020_v58  ;;  %4362 = vmatmul.mubr.f32.vlgmr.msra.gmra.mrb[36].mxu1 %v7020_v58 }
 0xa5f   :  { %5265 = vmatpush1.bf16.msra.mxu0 %v6676_v17  ;;  %5296 = vmatpush3.bf16.msra.mxu1 %v6792_v50 }
 0xa60   :  { %5267 = vmatprep.subr.bf16.mxu0 %v6686_v9  ;;  %5297 = vmatprep.subr.bf16.mxu1 %v5795_v48 }
 0xa61   :  { %2682 = vmatprep.mubr.f32.mxu0 %v5794_v3  ;;  %4396 = vmatprep.mubr.msk.f32.mxu1 %vm5796_vm1, %v5794_v3 }
 0xa63   :  { %5269 = vmatpush1.bf16.msra.mxu0 %v6694_v16  ;;  %5299 = vmatpush3.bf16.msra.mxu1 %v6821_v1 }
 0xa64   :  { %5271 = vmatprep.subr.bf16.mxu0 %v6704_v31  ;;  %5300 = vmatprep.subr.bf16.mxu1 %v5795_v48 }
 0xa67   :  { %5273 = vmatpush1.bf16.msra.mxu0 %v6712_v42  ;;  %5302 = vmatpush3.bf16.msra.mxu1 %v6836_v25 }
 0xa68   :  { %5275 = vmatprep.subr.bf16.mxu0 %v6722_v53  ;;  %5303 = vmatprep.subr.bf16.mxu1 %v5795_v48 }
 0xa6b   :  { %5277 = vmatpush1.bf16.msra.mxu0 %v6730_v63  ;;  %5305 = vmatpush3.bf16.msra.mxu1 %v6842_v6 }
 0xa6c   :  { %5279 = vmatprep.subr.bf16.mxu0 %v6740_v10  ;;  %5306 = vmatprep.subr.bf16.mxu1 %v5795_v48 }
 0xa6f   :  { %5281 = vmatpush1.bf16.msra.mxu0 %v6748_v21  ;;  %5308 = vmatpush3.bf16.msra.mxu1 %v6852_v22 }
 0xa70   :  { %5283 = vmatprep.subr.bf16.mxu0 %v6758_v34  ;;  %5309 = vmatprep.subr.bf16.mxu1 %v5795_v48 }
 0xa73   :  { %5285 = vmatpush1.bf16.msra.mxu0 %v6766_v20  ;;  %5311 = vmatpush3.bf16.msra.mxu1 %v6862_v40 }
 0xa74   :  { %5287 = vmatprep.subr.bf16.mxu0 %v6778_v59  ;;  %5312 = vmatprep.subr.bf16.mxu1 %v5795_v48 }
 0xa77   :  { %5289 = vmatpush1.bf16.msra.mxu0 %v6790_v38  ;;  %5314 = vmatpush3.bf16.msra.mxu1 %v6872_v56 }
 0xa78   :  { %5291 = vmatprep.subr.bf16.mxu0 %v6804_v43  ;;  %5315 = vmatprep.subr.bf16.mxu1 %v5795_v48 }
 0xa7b   :  { %5293 = vmatpush1.bf16.msra.mxu0 %v6812_v60  ;;  %5317 = vmatpush3.bf16.msra.mxu1 %v6882_v8 }
 0xa7c   :  { %5319 = vmatprep.subr.bf16.mxu0 %v6668_v41  ;;  %5350 = vmatprep.subr.bf16.mxu1 %v5795_v48 }
 0xb31   :  { %v2519_v39 = vpop.f32.mrb[20].mxu0  ;;  %v2590_v12 = vpop.f32.mrb[36].mxu1 }
 0xb32   :  { %v5586_v4 = vadd.f32 %v2519_v39, %v6955_v51  ;;  %v2521_v13 = vpop.f32.mrb[21].mxu0  ;;  %v4363_v15 = vpop.f32.mrb[37].mxu1  ;;  %v2608_v61 = vadd.f32 %v6966_v52, %v2590_v12 }
 0xb33   :  { %v5587_v36 = vadd.f32 %v2521_v13, %v6960_v55 }
 0xb34   :  { %v3583_v0 = vmul.f32 -1.442695, %v5586_v4 }
 0xb35   :  { %v3584_v37 = vmul.f32 -1.442695, %v5587_v36  ;;  %v2018_v36 = vadd.f32 %v6897_v44, %v6970_v28 }
 0xb36   :  { %5733 = vpow2.f32 %v3583_v0 }
 0xb37   :  { %5735 = vpow2.f32 %v3584_v37 }
 0xb40   :  { %v5734_v11 = vpop.eup %5733 }
 0xb41   :  { %v2598_v23 = vadd.f32 1.0, %v5734_v11  ;;  %v5736_v35 = vpop.eup %5735 }
 0xb42   :  { %v2605_v29 = vadd.f32 1.0, %v5736_v35 }
 0xb43   :  { %5737 = vrcp.f32 %v2598_v23 }
 0xb4d   :  { %v5738_v2 = vpop.eup %5737 }
 0xb4e   :  { %v2609_v19 = vmul.f32 %v5738_v2, %v2608_v61 }
 0xb50   :  { %v2610_v26 = vadd.f32 %v2609_v19, %v2013_v14 }
 0xb52   :  { %5739 = vtanh.f32 %v2610_v26 }
 0xb53   :  { %5741 = vrcp.f32 %v2605_v29 }
 0xb5c   :  { %v5740_v18 = vpop.eup %5739 }
 0xb5d   :  { %v2612_v24 = vsub.f32 %v7020_v58, %v5740_v18  ;;  %v5742_v27 = vpop.eup %5741 }
 0xb5f   :  { %v2613_v7 = vmul.f32 %v5742_v27, %v2612_v24 }
 0xb61   :  { %v7065_v30 = vadd.f32 %v5740_v18, %v2613_v7 }
 0xb63   :  { %2683 = vmatmul.mubr.f32.vlgmr.msra.gmra.mrb[22].mxu0 %v7065_v30  ;;  %4397 = vmatmul.mubr.f32.vlgmr.msra.gmra.mrb[38].mxu1 %v7065_v30 }
 0xb64   :  { %5321 = vmatpush1.bf16.msra.mxu0 %v6676_v17  ;;  %5352 = vmatpush3.bf16.msra.mxu1 %v6792_v50 }
 0xb65   :  { %5323 = vmatprep.subr.bf16.mxu0 %v6686_v9  ;;  %5353 = vmatprep.subr.bf16.mxu1 %v5795_v48 }
 0xb66   :  { %2847 = vmatprep.mubr.f32.mxu0 %v5794_v3  ;;  %4431 = vmatprep.mubr.msk.f32.mxu1 %vm5796_vm1, %v5794_v3 }
 0xb68   :  { %5325 = vmatpush1.bf16.msra.mxu0 %v6694_v16  ;;  %5355 = vmatpush3.bf16.msra.mxu1 %v6821_v1 }
 0xb69   :  { %5327 = vmatprep.subr.bf16.mxu0 %v6704_v31  ;;  %5356 = vmatprep.subr.bf16.mxu1 %v5795_v48 }
 0xb6c   :  { %5329 = vmatpush1.bf16.msra.mxu0 %v6712_v42  ;;  %5358 = vmatpush3.bf16.msra.mxu1 %v6836_v25 }
 0xb6d   :  { %5331 = vmatprep.subr.bf16.mxu0 %v6722_v53  ;;  %5359 = vmatprep.subr.bf16.mxu1 %v5795_v48 }
 0xb70   :  { %5333 = vmatpush1.bf16.msra.mxu0 %v6730_v63  ;;  %5361 = vmatpush3.bf16.msra.mxu1 %v6842_v6 }
 0xb71   :  { %5335 = vmatprep.subr.bf16.mxu0 %v6740_v10  ;;  %5362 = vmatprep.subr.bf16.mxu1 %v5795_v48 }
 0xb74   :  { %5337 = vmatpush1.bf16.msra.mxu0 %v6748_v21  ;;  %5364 = vmatpush3.bf16.msra.mxu1 %v6852_v22 }
 0xb75   :  { %5339 = vmatprep.subr.bf16.mxu0 %v6758_v34  ;;  %5365 = vmatprep.subr.bf16.mxu1 %v5795_v48 }
 0xb78   :  { %5341 = vmatpush1.bf16.msra.mxu0 %v6766_v20  ;;  %5367 = vmatpush3.bf16.msra.mxu1 %v6862_v40 }
 0xb79   :  { %5343 = vmatprep.subr.bf16.mxu0 %v6778_v59  ;;  %5368 = vmatprep.subr.bf16.mxu1 %v5795_v48 }
 0xb7c   :  { %5345 = vmatpush1.bf16.msra.mxu0 %v6790_v38  ;;  %5370 = vmatpush3.bf16.msra.mxu1 %v6872_v56 }
 0xb7d   :  { %5347 = vmatprep.subr.bf16.mxu0 %v6804_v43  ;;  %5371 = vmatprep.subr.bf16.mxu1 %v5795_v48 }
 0xb80   :  { %5349 = vmatpush1.bf16.msra.mxu0 %v6812_v60  ;;  %5373 = vmatpush3.bf16.msra.mxu1 %v6882_v8 }
 0xb81   :  { %5375 = vmatprep.subr.bf16.mxu0 %v6668_v41  ;;  %5406 = vmatprep.subr.bf16.mxu1 %v5795_v48 }
 0xc36   :  { %v2684_v62 = vpop.f32.mrb[22].mxu0  ;;  %v2755_v5 = vpop.f32.mrb[38].mxu1 }
 0xc37   :  { %v5588_v47 = vadd.f32 %v2684_v62, %v6955_v51  ;;  %v2686_v46 = vpop.f32.mrb[23].mxu0  ;;  %v4398_v49 = vpop.f32.mrb[39].mxu1  ;;  %v2773_v15 = vadd.f32 %v6966_v52, %v2755_v5 }
 0xc38   :  { %v5589_v58 = vadd.f32 %v2686_v46, %v6960_v55 }
 0xc39   :  { %v3585_v57 = vmul.f32 -1.442695, %v5588_v47 }
 0xc3a   :  { %v3586_v39 = vmul.f32 -1.442695, %v5589_v58 }
 0xc3b   :  { %5743 = vpow2.f32 %v3585_v57  ;;  %v2023_v57 = vadd.f32 %v6903_v32, %v6970_v28 }
 0xc3c   :  { %5745 = vpow2.f32 %v3586_v39 }
 0xc45   :  { %v5744_v12 = vpop.eup %5743 }
 0xc46   :  { %v2763_v4 = vadd.f32 1.0, %v5744_v12  ;;  %v5746_v13 = vpop.eup %5745 }
 0xc47   :  { %v2770_v23 = vadd.f32 1.0, %v5746_v13 }
 0xc48   :  { %5747 = vrcp.f32 %v2763_v4 }
 0xc52   :  { %v5748_v0 = vpop.eup %5747 }
 0xc53   :  { %v2774_v37 = vmul.f32 %v5748_v0, %v2773_v15 }
 0xc55   :  { %v2775_v11 = vadd.f32 %v2774_v37, %v2018_v36 }
 0xc57   :  { %5749 = vtanh.f32 %v2775_v11 }
 0xc58   :  { %5751 = vrcp.f32 %v2770_v23 }
 0xc61   :  { %v5750_v35 = vpop.eup %5749 }
 0xc62   :  { %v2777_v61 = vsub.f32 %v7065_v30, %v5750_v35  ;;  %v5752_v2 = vpop.eup %5751 }
 0xc64   :  { %v2778_v14 = vmul.f32 %v5752_v2, %v2777_v61 }
 0xc66   :  { %v7110_v19 = vadd.f32 %v5750_v35, %v2778_v14 }
 0xc68   :  { %2848 = vmatmul.mubr.f32.vlgmr.msra.gmra.mrb[24].mxu0 %v7110_v19  ;;  %4432 = vmatmul.mubr.f32.vlgmr.msra.gmra.mrb[40].mxu1 %v7110_v19 }
 0xc69   :  { %5377 = vmatpush1.bf16.msra.mxu0 %v6676_v17  ;;  %5408 = vmatpush3.bf16.msra.mxu1 %v6792_v50 }
 0xc6a   :  { %5379 = vmatprep.subr.bf16.mxu0 %v6686_v9  ;;  %5409 = vmatprep.subr.bf16.mxu1 %v5795_v48 }
 0xc6b   :  { %3012 = vmatprep.mubr.f32.mxu0 %v5794_v3  ;;  %4466 = vmatprep.mubr.msk.f32.mxu1 %vm5796_vm1, %v5794_v3 }
 0xc6d   :  { %5381 = vmatpush1.bf16.msra.mxu0 %v6694_v16  ;;  %5411 = vmatpush3.bf16.msra.mxu1 %v6821_v1 }
 0xc6e   :  { %5383 = vmatprep.subr.bf16.mxu0 %v6704_v31  ;;  %5412 = vmatprep.subr.bf16.mxu1 %v5795_v48 }
 0xc71   :  { %5385 = vmatpush1.bf16.msra.mxu0 %v6712_v42  ;;  %5414 = vmatpush3.bf16.msra.mxu1 %v6836_v25 }
 0xc72   :  { %5387 = vmatprep.subr.bf16.mxu0 %v6722_v53  ;;  %5415 = vmatprep.subr.bf16.mxu1 %v5795_v48 }
 0xc75   :  { %5389 = vmatpush1.bf16.msra.mxu0 %v6730_v63  ;;  %5417 = vmatpush3.bf16.msra.mxu1 %v6842_v6 }
 0xc76   :  { %5391 = vmatprep.subr.bf16.mxu0 %v6740_v10  ;;  %5418 = vmatprep.subr.bf16.mxu1 %v5795_v48 }
 0xc79   :  { %5393 = vmatpush1.bf16.msra.mxu0 %v6748_v21  ;;  %5420 = vmatpush3.bf16.msra.mxu1 %v6852_v22 }
 0xc7a   :  { %5395 = vmatprep.subr.bf16.mxu0 %v6758_v34  ;;  %5421 = vmatprep.subr.bf16.mxu1 %v5795_v48 }
 0xc7d   :  { %5397 = vmatpush1.bf16.msra.mxu0 %v6766_v20  ;;  %5423 = vmatpush3.bf16.msra.mxu1 %v6862_v40 }
 0xc7e   :  { %5399 = vmatprep.subr.bf16.mxu0 %v6778_v59  ;;  %5424 = vmatprep.subr.bf16.mxu1 %v5795_v48 }
 0xc81   :  { %5401 = vmatpush1.bf16.msra.mxu0 %v6790_v38  ;;  %5426 = vmatpush3.bf16.msra.mxu1 %v6872_v56 }
 0xc82   :  { %5403 = vmatprep.subr.bf16.mxu0 %v6804_v43  ;;  %5427 = vmatprep.subr.bf16.mxu1 %v5795_v48 }
 0xc85   :  { %5405 = vmatpush1.bf16.msra.mxu0 %v6812_v60  ;;  %5429 = vmatpush3.bf16.msra.mxu1 %v6882_v8 }
 0xc86   :  { %5431 = vmatprep.subr.bf16.mxu0 %v6668_v41  ;;  %5462 = vmatprep.subr.bf16.mxu1 %v5795_v48 }
 0xd3b   :  { %v2849_v44 = vpop.f32.mrb[24].mxu0  ;;  %v2920_v26 = vpop.f32.mrb[40].mxu1 }
 0xd3c   :  { %v5590_v29 = vadd.f32 %v2849_v44, %v6955_v51  ;;  %v2851_v18 = vpop.f32.mrb[25].mxu0  ;;  %v4433_v24 = vpop.f32.mrb[41].mxu1  ;;  %v2938_v46 = vadd.f32 %v6966_v52, %v2920_v26 }
 0xd3d   :  { %v5591_v7 = vadd.f32 %v2851_v18, %v6960_v55  ;;  %v2028_v18 = vadd.f32 %v6901_v54, %v6970_v28  ;;  %v3441_v54 = vld [vmem:[%s7321_s9 + $0x8] sm:$0xff] }
 0xd3e   :  { %v3587_v27 = vmul.f32 -1.442695, %v5590_v29 }
 0xd3f   :  { %v3588_v30 = vmul.f32 -1.442695, %v5591_v7 }
 0xd40   :  { %5753 = vpow2.f32 %v3587_v27 }
 0xd41   :  { %5755 = vpow2.f32 %v3588_v30 }
 0xd4a   :  { %v5754_v62 = vpop.eup %5753 }
 0xd4b   :  { %v2928_v5 = vadd.f32 1.0, %v5754_v62  ;;  %v5756_v47 = vpop.eup %5755 }
 0xd4c   :  { %v2935_v12 = vadd.f32 1.0, %v5756_v47 }
 0xd4d   :  { %5757 = vrcp.f32 %v2928_v5 }
 0xd57   :  { %v5758_v49 = vpop.eup %5757 }
 0xd58   :  { %v2939_v58 = vmul.f32 %v5758_v49, %v2938_v46  ;;  %v3442_v49 = vld [vmem:[%s7321_s9 + $0x10] sm:$0xff] }
 0xd5a   :  { %v2940_v39 = vadd.f32 %v2939_v58, %v2023_v57  ;;  %v3444_v58 = vld [vmem:[%s7321_s9 + $0x20] sm:$0xff] }
 0xd5c   :  { %5759 = vtanh.f32 %v2940_v39  ;;  %v3445_v39 = vld [vmem:[%s7321_s9 + $0x28] sm:$0xff] }
 0xd5d   :  { %5761 = vrcp.f32 %v2935_v12  ;;  %v5549_v12 = vpack.c.bf16 %v3445_v39, %v3444_v58 }
 0xd66   :  { %v5760_v4 = vpop.eup %5759 }
 0xd67   :  { %v2942_v13 = vsub.f32 %v7110_v19, %v5760_v4  ;;  %v5762_v15 = vpop.eup %5761 }
 0xd69   :  { %v2943_v0 = vmul.f32 %v5762_v15, %v2942_v13  ;;  %v3447_v13 = vld [vmem:[%s7321_s9 + $0x38] sm:$0xff] }
 0xd6b   :  { %v7155_v36 = vadd.f32 %v5760_v4, %v2943_v0  ;;  %v3446_v4 = vld [vmem:[%s7321_s9 + $0x30] sm:$0xff]  ;;  %v3448_v0 = vld [vmem:[%s7321_s9 + $0x40] sm:$0xff] }
 0xd6c   :  { %v5552_v15 = vpack.c.bf16 %v3447_v13, %v3446_v4 }
 0xd6d   :  { %3013 = vmatmul.mubr.f32.vlgmr.msra.gmra.mrb[26].mxu0 %v7155_v36  ;;  %4467 = vmatmul.mubr.f32.vlgmr.msra.gmra.mrb[42].mxu1 %v7155_v36 }
 0xd6e   :  { %5433 = vmatpush1.bf16.msra.mxu0 %v6676_v17  ;;  %5464 = vmatpush3.bf16.msra.mxu1 %v6792_v50 }
 0xd6f   :  { %5435 = vmatprep.subr.bf16.mxu0 %v6686_v9  ;;  %5465 = vmatprep.subr.bf16.mxu1 %v5795_v48 }
 0xd70   :  { %3177 = vmatprep.mubr.f32.mxu0 %v5794_v3  ;;  %4501 = vmatprep.mubr.msk.f32.mxu1 %vm5796_vm1, %v5794_v3 }
 0xd72   :  { %5437 = vmatpush1.bf16.msra.mxu0 %v6694_v16  ;;  %5467 = vmatpush3.bf16.msra.mxu1 %v6821_v1 }
 0xd73   :  { %5439 = vmatprep.subr.bf16.mxu0 %v6704_v31  ;;  %5468 = vmatprep.subr.bf16.mxu1 %v5795_v48 }
 0xd76   :  { %5441 = vmatpush1.bf16.msra.mxu0 %v6712_v42  ;;  %5470 = vmatpush3.bf16.msra.mxu1 %v6836_v25 }
 0xd77   :  { %5443 = vmatprep.subr.bf16.mxu0 %v6722_v53  ;;  %5471 = vmatprep.subr.bf16.mxu1 %v5795_v48 }
 0xd7a   :  { %5445 = vmatpush1.bf16.msra.mxu0 %v6730_v63  ;;  %5473 = vmatpush3.bf16.msra.mxu1 %v6842_v6 }
 0xd7b   :  { %5447 = vmatprep.subr.bf16.mxu0 %v6740_v10  ;;  %5474 = vmatprep.subr.bf16.mxu1 %v5795_v48 }
 0xd7e   :  { %5449 = vmatpush1.bf16.msra.mxu0 %v6748_v21  ;;  %5476 = vmatpush3.bf16.msra.mxu1 %v6852_v22 }
 0xd7f   :  { %5451 = vmatprep.subr.bf16.mxu0 %v6758_v34  ;;  %5477 = vmatprep.subr.bf16.mxu1 %v5795_v48 }
 0xd82   :  { %5453 = vmatpush1.bf16.msra.mxu0 %v6766_v20  ;;  %5479 = vmatpush3.bf16.msra.mxu1 %v6862_v40 }
 0xd83   :  { %5455 = vmatprep.subr.bf16.mxu0 %v6778_v59  ;;  %5480 = vmatprep.subr.bf16.mxu1 %v5795_v48 }
 0xd86   :  { %5457 = vmatpush1.bf16.msra.mxu0 %v6790_v38  ;;  %5482 = vmatpush3.bf16.msra.mxu1 %v6872_v56 }
 0xd87   :  { %5459 = vmatprep.subr.bf16.mxu0 %v6804_v43  ;;  %5483 = vmatprep.subr.bf16.mxu1 %v5795_v48 }
 0xd8a   :  { %5461 = vmatpush1.bf16.msra.mxu0 %v6812_v60  ;;  %5485 = vmatpush3.bf16.msra.mxu1 %v6882_v8 }
 0xd8b   :  { %5487 = vmatprep.subr.bf16.mxu0 %v6668_v41  ;;  %5518 = vmatprep.subr.bf16.mxu1 %v5795_v48 }
 0xe40   :  { %v3014_v32 = vpop.f32.mrb[26].mxu0  ;;  %v3085_v37 = vpop.f32.mrb[42].mxu1 }
 0xe41   :  { %v5592_v11 = vadd.f32 %v3014_v32, %v6955_v51  ;;  %v3016_v23 = vpop.f32.mrb[27].mxu0  ;;  %v4468_v35 = vpop.f32.mrb[43].mxu1  ;;  %v3103_v41 = vadd.f32 %v6966_v52, %v3085_v37  ;;  %v3450_v32 = vld [vmem:[%s7321_s9 + $0x50] sm:$0xff] }
 0xe42   :  { %v5593_v2 = vadd.f32 %v3016_v23, %v6960_v55  ;;  %v3452_v35 = vld [vmem:[%s7321_s9 + $0x60] sm:$0xff] }
 0xe43   :  { %v3589_v61 = vmul.f32 -1.442695, %v5592_v11  ;;  %v3451_v11 = vld [vmem:[%s7321_s9 + $0x58] sm:$0xff] }
 0xe44   :  { %v3590_v14 = vmul.f32 -1.442695, %v5593_v2  ;;  %v5558_v23 = vpack.c.bf16 %v3451_v11, %v3450_v32 }
 0xe45   :  { %5763 = vpow2.f32 %v3589_v61  ;;  %v3453_v61 = vld [vmem:[%s7321_s9 + $0x68] sm:$0xff] }
 0xe46   :  { %5765 = vpow2.f32 %v3590_v14  ;;  %v5561_v2 = vpack.c.bf16 %v3453_v61, %v3452_v35  ;;  %v3454_v14 = vld [vmem:[%s7321_s9 + $0x70] sm:$0xff] }
 0xe4f   :  { %v5764_v19 = vpop.eup %5763 }
 0xe50   :  { %v3093_v44 = vadd.f32 1.0, %v5764_v19  ;;  %v5766_v26 = vpop.eup %5765  ;;  %v3455_v19 = vld [vmem:[%s7321_s9 + $0x78] sm:$0xff] }
 0xe51   :  { %v3100_v7 = vadd.f32 1.0, %v5766_v26 }
 0xe52   :  { %5767 = vrcp.f32 %v3093_v44  ;;  %v5564_v44 = vpack.c.bf16 %v3455_v19, %v3454_v14 }
 0xe5c   :  { %v5768_v29 = vpop.eup %5767 }
 0xe5d   :  { %v3104_v24 = vmul.f32 %v5768_v29, %v3103_v41 }
 0xe5f   :  { %v3105_v27 = vadd.f32 %v3104_v24, %v2028_v18 }
 0xe61   :  { %5769 = vtanh.f32 %v3105_v27 }
 0xe62   :  { %5771 = vrcp.f32 %v3100_v7 }
 0xe6b   :  { %v5770_v30 = vpop.eup %5769 }
 0xe6c   :  { %v3107_v62 = vsub.f32 %v7155_v36, %v5770_v30  ;;  %v5772_v5 = vpop.eup %5771  ;;  %v3449_v36 = vld [vmem:[%s7321_s9 + $0x48] sm:$0xff] }
 0xe6d   :  { %v5555_v37 = vpack.c.bf16 %v3449_v36, %v3448_v0 }
 0xe6e   :  { %v3108_v47 = vmul.f32 %v5772_v5, %v3107_v62 }
 0xe70   :  { %v3109_v46 = vadd.f32 %v5770_v30, %v3108_v47 }
 0xe72   :  { %3178 = vmatmul.mubr.f32.vlgmr.msra.gmra.mrb[28].mxu0 %v3109_v46  ;;  %4502 = vmatmul.mubr.f32.vlgmr.msra.gmra.mrb[44].mxu1 %v3109_v46 }
 0xe73   :  { %5489 = vmatpush1.bf16.msra.mxu0 %v6676_v17  ;;  %5520 = vmatpush3.bf16.msra.mxu1 %v6792_v50  ;;  %v2033_v50 = vadd.f32 %v6951_v45, %v6970_v28 }
 0xe74   :  { %5491 = vmatprep.subr.bf16.mxu0 %v6686_v9  ;;  %5521 = vmatprep.subr.bf16.mxu1 %v5795_v48 }
 0xe75   :  { %3342 = vmatprep.mubr.f32.mxu0 %v5794_v3  ;;  %4536 = vmatprep.mubr.msk.f32.mxu1 %vm5796_vm1, %v5794_v3 }
 0xe77   :  { %5493 = vmatpush1.bf16.msra.mxu0 %v6694_v16  ;;  %5523 = vmatpush3.bf16.msra.mxu1 %v6821_v1 }
 0xe78   :  { %5495 = vmatprep.subr.bf16.mxu0 %v6704_v31  ;;  %5524 = vmatprep.subr.bf16.mxu1 %v5795_v48 }
 0xe7b   :  { %5497 = vmatpush1.bf16.msra.mxu0 %v6712_v42  ;;  %5526 = vmatpush3.bf16.msra.mxu1 %v6836_v25 }
 0xe7c   :  { %5499 = vmatprep.subr.bf16.mxu0 %v6722_v53  ;;  %5527 = vmatprep.subr.bf16.mxu1 %v5795_v48 }
 0xe7f   :  { %5501 = vmatpush1.bf16.msra.mxu0 %v6730_v63  ;;  %5529 = vmatpush3.bf16.msra.mxu1 %v6842_v6 }
 0xe80   :  { %5503 = vmatprep.subr.bf16.mxu0 %v6740_v10  ;;  %5530 = vmatprep.subr.bf16.mxu1 %v5795_v48 }
 0xe83   :  { %5505 = vmatpush1.bf16.msra.mxu0 %v6748_v21  ;;  %5532 = vmatpush3.bf16.msra.mxu1 %v6852_v22 }
 0xe84   :  { %5507 = vmatprep.subr.bf16.mxu0 %v6758_v34  ;;  %5533 = vmatprep.subr.bf16.mxu1 %v5795_v48 }
 0xe87   :  { %5509 = vmatpush1.bf16.msra.mxu0 %v6766_v20  ;;  %5535 = vmatpush3.bf16.msra.mxu1 %v6862_v40 }
 0xe88   :  { %5511 = vmatprep.subr.bf16.mxu0 %v6778_v59  ;;  %5536 = vmatprep.subr.bf16.mxu1 %v5795_v48 }
 0xe8b   :  { %5513 = vmatpush1.bf16.msra.mxu0 %v6790_v38  ;;  %5538 = vmatpush3.bf16.msra.mxu1 %v6872_v56 }
 0xe8c   :  { %5515 = vmatprep.subr.bf16.mxu0 %v6804_v43  ;;  %5539 = vmatprep.subr.bf16.mxu1 %v5795_v48 }
 0xe8f   :  { %5517 = vmatpush1.bf16.msra.mxu0 %v6812_v60  ;;  %5541 = vmatpush3.bf16.msra.mxu1 %v6882_v8  ;;  %v3440_v8 = vld [vmem:[%s7321_s9] sm:$0xff] }
 0xe90   :  { %5542 = vmatprep.subr.bf16.mxu0 %v5795_v48  ;;  %v5543_v45 = vpack.c.bf16 %v3441_v54, %v3440_v8 }
 0xf45   :  { %v3179_v17 = vpop.f32.mrb[28].mxu0  ;;  %v3250_v9 = vpop.f32.mrb[44].mxu1 }
 0xf46   :  { %v5594_v16 = vadd.f32 %v3179_v17, %v6955_v51  ;;  %v3181_v31 = vpop.f32.mrb[29].mxu0  ;;  %v4503_v42 = vpop.f32.mrb[45].mxu1  ;;  %v3268_v59 = vadd.f32 %v6966_v52, %v3250_v9  ;;  %v2038_v17 = vadd.f32 %v6949_v33, %v6970_v28 }
 0xf47   :  { %v5595_v63 = vadd.f32 %v3181_v31, %v6960_v55 }
 0xf48   :  { %v3591_v53 = vmul.f32 -1.442695, %v5594_v16 }
 0xf49   :  { %v3592_v10 = vmul.f32 -1.442695, %v5595_v63 }
 0xf4a   :  { %5773 = vpow2.f32 %v3591_v53 }
 0xf4b   :  { %5775 = vpow2.f32 %v3592_v10 }
 0xf54   :  { %v5774_v21 = vpop.eup %5773 }
 0xf55   :  { %v3258_v34 = vadd.f32 1.0, %v5774_v21  ;;  %v5776_v20 = vpop.eup %5775 }
 0xf56   :  { %v3265_v1 = vadd.f32 1.0, %v5776_v20 }
 0xf57   :  { %5777 = vrcp.f32 %v3258_v34 }
 0xf61   :  { %v5778_v38 = vpop.eup %5777 }
 0xf62   :  { %v3269_v43 = vmul.f32 %v5778_v38, %v3268_v59 }
 0xf64   :  { %v3270_v60 = vadd.f32 %v3269_v43, %v2033_v50 }
 0xf66   :  { %5779 = vtanh.f32 %v3270_v60 }
 0xf67   :  { %5781 = vrcp.f32 %v3265_v1 }
 0xf70   :  { %v5780_v25 = vpop.eup %5779 }
 0xf71   :  { %v3272_v6 = vsub.f32 %v3109_v46, %v5780_v25  ;;  %v5782_v22 = vpop.eup %5781 }
 0xf73   :  { %v3273_v40 = vmul.f32 %v5782_v22, %v3272_v6 }
 0xf75   :  { %v7239_v56 = vadd.f32 %v5780_v25, %v3273_v40 }
 0xf77   :  { %3343 = vmatmul.mubr.f32.vlgmr.msra.gmra.mrb[30].mxu0 %v7239_v56  ;;  %4537 = vmatmul.mubr.f32.vlgmr.msra.gmra.mrb[46].mxu1 %v7239_v56 }
 0xf78   :  { %4571 = vmatprep.mubr.msk.f32.mxu0 %vm5796_vm1, %v5794_v3  ;;  %5544 = vmatpush3.bf16.msra.mxu0 %v5543_v45  ;;  %v3443_v3 = vld [vmem:[%s7321_s9 + $0x18] sm:$0xff] }
 0xf79   :  { %5545 = vmatprep.subr.bf16.mxu0 %v5795_v48  ;;  %v5546_v57 = vpack.c.bf16 %v3443_v3, %v3442_v49 }
 0xf7c   :  { %5547 = vmatpush3.bf16.msra.mxu0 %v5546_v57 }
 0xf7d   :  { %5548 = vmatprep.subr.bf16.mxu0 %v5795_v48 }
 0xf80   :  { %5550 = vmatpush3.bf16.msra.mxu0 %v5549_v12 }
 0xf81   :  { %5551 = vmatprep.subr.bf16.mxu0 %v5795_v48 }
 0xf84   :  { %5553 = vmatpush3.bf16.msra.mxu0 %v5552_v15 }
 0xf85   :  { %5554 = vmatprep.subr.bf16.mxu0 %v5795_v48 }
 0xf88   :  { %5556 = vmatpush3.bf16.msra.mxu0 %v5555_v37 }
 0xf89   :  { %5557 = vmatprep.subr.bf16.mxu0 %v5795_v48 }
 0xf8c   :  { %5559 = vmatpush3.bf16.msra.mxu0 %v5558_v23 }
 0xf8d   :  { %5560 = vmatprep.subr.bf16.mxu0 %v5795_v48 }
 0xf90   :  { %5562 = vmatpush3.bf16.msra.mxu0 %v5561_v2 }
 0xf91   :  { %5563 = vmatprep.subr.bf16.mxu0 %v5795_v48 }
 0xf94   :  { %5565 = vmatpush3.bf16.msra.mxu0 %v5564_v44 }
0x104a   :  { %v3344_v26 = vpop.f32.mrb[30].mxu0  ;;  %v3415_v41 = vpop.f32.mrb[46].mxu1 }
0x104b   :  { %v5596_v29 = vadd.f32 %v3344_v26, %v6955_v51  ;;  %v3346_v18 = vpop.f32.mrb[31].mxu0  ;;  %v4538_v24 = vpop.f32.mrb[47].mxu1  ;;  %v3433_v46 = vadd.f32 %v6966_v52, %v3415_v41  ;;  %v3595_v52 = vld [vmem:[%s7322_s10] ss:$0 sm:$0xff] }
0x104c   :  { %v5597_v7 = vadd.f32 %v3346_v18, %v6960_v55 }
0x104d   :  { %v3593_v27 = vmul.f32 -1.442695, %v5596_v29 }
0x104e   :  { %v3594_v30 = vmul.f32 -1.442695, %v5597_v7 }
0x104f   :  { %5783 = vpow2.f32 %v3593_v27 }
0x1050   :  { %5785 = vpow2.f32 %v3594_v30 }
0x1059   :  { %v5784_v62 = vpop.eup %5783 }
0x105a   :  { %v3423_v5 = vadd.f32 1.0, %v5784_v62  ;;  %v5786_v47 = vpop.eup %5785 }
0x105b   :  { %v3430_v16 = vadd.f32 1.0, %v5786_v47 }
0x105c   :  { %5787 = vrcp.f32 %v3423_v5 }
0x1066   :  { %v5788_v48 = vpop.eup %5787 }
0x1067   :  { %v3434_v9 = vmul.f32 %v5788_v48, %v3433_v46 }
0x1069   :  { %v3435_v51 = vadd.f32 %v3434_v9, %v2038_v17 }
0x106b   :  { %5789 = vtanh.f32 %v3435_v51 }
0x106c   :  { %5791 = vrcp.f32 %v3430_v16 }
0x1075   :  { %v5790_v31 = vpop.eup %5789 }
0x1076   :  { %v3437_v55 = vsub.f32 %v7239_v56, %v5790_v31  ;;  %v5792_v42 = vpop.eup %5791 }
0x1078   :  { %v3438_v53 = vmul.f32 %v5792_v42, %v3437_v55 }
0x107a   :  { %v3439_v63 = vadd.f32 %v5790_v31, %v3438_v53 }
0x107c   :  { %4572 = vmatmul.mubr.f32.vlgmr.msra.gmra.mrb[32].mxu0 %v3439_v63 }
0x114f   :  { %v3529_v10 = vpop.f32.mrb[32].mxu0 }
0x1150   :  { %v3530_v21 = vadd.f32 %v3595_v52, %v3529_v10  ;;  %v4573_v34 = vpop.f32.mrb[33].mxu0 }
0x1152   :  { %3533 = vst [vmem:[%s7323_s11] sm:$0xff] %v3530_v21 }

</bundles_post_ra>
